<compile_context>
chip_gen: v7x
topology: tpu7x:2x2x1
jax: 0.10.0
libtpu: 0.0.40
codegen_flags: <defaults>
</compile_context>

<pallas_src>
import functools

import jax
import jax.numpy as jnp
from jax.experimental import pallas as pl
from jax.experimental.pallas import tpu as pltpu

EPS = 1e-5
_TAP_GS = (-1, 0, 1)   # packed-group shift order; must match the weight packer


def _ode_layer_kernel(x_ref, w1_ref, b1_ref, a1_ref, w2_ref, b2_ref, a2_ref,
                      o_ref, scr_ref, *, H, W, C, pack, pad):
    G = W // pack            # packed groups per image row
    R = H * G                # packed rows (= H*W / pack)
    L = pack * C             # lane width (128)
    inv_hw = 1.0 / float(H * W)

    # Zero the halo rows of the padded scratch (H-direction zero padding).
    scr_ref[0:pad, :] = jnp.zeros((pad, L), jnp.bfloat16)
    scr_ref[pad + R:pad + R + pad, :] = jnp.zeros((pad, L), jnp.bfloat16)

    # Row-validity masks for cross-group (W-direction) taps; computed once and
    # reused by both convolutions.
    g_idx = jax.lax.broadcasted_iota(jnp.int32, (R, 1), 0) % G
    m_prev = g_idx > 0          # output group has a left neighbour  (w-1 in bounds)
    m_next = g_idx < (G - 1)    # output group has a right neighbour (w+1 in bounds)

    def instance_norm(v):
        # Per-channel mean / biased variance over all H*W positions (matches
        # nn.InstanceNorm2d, eps=1e-5, affine=False).  Each channel lives on
        # `pack` lane slots; the cross-slot combine uses static XLU lane
        # rotations on the canonical (R, L) f32 layout.
        vs, v2s = v, v * v
        for p in range(1, pack):
            rv = pltpu.roll(v, shift=p * C, axis=1)
            vs = vs + rv
            v2s = v2s + rv * rv
        s1 = jnp.sum(vs, axis=0, keepdims=True)     # (1, L) channel sums, bcast over slots
        s2 = jnp.sum(v2s, axis=0, keepdims=True)
        mean = s1 * inv_hw
        var = s2 * inv_hw - mean * mean
        return (v - mean) * jax.lax.rsqrt(var + EPS)

    def conv3x3_prelu(v, w_ref, b_ref, a_ref):
        # bf16 activations go into the halo scratch; each of the 9 taps is a
        # static row-shifted lane-dense (R, L) slice matmul'ed on the MXU against
        # a packed (L, L) bf16 weight (f32 accumulation).  Cross-group W shifts
        # are encoded in the packed weight blocks plus the m_prev / m_next masks.
        scr_ref[pad:pad + R, :] = v.astype(jnp.bfloat16)
        acc = jnp.zeros((R, L), jnp.float32)
        k = 0
        for dy in range(3):
            for gs in _TAP_GS:
                shift = (dy - 1) * G + gs
                tap = scr_ref[pad + shift:pad + shift + R, :]      # (R, L) bf16
                if gs == -1:
                    tap = jnp.where(m_prev, tap, jnp.zeros_like(tap))
                elif gs == 1:
                    tap = jnp.where(m_next, tap, jnp.zeros_like(tap))
                acc = acc + jnp.dot(tap, w_ref[k],
                                    preferred_element_type=jnp.float32)
                k += 1
        acc = acc + b_ref[...]                                     # (1, L) bias
        a = a_ref[...]                                             # (1, L) PReLU slope
        return jnp.where(acc > 0, acc, a * acc)

    x = x_ref[0]                                                   # (R, L) f32
    h = instance_norm(x)
    h = conv3x3_prelu(h, w1_ref, b1_ref, a1_ref)
    h = instance_norm(h)
    h = conv3x3_prelu(h, w2_ref, b2_ref, a2_ref)
    o_ref[0] = h.astype(o_ref.dtype)


def _pack_conv_weight(w_hwio, pack):
    """(3, 3, Cin, Cout) conv weight -> (9, pack*Cin, pack*Cout) bf16 packed taps.

    Tap k corresponds to (dy, gs) with dy in 0..2 (row shift dy-1) and gs in
    _TAP_GS (packed-group shift); block (p_in, p_out) of tap (dy, gs) carries the
    original Cin x Cout tap W[dy, dx] with dx = gs*pack + p_in - p_out + 1 when
    0 <= dx <= 2 and is zero otherwise.
    """
    kh, kw, ci, co = w_hwio.shape
    assert kh == 3 and kw == 3
    mats = []
    for dy in range(kh):
        for gs in _TAP_GS:
            m = jnp.zeros((pack * ci, pack * co), jnp.float32)
            if gs == 0:
                for p_out in range(pack):
                    for s in (-1, 0, 1):
                        p_in = p_out + s
                        if 0 <= p_in < pack:
                            m = m.at[p_in * ci:(p_in + 1) * ci,
                                     p_out * co:(p_out + 1) * co].set(w_hwio[dy, s + 1])
            elif gs == -1:   # input = last slot of the previous group, dx = -1
                m = m.at[(pack - 1) * ci:pack * ci, 0:co].set(w_hwio[dy, 0])
            else:            # gs == +1: input = slot 0 of the next group, dx = +1
                m = m.at[0:ci, (pack - 1) * co:pack * co].set(w_hwio[dy, 2])
            mats.append(m)
    return jnp.stack(mats).astype(jnp.bfloat16)


def ode_layer_forward(x_nchw, params, t=None):
    """Pallas forward. x_nchw: (N, C, H, W) float32 -> (N, C, H, W).
    `t` (the ODE time variable) is accepted for interface parity and ignored,
    exactly like the torch module's forward."""
    del t
    w1, b1, a1, w2, b2, a2 = params          # w*: (3,3,Cin,Cout); b*, a*: (1,C)
    N, C, H, W = x_nchw.shape
    assert 128 % C == 0, "channel count must divide 128"
    pack = 128 // C                           # spatial positions packed per vreg row
    assert W % pack == 0
    G = W // pack
    R = H * G
    L = pack * C
    assert R % 8 == 0
    pad = max(16, ((G + 1 + 15) // 16) * 16)  # halo rows, 16-aligned for bf16 tiling

    # NCHW -> NHWC -> lane-packed (N, H*G, pack*C). In an ODE-solver loop the packed
    # layout should be kept across calls instead of re-converting every step.
    x = jnp.transpose(x_nchw, (0, 2, 3, 1)).reshape(N, R, L).astype(jnp.float32)

    w1p = _pack_conv_weight(w1, pack)                                        # (9, L, L)
    w2p = _pack_conv_weight(w2, pack)
    b1p = jnp.tile(jnp.reshape(b1, (1, C)), (1, pack)).astype(jnp.float32)   # (1, L)
    b2p = jnp.tile(jnp.reshape(b2, (1, C)), (1, pack)).astype(jnp.float32)
    a1p = jnp.tile(jnp.reshape(a1, (1, C)), (1, pack)).astype(jnp.float32)
    a2p = jnp.tile(jnp.reshape(a2, (1, C)), (1, pack)).astype(jnp.float32)

    kernel = functools.partial(_ode_layer_kernel, H=H, W=W, C=C, pack=pack, pad=pad)

    out_packed = pl.pallas_call(
        kernel,
        out_shape=jax.ShapeDtypeStruct((N, R, L), jnp.float32),
        grid=(N,),
        in_specs=[
            pl.BlockSpec((1, R, L), lambda n: (n, 0, 0)),
            pl.BlockSpec((9, L, L), lambda n: (0, 0, 0)),
            pl.BlockSpec((1, L), lambda n: (0, 0)),
            pl.BlockSpec((1, L), lambda n: (0, 0)),
            pl.BlockSpec((9, L, L), lambda n: (0, 0, 0)),
            pl.BlockSpec((1, L), lambda n: (0, 0)),
            pl.BlockSpec((1, L), lambda n: (0, 0)),
        ],
        out_specs=pl.BlockSpec((1, R, L), lambda n: (n, 0, 0)),
        scratch_shapes=[pltpu.VMEM((R + 2 * pad, L), jnp.bfloat16)],
        compiler_params=pltpu.CompilerParams(dimension_semantics=("parallel",)),
    )(x, w1p, b1p, a1p, w2p, b2p, a2p)

    out = out_packed.reshape(N, H, W, C)
    return jnp.transpose(out, (0, 3, 1, 2))   # NHWC -> NCHW


def init_params(key, channels=32, kh=3, kw=3):
    """Deterministic params matching ODELayer._init_weights:
    Xavier-uniform conv weights, zero biases, PReLU slopes init=0.0."""
    k1, k2 = jax.random.split(key)
    fan_in = channels * kh * kw
    fan_out = channels * kh * kw
    bound = (6.0 / (fan_in + fan_out)) ** 0.5

    def xavier(k):
        # PyTorch conv weight layout (Cout, Cin, kh, kw) -> kernel layout (kh, kw, Cin, Cout)
        w_torch = jax.random.uniform(
            k, (channels, channels, kh, kw), jnp.float32, minval=-bound, maxval=bound
        )
        return jnp.transpose(w_torch, (2, 3, 1, 0))

    w1 = xavier(k1)
    w2 = xavier(k2)
    b1 = jnp.zeros((1, channels), jnp.float32)
    b2 = jnp.zeros((1, channels), jnp.float32)
    a1 = jnp.zeros((1, channels), jnp.float32)       # PReLU init=0.0
    a2 = jnp.zeros((1, channels), jnp.float32)
    return (w1, b1, a1, w2, b2, a2)


def ref_forward(x_nchw, params):
    """Pure-JAX f32 reference (mirrors the torch module) for the correctness check."""
    w1, b1, a1, w2, b2, a2 = params

    def inorm(v):
        m = v.mean(axis=(2, 3), keepdims=True)
        var = v.var(axis=(2, 3), keepdims=True)
        return (v - m) / jnp.sqrt(var + EPS)

    def conv(v, w, b):
        out = jax.lax.conv_general_dilated(
            v, w, (1, 1), "SAME",
            dimension_numbers=("NCHW", "HWIO", "NCHW"),
            precision=jax.lax.Precision.HIGHEST,
        )
        return out + b.reshape(1, -1, 1, 1)

    def prelu(v, a):
        return jnp.where(v > 0, v, a.reshape(1, -1, 1, 1) * v)

    h = inorm(x_nchw)
    h = conv(h, w1, b1)
    h = prelu(h, a1)
    h = inorm(h)
    h = conv(h, w2, b2)
    h = prelu(h, a2)
    return h


if __name__ == "__main__":
    key = jax.random.PRNGKey(0)
    kx, kp = jax.random.split(key)

    N, C, H, W = 2, 32, 16, 16                       # channels fixed to 32 by the module
    x = jax.random.normal(kx, (N, C, H, W), jnp.float32)
    t = jnp.zeros(())                                # unused ODE time variable
    params = init_params(kp, channels=C)

    fwd = jax.jit(ode_layer_forward)
    out = jax.block_until_ready(fwd(x, params))

    ref = jax.block_until_ready(ref_forward(x, params))
    assert out.shape == (N, C, H, W)
    # bf16 MXU inputs with f32 accumulation -> bf16-class tolerance vs. the f32 ref.
    assert jnp.allclose(out, ref, atol=3e-2, rtol=3e-2), float(jnp.abs(out - ref).max())

    print("KERNEL_OK")
</pallas_src>

<mosaic_0001>
module attributes {stable_mosaic.version = 11 : i64} {
  func.func @_ode_layer_kernel(%arg0: i32, %arg1: memref<1x64x128xf32, #tpu.memory_space<vmem>>, %arg2: memref<9x128x128xbf16, #tpu.memory_space<vmem>>, %arg3: memref<1x128xf32, #tpu.memory_space<vmem>>, %arg4: memref<1x128xf32, #tpu.memory_space<vmem>>, %arg5: memref<9x128x128xbf16, #tpu.memory_space<vmem>>, %arg6: memref<1x128xf32, #tpu.memory_space<vmem>>, %arg7: memref<1x128xf32, #tpu.memory_space<vmem>>, %arg8: memref<1x64x128xf32, #tpu.memory_space<vmem>>, %arg9: memref<96x128xbf16, #tpu.memory_space<vmem>>) attributes {dimension_semantics = [#tpu.dimension_semantics<parallel>], iteration_bounds = array<i64: 2>, scalar_prefetch = 0 : i64, scratch_operands = 1 : i64, tpu.core_type = #tpu.core_type<tc>, window_params = [{transform_indices = @transform_0, window_bounds = array<i64: 1, 64, 128>}, {pipeline_mode = #tpu.pipeline_mode<synchronous>, transform_indices = @transform_1, window_bounds = array<i64: 9, 128, 128>}, {pipeline_mode = #tpu.pipeline_mode<synchronous>, transform_indices = @transform_2, window_bounds = array<i64: 1, 128>}, {pipeline_mode = #tpu.pipeline_mode<synchronous>, transform_indices = @transform_3, window_bounds = array<i64: 1, 128>}, {pipeline_mode = #tpu.pipeline_mode<synchronous>, transform_indices = @transform_4, window_bounds = array<i64: 9, 128, 128>}, {pipeline_mode = #tpu.pipeline_mode<synchronous>, transform_indices = @transform_5, window_bounds = array<i64: 1, 128>}, {pipeline_mode = #tpu.pipeline_mode<synchronous>, transform_indices = @transform_6, window_bounds = array<i64: 1, 128>}, {transform_indices = @transform_7, window_bounds = array<i64: 1, 64, 128>}]} {
    %cst = arith.constant 0.000000e+00 : bf16
    %0 = vector.broadcast %cst : bf16 to vector<16x128xbf16>
    %c0 = arith.constant 0 : index
    %c0_0 = arith.constant 0 : index
    %1 = vector.load %arg9[%c0, %c0_0] : memref<96x128xbf16, #tpu.memory_space<vmem>>, vector<16x128xbf16>
    tpu.vector_store %arg9[%c0, %c0_0], %0 {strides = array<i32>} : memref<96x128xbf16, #tpu.memory_space<vmem>>, vector<16x128xbf16>,
    %cst_1 = arith.constant 0.000000e+00 : bf16
    %2 = vector.broadcast %cst_1 : bf16 to vector<16x128xbf16>
    %c80 = arith.constant 80 : index
    %c0_2 = arith.constant 0 : index
    %3 = vector.load %arg9[%c80, %c0_2] : memref<96x128xbf16, #tpu.memory_space<vmem>>, vector<16x128xbf16>
    tpu.vector_store %arg9[%c80, %c0_2], %2 {strides = array<i32>} : memref<96x128xbf16, #tpu.memory_space<vmem>>, vector<16x128xbf16>,
    %4 = tpu.iota {dimensions = array<i32: 0>} : vector<64x1xi32>
    %c4_i32 = arith.constant 4 : i32
    %c0_i32 = arith.constant 0 : i32
    %5 = arith.cmpi eq, %c4_i32, %c0_i32 : i32
    %c1_i32 = arith.constant 1 : i32
    %6 = arith.select %5, %c1_i32, %c4_i32 : i32
    %7 = vector.broadcast %6 : i32 to vector<64x1xi32>
    %8 = arith.remsi %4, %7 : vector<64x1xi32>
    %c0_i32_3 = arith.constant 0 : i32
    %9 = vector.broadcast %c0_i32_3 : i32 to vector<64x1xi32>
    %10 = arith.cmpi ne, %8, %9 : vector<64x1xi32>
    %c0_i32_4 = arith.constant 0 : i32
    %11 = vector.broadcast %c0_i32_4 : i32 to vector<64x1xi32>
    %12 = arith.cmpi slt, %8, %11 : vector<64x1xi32>
    %c0_i32_5 = arith.constant 0 : i32
    %13 = arith.cmpi slt, %6, %c0_i32_5 : i32
    %14 = vector.broadcast %13 : i1 to vector<64x1xi1>
    %15 = vector.broadcast %14 : vector<64x1xi1> to vector<64x1xi1>
    %16 = arith.xori %12, %15 : vector<64x1xi1>
    %17 = arith.andi %16, %10 : vector<64x1xi1>
    %18 = vector.broadcast %6 : i32 to vector<64x1xi32>
    %19 = arith.addi %8, %18 : vector<64x1xi32>
    %20 = arith.select %17, %19, %8 : vector<64x1xi1>, vector<64x1xi32>
    %c0_i32_6 = arith.constant 0 : i32
    %21 = vector.broadcast %c0_i32_6 : i32 to vector<64x1xi32>
    %22 = arith.cmpi sgt, %20, %21 : vector<64x1xi32>
    %c3_i32 = arith.constant 3 : i32
    %23 = vector.broadcast %c3_i32 : i32 to vector<64x1xi32>
    %24 = arith.cmpi slt, %20, %23 : vector<64x1xi32>
    %c0_7 = arith.constant 0 : index
    %c0_8 = arith.constant 0 : index
    %c0_9 = arith.constant 0 : index
    %25 = vector.load %arg1[%c0_7, %c0_8, %c0_9] : memref<1x64x128xf32, #tpu.memory_space<vmem>>, vector<1x64x128xf32>
    %26 = vector.shape_cast %25 : vector<1x64x128xf32> to vector<64x128xf32>
    %27 = arith.mulf %26, %26 : vector<64x128xf32>
    %c32_i32 = arith.constant 32 : i32
    %28 = tpu.dynamic_rotate %26 by %c32_i32 dim 1 : vector<64x128xf32>, i32 -> vector<64x128xf32>
    %29 = arith.addf %26, %28 : vector<64x128xf32>
    %30 = arith.mulf %28, %28 : vector<64x128xf32>
    %31 = arith.addf %27, %30 : vector<64x128xf32>
    %c64_i32 = arith.constant 64 : i32
    %32 = tpu.dynamic_rotate %26 by %c64_i32 dim 1 : vector<64x128xf32>, i32 -> vector<64x128xf32>
    %33 = arith.addf %29, %32 : vector<64x128xf32>
    %34 = arith.mulf %32, %32 : vector<64x128xf32>
    %35 = arith.addf %31, %34 : vector<64x128xf32>
    %c96_i32 = arith.constant 96 : i32
    %36 = tpu.dynamic_rotate %26 by %c96_i32 dim 1 : vector<64x128xf32>, i32 -> vector<64x128xf32>
    %37 = arith.addf %33, %36 : vector<64x128xf32>
    %38 = arith.mulf %36, %36 : vector<64x128xf32>
    %39 = arith.addf %35, %38 : vector<64x128xf32>
    %cst_10 = arith.constant dense<0.000000e+00> : vector<128xf32>
    %40 = vector.multi_reduction <add>, %37, %cst_10 [0] : vector<64x128xf32> to vector<128xf32>
    %41 = vector.shape_cast %40 : vector<128xf32> to vector<1x128xf32>
    %cst_11 = arith.constant dense<0.000000e+00> : vector<128xf32>
    %42 = vector.multi_reduction <add>, %39, %cst_11 [0] : vector<64x128xf32> to vector<128xf32>
    %43 = vector.shape_cast %42 : vector<128xf32> to vector<1x128xf32>
    %cst_12 = arith.constant 3.906250e-03 : f32
    %44 = vector.broadcast %cst_12 : f32 to vector<1x128xf32>
    %45 = arith.mulf %41, %44 : vector<1x128xf32>
    %cst_13 = arith.constant 3.906250e-03 : f32
    %46 = vector.broadcast %cst_13 : f32 to vector<1x128xf32>
    %47 = arith.mulf %43, %46 : vector<1x128xf32>
    %48 = arith.mulf %45, %45 : vector<1x128xf32>
    %49 = arith.subf %47, %48 : vector<1x128xf32>
    %50 = vector.broadcast %45 : vector<1x128xf32> to vector<64x128xf32>
    %51 = arith.subf %26, %50 : vector<64x128xf32>
    %cst_14 = arith.constant 9.99999974E-6 : f32
    %52 = vector.broadcast %cst_14 : f32 to vector<1x128xf32>
    %53 = arith.addf %49, %52 : vector<1x128xf32>
    %54 = math.rsqrt %53 : vector<1x128xf32>
    %55 = vector.broadcast %54 : vector<1x128xf32> to vector<64x128xf32>
    %56 = arith.mulf %51, %55 : vector<64x128xf32>
    %57 = arith.truncf %56 : vector<64x128xf32> to vector<64x128xbf16>
    %c16 = arith.constant 16 : index
    %c0_15 = arith.constant 0 : index
    %58 = vector.load %arg9[%c16, %c0_15] : memref<96x128xbf16, #tpu.memory_space<vmem>>, vector<64x128xbf16>
    tpu.vector_store %arg9[%c16, %c0_15], %57 {strides = array<i32>} : memref<96x128xbf16, #tpu.memory_space<vmem>>, vector<64x128xbf16>,
    %cst_16 = arith.constant 0.000000e+00 : f32
    %59 = vector.broadcast %cst_16 : f32 to vector<64x128xf32>
    %c11 = arith.constant 11 : index
    %c0_17 = arith.constant 0 : index
    %60 = vector.load %arg9[%c11, %c0_17] : memref<96x128xbf16, #tpu.memory_space<vmem>>, vector<64x128xbf16>
    %cst_18 = arith.constant 0.000000e+00 : bf16
    %61 = vector.broadcast %cst_18 : bf16 to vector<64x128xbf16>
    %62 = vector.shape_cast %22 : vector<64x1xi1> to vector<64x1xi1>
    %63 = vector.broadcast %62 : vector<64x1xi1> to vector<64x128xi1>
    %64 = arith.select %63, %60, %61 : vector<64x128xi1>, vector<64x128xbf16>
    %c0_19 = arith.constant 0 : index
    %c0_20 = arith.constant 0 : index
    %c0_21 = arith.constant 0 : index
    %65 = vector.load %arg2[%c0_19, %c0_20, %c0_21] : memref<9x128x128xbf16, #tpu.memory_space<vmem>>, vector<1x128x128xbf16>
    %66 = vector.shape_cast %65 : vector<1x128x128xbf16> to vector<128x128xbf16>
    %cst_22 = arith.constant dense<0.000000e+00> : vector<64x128xf32>
    %67 = tpu.matmul %64, %66, %cst_22 {dimension_numbers = #tpu.dot_dimension_numbers<[1], [0], [0], [1], [0, 0, 1, 1], [], []>} : vector<64x128xbf16>, vector<128x128xbf16>, vector<64x128xf32> -> vector<64x128xf32>
    %68 = arith.addf %59, %67 : vector<64x128xf32>
    %c12 = arith.constant 12 : index
    %c0_23 = arith.constant 0 : index
    %69 = vector.load %arg9[%c12, %c0_23] : memref<96x128xbf16, #tpu.memory_space<vmem>>, vector<64x128xbf16>
    %c1 = arith.constant 1 : index
    %c0_24 = arith.constant 0 : index
    %c0_25 = arith.constant 0 : index
    %70 = vector.load %arg2[%c1, %c0_24, %c0_25] : memref<9x128x128xbf16, #tpu.memory_space<vmem>>, vector<1x128x128xbf16>
    %71 = vector.shape_cast %70 : vector<1x128x128xbf16> to vector<128x128xbf16>
    %cst_26 = arith.constant dense<0.000000e+00> : vector<64x128xf32>
    %72 = tpu.matmul %69, %71, %cst_26 {dimension_numbers = #tpu.dot_dimension_numbers<[1], [0], [0], [1], [0, 0, 1, 1], [], []>} : vector<64x128xbf16>, vector<128x128xbf16>, vector<64x128xf32> -> vector<64x128xf32>
    %73 = arith.addf %68, %72 : vector<64x128xf32>
    %c13 = arith.constant 13 : index
    %c0_27 = arith.constant 0 : index
    %74 = vector.load %arg9[%c13, %c0_27] : memref<96x128xbf16, #tpu.memory_space<vmem>>, vector<64x128xbf16>
    %cst_28 = arith.constant 0.000000e+00 : bf16
    %75 = vector.broadcast %cst_28 : bf16 to vector<64x128xbf16>
    %76 = vector.shape_cast %24 : vector<64x1xi1> to vector<64x1xi1>
    %77 = vector.broadcast %76 : vector<64x1xi1> to vector<64x128xi1>
    %78 = arith.select %77, %74, %75 : vector<64x128xi1>, vector<64x128xbf16>
    %c2 = arith.constant 2 : index
    %c0_29 = arith.constant 0 : index
    %c0_30 = arith.constant 0 : index
    %79 = vector.load %arg2[%c2, %c0_29, %c0_30] : memref<9x128x128xbf16, #tpu.memory_space<vmem>>, vector<1x128x128xbf16>
    %80 = vector.shape_cast %79 : vector<1x128x128xbf16> to vector<128x128xbf16>
    %cst_31 = arith.constant dense<0.000000e+00> : vector<64x128xf32>
    %81 = tpu.matmul %78, %80, %cst_31 {dimension_numbers = #tpu.dot_dimension_numbers<[1], [0], [0], [1], [0, 0, 1, 1], [], []>} : vector<64x128xbf16>, vector<128x128xbf16>, vector<64x128xf32> -> vector<64x128xf32>
    %82 = arith.addf %73, %81 : vector<64x128xf32>
    %c15 = arith.constant 15 : index
    %c0_32 = arith.constant 0 : index
    %83 = vector.load %arg9[%c15, %c0_32] : memref<96x128xbf16, #tpu.memory_space<vmem>>, vector<64x128xbf16>
    %cst_33 = arith.constant 0.000000e+00 : bf16
    %84 = vector.broadcast %cst_33 : bf16 to vector<64x128xbf16>
    %85 = vector.shape_cast %22 : vector<64x1xi1> to vector<64x1xi1>
    %86 = vector.broadcast %85 : vector<64x1xi1> to vector<64x128xi1>
    %87 = arith.select %86, %83, %84 : vector<64x128xi1>, vector<64x128xbf16>
    %c3 = arith.constant 3 : index
    %c0_34 = arith.constant 0 : index
    %c0_35 = arith.constant 0 : index
    %88 = vector.load %arg2[%c3, %c0_34, %c0_35] : memref<9x128x128xbf16, #tpu.memory_space<vmem>>, vector<1x128x128xbf16>
    %89 = vector.shape_cast %88 : vector<1x128x128xbf16> to vector<128x128xbf16>
    %cst_36 = arith.constant dense<0.000000e+00> : vector<64x128xf32>
    %90 = tpu.matmul %87, %89, %cst_36 {dimension_numbers = #tpu.dot_dimension_numbers<[1], [0], [0], [1], [0, 0, 1, 1], [], []>} : vector<64x128xbf16>, vector<128x128xbf16>, vector<64x128xf32> -> vector<64x128xf32>
    %91 = arith.addf %82, %90 : vector<64x128xf32>
    %c16_37 = arith.constant 16 : index
    %c0_38 = arith.constant 0 : index
    %92 = vector.load %arg9[%c16_37, %c0_38] : memref<96x128xbf16, #tpu.memory_space<vmem>>, vector<64x128xbf16>
    %c4 = arith.constant 4 : index
    %c0_39 = arith.constant 0 : index
    %c0_40 = arith.constant 0 : index
    %93 = vector.load %arg2[%c4, %c0_39, %c0_40] : memref<9x128x128xbf16, #tpu.memory_space<vmem>>, vector<1x128x128xbf16>
    %94 = vector.shape_cast %93 : vector<1x128x128xbf16> to vector<128x128xbf16>
    %cst_41 = arith.constant dense<0.000000e+00> : vector<64x128xf32>
    %95 = tpu.matmul %92, %94, %cst_41 {dimension_numbers = #tpu.dot_dimension_numbers<[1], [0], [0], [1], [0, 0, 1, 1], [], []>} : vector<64x128xbf16>, vector<128x128xbf16>, vector<64x128xf32> -> vector<64x128xf32>
    %96 = arith.addf %91, %95 : vector<64x128xf32>
    %c17 = arith.constant 17 : index
    %c0_42 = arith.constant 0 : index
    %97 = vector.load %arg9[%c17, %c0_42] : memref<96x128xbf16, #tpu.memory_space<vmem>>, vector<64x128xbf16>
    %cst_43 = arith.constant 0.000000e+00 : bf16
    %98 = vector.broadcast %cst_43 : bf16 to vector<64x128xbf16>
    %99 = vector.shape_cast %24 : vector<64x1xi1> to vector<64x1xi1>
    %100 = vector.broadcast %99 : vector<64x1xi1> to vector<64x128xi1>
    %101 = arith.select %100, %97, %98 : vector<64x128xi1>, vector<64x128xbf16>
    %c5 = arith.constant 5 : index
    %c0_44 = arith.constant 0 : index
    %c0_45 = arith.constant 0 : index
    %102 = vector.load %arg2[%c5, %c0_44, %c0_45] : memref<9x128x128xbf16, #tpu.memory_space<vmem>>, vector<1x128x128xbf16>
    %103 = vector.shape_cast %102 : vector<1x128x128xbf16> to vector<128x128xbf16>
    %cst_46 = arith.constant dense<0.000000e+00> : vector<64x128xf32>
    %104 = tpu.matmul %101, %103, %cst_46 {dimension_numbers = #tpu.dot_dimension_numbers<[1], [0], [0], [1], [0, 0, 1, 1], [], []>} : vector<64x128xbf16>, vector<128x128xbf16>, vector<64x128xf32> -> vector<64x128xf32>
    %105 = arith.addf %96, %104 : vector<64x128xf32>
    %c19 = arith.constant 19 : index
    %c0_47 = arith.constant 0 : index
    %106 = vector.load %arg9[%c19, %c0_47] : memref<96x128xbf16, #tpu.memory_space<vmem>>, vector<64x128xbf16>
    %cst_48 = arith.constant 0.000000e+00 : bf16
    %107 = vector.broadcast %cst_48 : bf16 to vector<64x128xbf16>
    %108 = vector.shape_cast %22 : vector<64x1xi1> to vector<64x1xi1>
    %109 = vector.broadcast %108 : vector<64x1xi1> to vector<64x128xi1>
    %110 = arith.select %109, %106, %107 : vector<64x128xi1>, vector<64x128xbf16>
    %c6 = arith.constant 6 : index
    %c0_49 = arith.constant 0 : index
    %c0_50 = arith.constant 0 : index
    %111 = vector.load %arg2[%c6, %c0_49, %c0_50] : memref<9x128x128xbf16, #tpu.memory_space<vmem>>, vector<1x128x128xbf16>
    %112 = vector.shape_cast %111 : vector<1x128x128xbf16> to vector<128x128xbf16>
    %cst_51 = arith.constant dense<0.000000e+00> : vector<64x128xf32>
    %113 = tpu.matmul %110, %112, %cst_51 {dimension_numbers = #tpu.dot_dimension_numbers<[1], [0], [0], [1], [0, 0, 1, 1], [], []>} : vector<64x128xbf16>, vector<128x128xbf16>, vector<64x128xf32> -> vector<64x128xf32>
    %114 = arith.addf %105, %113 : vector<64x128xf32>
    %c20 = arith.constant 20 : index
    %c0_52 = arith.constant 0 : index
    %115 = vector.load %arg9[%c20, %c0_52] : memref<96x128xbf16, #tpu.memory_space<vmem>>, vector<64x128xbf16>
    %c7 = arith.constant 7 : index
    %c0_53 = arith.constant 0 : index
    %c0_54 = arith.constant 0 : index
    %116 = vector.load %arg2[%c7, %c0_53, %c0_54] : memref<9x128x128xbf16, #tpu.memory_space<vmem>>, vector<1x128x128xbf16>
    %117 = vector.shape_cast %116 : vector<1x128x128xbf16> to vector<128x128xbf16>
    %cst_55 = arith.constant dense<0.000000e+00> : vector<64x128xf32>
    %118 = tpu.matmul %115, %117, %cst_55 {dimension_numbers = #tpu.dot_dimension_numbers<[1], [0], [0], [1], [0, 0, 1, 1], [], []>} : vector<64x128xbf16>, vector<128x128xbf16>, vector<64x128xf32> -> vector<64x128xf32>
    %119 = arith.addf %114, %118 : vector<64x128xf32>
    %c21 = arith.constant 21 : index
    %c0_56 = arith.constant 0 : index
    %120 = vector.load %arg9[%c21, %c0_56] : memref<96x128xbf16, #tpu.memory_space<vmem>>, vector<64x128xbf16>
    %cst_57 = arith.constant 0.000000e+00 : bf16
    %121 = vector.broadcast %cst_57 : bf16 to vector<64x128xbf16>
    %122 = vector.shape_cast %24 : vector<64x1xi1> to vector<64x1xi1>
    %123 = vector.broadcast %122 : vector<64x1xi1> to vector<64x128xi1>
    %124 = arith.select %123, %120, %121 : vector<64x128xi1>, vector<64x128xbf16>
    %c8 = arith.constant 8 : index
    %c0_58 = arith.constant 0 : index
    %c0_59 = arith.constant 0 : index
    %125 = vector.load %arg2[%c8, %c0_58, %c0_59] : memref<9x128x128xbf16, #tpu.memory_space<vmem>>, vector<1x128x128xbf16>
    %126 = vector.shape_cast %125 : vector<1x128x128xbf16> to vector<128x128xbf16>
    %cst_60 = arith.constant dense<0.000000e+00> : vector<64x128xf32>
    %127 = tpu.matmul %124, %126, %cst_60 {dimension_numbers = #tpu.dot_dimension_numbers<[1], [0], [0], [1], [0, 0, 1, 1], [], []>} : vector<64x128xbf16>, vector<128x128xbf16>, vector<64x128xf32> -> vector<64x128xf32>
    %128 = arith.addf %119, %127 : vector<64x128xf32>
    %c0_61 = arith.constant 0 : index
    %c0_62 = arith.constant 0 : index
    %129 = vector.load %arg3[%c0_61, %c0_62] : memref<1x128xf32, #tpu.memory_space<vmem>>, vector<1x128xf32>
    %130 = vector.broadcast %129 : vector<1x128xf32> to vector<64x128xf32>
    %131 = arith.addf %128, %130 : vector<64x128xf32>
    %c0_63 = arith.constant 0 : index
    %c0_64 = arith.constant 0 : index
    %132 = vector.load %arg4[%c0_63, %c0_64] : memref<1x128xf32, #tpu.memory_space<vmem>>, vector<1x128xf32>
    %cst_65 = arith.constant 0.000000e+00 : f32
    %133 = vector.broadcast %cst_65 : f32 to vector<64x128xf32>
    %134 = arith.cmpf ogt, %131, %133 : vector<64x128xf32>
    %135 = vector.broadcast %132 : vector<1x128xf32> to vector<64x128xf32>
    %136 = arith.mulf %135, %131 : vector<64x128xf32>
    %137 = arith.select %134, %131, %136 : vector<64x128xi1>, vector<64x128xf32>
    %138 = arith.mulf %137, %137 : vector<64x128xf32>
    %c32_i32_66 = arith.constant 32 : i32
    %139 = tpu.dynamic_rotate %137 by %c32_i32_66 dim 1 : vector<64x128xf32>, i32 -> vector<64x128xf32>
    %140 = arith.addf %137, %139 : vector<64x128xf32>
    %141 = arith.mulf %139, %139 : vector<64x128xf32>
    %142 = arith.addf %138, %141 : vector<64x128xf32>
    %c64_i32_67 = arith.constant 64 : i32
    %143 = tpu.dynamic_rotate %137 by %c64_i32_67 dim 1 : vector<64x128xf32>, i32 -> vector<64x128xf32>
    %144 = arith.addf %140, %143 : vector<64x128xf32>
    %145 = arith.mulf %143, %143 : vector<64x128xf32>
    %146 = arith.addf %142, %145 : vector<64x128xf32>
    %c96_i32_68 = arith.constant 96 : i32
    %147 = tpu.dynamic_rotate %137 by %c96_i32_68 dim 1 : vector<64x128xf32>, i32 -> vector<64x128xf32>
    %148 = arith.addf %144, %147 : vector<64x128xf32>
    %149 = arith.mulf %147, %147 : vector<64x128xf32>
    %150 = arith.addf %146, %149 : vector<64x128xf32>
    %cst_69 = arith.constant dense<0.000000e+00> : vector<128xf32>
    %151 = vector.multi_reduction <add>, %148, %cst_69 [0] : vector<64x128xf32> to vector<128xf32>
    %152 = vector.shape_cast %151 : vector<128xf32> to vector<1x128xf32>
    %cst_70 = arith.constant dense<0.000000e+00> : vector<128xf32>
    %153 = vector.multi_reduction <add>, %150, %cst_70 [0] : vector<64x128xf32> to vector<128xf32>
    %154 = vector.shape_cast %153 : vector<128xf32> to vector<1x128xf32>
    %cst_71 = arith.constant 3.906250e-03 : f32
    %155 = vector.broadcast %cst_71 : f32 to vector<1x128xf32>
    %156 = arith.mulf %152, %155 : vector<1x128xf32>
    %cst_72 = arith.constant 3.906250e-03 : f32
    %157 = vector.broadcast %cst_72 : f32 to vector<1x128xf32>
    %158 = arith.mulf %154, %157 : vector<1x128xf32>
    %159 = arith.mulf %156, %156 : vector<1x128xf32>
    %160 = arith.subf %158, %159 : vector<1x128xf32>
    %161 = vector.broadcast %156 : vector<1x128xf32> to vector<64x128xf32>
    %162 = arith.subf %137, %161 : vector<64x128xf32>
    %cst_73 = arith.constant 9.99999974E-6 : f32
    %163 = vector.broadcast %cst_73 : f32 to vector<1x128xf32>
    %164 = arith.addf %160, %163 : vector<1x128xf32>
    %165 = math.rsqrt %164 : vector<1x128xf32>
    %166 = vector.broadcast %165 : vector<1x128xf32> to vector<64x128xf32>
    %167 = arith.mulf %162, %166 : vector<64x128xf32>
    %168 = arith.truncf %167 : vector<64x128xf32> to vector<64x128xbf16>
    %c16_74 = arith.constant 16 : index
    %c0_75 = arith.constant 0 : index
    %169 = vector.load %arg9[%c16_74, %c0_75] : memref<96x128xbf16, #tpu.memory_space<vmem>>, vector<64x128xbf16>
    tpu.vector_store %arg9[%c16_74, %c0_75], %168 {strides = array<i32>} : memref<96x128xbf16, #tpu.memory_space<vmem>>, vector<64x128xbf16>,
    %cst_76 = arith.constant 0.000000e+00 : f32
    %170 = vector.broadcast %cst_76 : f32 to vector<64x128xf32>
    %c11_77 = arith.constant 11 : index
    %c0_78 = arith.constant 0 : index
    %171 = vector.load %arg9[%c11_77, %c0_78] : memref<96x128xbf16, #tpu.memory_space<vmem>>, vector<64x128xbf16>
    %cst_79 = arith.constant 0.000000e+00 : bf16
    %172 = vector.broadcast %cst_79 : bf16 to vector<64x128xbf16>
    %173 = vector.shape_cast %22 : vector<64x1xi1> to vector<64x1xi1>
    %174 = vector.broadcast %173 : vector<64x1xi1> to vector<64x128xi1>
    %175 = arith.select %174, %171, %172 : vector<64x128xi1>, vector<64x128xbf16>
    %c0_80 = arith.constant 0 : index
    %c0_81 = arith.constant 0 : index
    %c0_82 = arith.constant 0 : index
    %176 = vector.load %arg5[%c0_80, %c0_81, %c0_82] : memref<9x128x128xbf16, #tpu.memory_space<vmem>>, vector<1x128x128xbf16>
    %177 = vector.shape_cast %176 : vector<1x128x128xbf16> to vector<128x128xbf16>
    %cst_83 = arith.constant dense<0.000000e+00> : vector<64x128xf32>
    %178 = tpu.matmul %175, %177, %cst_83 {dimension_numbers = #tpu.dot_dimension_numbers<[1], [0], [0], [1], [0, 0, 1, 1], [], []>} : vector<64x128xbf16>, vector<128x128xbf16>, vector<64x128xf32> -> vector<64x128xf32>
    %179 = arith.addf %170, %178 : vector<64x128xf32>
    %c12_84 = arith.constant 12 : index
    %c0_85 = arith.constant 0 : index
    %180 = vector.load %arg9[%c12_84, %c0_85] : memref<96x128xbf16, #tpu.memory_space<vmem>>, vector<64x128xbf16>
    %c1_86 = arith.constant 1 : index
    %c0_87 = arith.constant 0 : index
    %c0_88 = arith.constant 0 : index
    %181 = vector.load %arg5[%c1_86, %c0_87, %c0_88] : memref<9x128x128xbf16, #tpu.memory_space<vmem>>, vector<1x128x128xbf16>
    %182 = vector.shape_cast %181 : vector<1x128x128xbf16> to vector<128x128xbf16>
    %cst_89 = arith.constant dense<0.000000e+00> : vector<64x128xf32>
    %183 = tpu.matmul %180, %182, %cst_89 {dimension_numbers = #tpu.dot_dimension_numbers<[1], [0], [0], [1], [0, 0, 1, 1], [], []>} : vector<64x128xbf16>, vector<128x128xbf16>, vector<64x128xf32> -> vector<64x128xf32>
    %184 = arith.addf %179, %183 : vector<64x128xf32>
    %c13_90 = arith.constant 13 : index
    %c0_91 = arith.constant 0 : index
    %185 = vector.load %arg9[%c13_90, %c0_91] : memref<96x128xbf16, #tpu.memory_space<vmem>>, vector<64x128xbf16>
    %cst_92 = arith.constant 0.000000e+00 : bf16
    %186 = vector.broadcast %cst_92 : bf16 to vector<64x128xbf16>
    %187 = vector.shape_cast %24 : vector<64x1xi1> to vector<64x1xi1>
    %188 = vector.broadcast %187 : vector<64x1xi1> to vector<64x128xi1>
    %189 = arith.select %188, %185, %186 : vector<64x128xi1>, vector<64x128xbf16>
    %c2_93 = arith.constant 2 : index
    %c0_94 = arith.constant 0 : index
    %c0_95 = arith.constant 0 : index
    %190 = vector.load %arg5[%c2_93, %c0_94, %c0_95] : memref<9x128x128xbf16, #tpu.memory_space<vmem>>, vector<1x128x128xbf16>
    %191 = vector.shape_cast %190 : vector<1x128x128xbf16> to vector<128x128xbf16>
    %cst_96 = arith.constant dense<0.000000e+00> : vector<64x128xf32>
    %192 = tpu.matmul %189, %191, %cst_96 {dimension_numbers = #tpu.dot_dimension_numbers<[1], [0], [0], [1], [0, 0, 1, 1], [], []>} : vector<64x128xbf16>, vector<128x128xbf16>, vector<64x128xf32> -> vector<64x128xf32>
    %193 = arith.addf %184, %192 : vector<64x128xf32>
    %c15_97 = arith.constant 15 : index
    %c0_98 = arith.constant 0 : index
    %194 = vector.load %arg9[%c15_97, %c0_98] : memref<96x128xbf16, #tpu.memory_space<vmem>>, vector<64x128xbf16>
    %cst_99 = arith.constant 0.000000e+00 : bf16
    %195 = vector.broadcast %cst_99 : bf16 to vector<64x128xbf16>
    %196 = vector.shape_cast %22 : vector<64x1xi1> to vector<64x1xi1>
    %197 = vector.broadcast %196 : vector<64x1xi1> to vector<64x128xi1>
    %198 = arith.select %197, %194, %195 : vector<64x128xi1>, vector<64x128xbf16>
    %c3_100 = arith.constant 3 : index
    %c0_101 = arith.constant 0 : index
    %c0_102 = arith.constant 0 : index
    %199 = vector.load %arg5[%c3_100, %c0_101, %c0_102] : memref<9x128x128xbf16, #tpu.memory_space<vmem>>, vector<1x128x128xbf16>
    %200 = vector.shape_cast %199 : vector<1x128x128xbf16> to vector<128x128xbf16>
    %cst_103 = arith.constant dense<0.000000e+00> : vector<64x128xf32>
    %201 = tpu.matmul %198, %200, %cst_103 {dimension_numbers = #tpu.dot_dimension_numbers<[1], [0], [0], [1], [0, 0, 1, 1], [], []>} : vector<64x128xbf16>, vector<128x128xbf16>, vector<64x128xf32> -> vector<64x128xf32>
    %202 = arith.addf %193, %201 : vector<64x128xf32>
    %c16_104 = arith.constant 16 : index
    %c0_105 = arith.constant 0 : index
    %203 = vector.load %arg9[%c16_104, %c0_105] : memref<96x128xbf16, #tpu.memory_space<vmem>>, vector<64x128xbf16>
    %c4_106 = arith.constant 4 : index
    %c0_107 = arith.constant 0 : index
    %c0_108 = arith.constant 0 : index
    %204 = vector.load %arg5[%c4_106, %c0_107, %c0_108] : memref<9x128x128xbf16, #tpu.memory_space<vmem>>, vector<1x128x128xbf16>
    %205 = vector.shape_cast %204 : vector<1x128x128xbf16> to vector<128x128xbf16>
    %cst_109 = arith.constant dense<0.000000e+00> : vector<64x128xf32>
    %206 = tpu.matmul %203, %205, %cst_109 {dimension_numbers = #tpu.dot_dimension_numbers<[1], [0], [0], [1], [0, 0, 1, 1], [], []>} : vector<64x128xbf16>, vector<128x128xbf16>, vector<64x128xf32> -> vector<64x128xf32>
    %207 = arith.addf %202, %206 : vector<64x128xf32>
    %c17_110 = arith.constant 17 : index
    %c0_111 = arith.constant 0 : index
    %208 = vector.load %arg9[%c17_110, %c0_111] : memref<96x128xbf16, #tpu.memory_space<vmem>>, vector<64x128xbf16>
    %cst_112 = arith.constant 0.000000e+00 : bf16
    %209 = vector.broadcast %cst_112 : bf16 to vector<64x128xbf16>
    %210 = vector.shape_cast %24 : vector<64x1xi1> to vector<64x1xi1>
    %211 = vector.broadcast %210 : vector<64x1xi1> to vector<64x128xi1>
    %212 = arith.select %211, %208, %209 : vector<64x128xi1>, vector<64x128xbf16>
    %c5_113 = arith.constant 5 : index
    %c0_114 = arith.constant 0 : index
    %c0_115 = arith.constant 0 : index
    %213 = vector.load %arg5[%c5_113, %c0_114, %c0_115] : memref<9x128x128xbf16, #tpu.memory_space<vmem>>, vector<1x128x128xbf16>
    %214 = vector.shape_cast %213 : vector<1x128x128xbf16> to vector<128x128xbf16>
    %cst_116 = arith.constant dense<0.000000e+00> : vector<64x128xf32>
    %215 = tpu.matmul %212, %214, %cst_116 {dimension_numbers = #tpu.dot_dimension_numbers<[1], [0], [0], [1], [0, 0, 1, 1], [], []>} : vector<64x128xbf16>, vector<128x128xbf16>, vector<64x128xf32> -> vector<64x128xf32>
    %216 = arith.addf %207, %215 : vector<64x128xf32>
    %c19_117 = arith.constant 19 : index
    %c0_118 = arith.constant 0 : index
    %217 = vector.load %arg9[%c19_117, %c0_118] : memref<96x128xbf16, #tpu.memory_space<vmem>>, vector<64x128xbf16>
    %cst_119 = arith.constant 0.000000e+00 : bf16
    %218 = vector.broadcast %cst_119 : bf16 to vector<64x128xbf16>
    %219 = vector.shape_cast %22 : vector<64x1xi1> to vector<64x1xi1>
    %220 = vector.broadcast %219 : vector<64x1xi1> to vector<64x128xi1>
    %221 = arith.select %220, %217, %218 : vector<64x128xi1>, vector<64x128xbf16>
    %c6_120 = arith.constant 6 : index
    %c0_121 = arith.constant 0 : index
    %c0_122 = arith.constant 0 : index
    %222 = vector.load %arg5[%c6_120, %c0_121, %c0_122] : memref<9x128x128xbf16, #tpu.memory_space<vmem>>, vector<1x128x128xbf16>
    %223 = vector.shape_cast %222 : vector<1x128x128xbf16> to vector<128x128xbf16>
    %cst_123 = arith.constant dense<0.000000e+00> : vector<64x128xf32>
    %224 = tpu.matmul %221, %223, %cst_123 {dimension_numbers = #tpu.dot_dimension_numbers<[1], [0], [0], [1], [0, 0, 1, 1], [], []>} : vector<64x128xbf16>, vector<128x128xbf16>, vector<64x128xf32> -> vector<64x128xf32>
    %225 = arith.addf %216, %224 : vector<64x128xf32>
    %c20_124 = arith.constant 20 : index
    %c0_125 = arith.constant 0 : index
    %226 = vector.load %arg9[%c20_124, %c0_125] : memref<96x128xbf16, #tpu.memory_space<vmem>>, vector<64x128xbf16>
    %c7_126 = arith.constant 7 : index
    %c0_127 = arith.constant 0 : index
    %c0_128 = arith.constant 0 : index
    %227 = vector.load %arg5[%c7_126, %c0_127, %c0_128] : memref<9x128x128xbf16, #tpu.memory_space<vmem>>, vector<1x128x128xbf16>
    %228 = vector.shape_cast %227 : vector<1x128x128xbf16> to vector<128x128xbf16>
    %cst_129 = arith.constant dense<0.000000e+00> : vector<64x128xf32>
    %229 = tpu.matmul %226, %228, %cst_129 {dimension_numbers = #tpu.dot_dimension_numbers<[1], [0], [0], [1], [0, 0, 1, 1], [], []>} : vector<64x128xbf16>, vector<128x128xbf16>, vector<64x128xf32> -> vector<64x128xf32>
    %230 = arith.addf %225, %229 : vector<64x128xf32>
    %c21_130 = arith.constant 21 : index
    %c0_131 = arith.constant 0 : index
    %231 = vector.load %arg9[%c21_130, %c0_131] : memref<96x128xbf16, #tpu.memory_space<vmem>>, vector<64x128xbf16>
    %cst_132 = arith.constant 0.000000e+00 : bf16
    %232 = vector.broadcast %cst_132 : bf16 to vector<64x128xbf16>
    %233 = vector.shape_cast %24 : vector<64x1xi1> to vector<64x1xi1>
    %234 = vector.broadcast %233 : vector<64x1xi1> to vector<64x128xi1>
    %235 = arith.select %234, %231, %232 : vector<64x128xi1>, vector<64x128xbf16>
    %c8_133 = arith.constant 8 : index
    %c0_134 = arith.constant 0 : index
    %c0_135 = arith.constant 0 : index
    %236 = vector.load %arg5[%c8_133, %c0_134, %c0_135] : memref<9x128x128xbf16, #tpu.memory_space<vmem>>, vector<1x128x128xbf16>
    %237 = vector.shape_cast %236 : vector<1x128x128xbf16> to vector<128x128xbf16>
    %cst_136 = arith.constant dense<0.000000e+00> : vector<64x128xf32>
    %238 = tpu.matmul %235, %237, %cst_136 {dimension_numbers = #tpu.dot_dimension_numbers<[1], [0], [0], [1], [0, 0, 1, 1], [], []>} : vector<64x128xbf16>, vector<128x128xbf16>, vector<64x128xf32> -> vector<64x128xf32>
    %239 = arith.addf %230, %238 : vector<64x128xf32>
    %c0_137 = arith.constant 0 : index
    %c0_138 = arith.constant 0 : index
    %240 = vector.load %arg6[%c0_137, %c0_138] : memref<1x128xf32, #tpu.memory_space<vmem>>, vector<1x128xf32>
    %241 = vector.broadcast %240 : vector<1x128xf32> to vector<64x128xf32>
    %242 = arith.addf %239, %241 : vector<64x128xf32>
    %c0_139 = arith.constant 0 : index
    %c0_140 = arith.constant 0 : index
    %243 = vector.load %arg7[%c0_139, %c0_140] : memref<1x128xf32, #tpu.memory_space<vmem>>, vector<1x128xf32>
    %cst_141 = arith.constant 0.000000e+00 : f32
    %244 = vector.broadcast %cst_141 : f32 to vector<64x128xf32>
    %245 = arith.cmpf ogt, %242, %244 : vector<64x128xf32>
    %246 = vector.broadcast %243 : vector<1x128xf32> to vector<64x128xf32>
    %247 = arith.mulf %246, %242 : vector<64x128xf32>
    %248 = arith.select %245, %242, %247 : vector<64x128xi1>, vector<64x128xf32>
    %c0_142 = arith.constant 0 : index
    %c0_143 = arith.constant 0 : index
    %c0_144 = arith.constant 0 : index
    %249 = vector.load %arg8[%c0_142, %c0_143, %c0_144] : memref<1x64x128xf32, #tpu.memory_space<vmem>>, vector<1x64x128xf32>
    %250 = vector.shape_cast %249 : vector<1x64x128xf32> to vector<64x128xf32>
    %251 = vector.shape_cast %248 : vector<64x128xf32> to vector<1x64x128xf32>
    tpu.vector_store %arg8[%c0_142, %c0_143, %c0_144], %251 {strides = array<i32>} : memref<1x64x128xf32, #tpu.memory_space<vmem>>, vector<1x64x128xf32>,
    return
  }
  func.func @transform_0(%arg0: i32) -> (i32, i32, i32) {
    %c0_i32 = arith.constant 0 : i32
    %c0_i32_0 = arith.constant 0 : i32
    %c0_i32_1 = arith.constant 0 : i32
    return %arg0, %c0_i32, %c0_i32_0 : i32, i32, i32
  }
  func.func @transform_1(%arg0: i32) -> (i32, i32, i32) {
    %c0_i32 = arith.constant 0 : i32
    %c0_i32_0 = arith.constant 0 : i32
    %c0_i32_1 = arith.constant 0 : i32
    %c0_i32_2 = arith.constant 0 : i32
    return %c0_i32, %c0_i32_0, %c0_i32_1 : i32, i32, i32
  }
  func.func @transform_2(%arg0: i32) -> (i32, i32) {
    %c0_i32 = arith.constant 0 : i32
    %c0_i32_0 = arith.constant 0 : i32
    %c0_i32_1 = arith.constant 0 : i32
    return %c0_i32, %c0_i32_0 : i32, i32
  }
  func.func @transform_3(%arg0: i32) -> (i32, i32) {
    %c0_i32 = arith.constant 0 : i32
    %c0_i32_0 = arith.constant 0 : i32
    %c0_i32_1 = arith.constant 0 : i32
    return %c0_i32, %c0_i32_0 : i32, i32
  }
  func.func @transform_4(%arg0: i32) -> (i32, i32, i32) {
    %c0_i32 = arith.constant 0 : i32
    %c0_i32_0 = arith.constant 0 : i32
    %c0_i32_1 = arith.constant 0 : i32
    %c0_i32_2 = arith.constant 0 : i32
    return %c0_i32, %c0_i32_0, %c0_i32_1 : i32, i32, i32
  }
  func.func @transform_5(%arg0: i32) -> (i32, i32) {
    %c0_i32 = arith.constant 0 : i32
    %c0_i32_0 = arith.constant 0 : i32
    %c0_i32_1 = arith.constant 0 : i32
    return %c0_i32, %c0_i32_0 : i32, i32
  }
  func.func @transform_6(%arg0: i32) -> (i32, i32) {
    %c0_i32 = arith.constant 0 : i32
    %c0_i32_0 = arith.constant 0 : i32
    %c0_i32_1 = arith.constant 0 : i32
    return %c0_i32, %c0_i32_0 : i32, i32
  }
  func.func @transform_7(%arg0: i32) -> (i32, i32, i32) {
    %c0_i32 = arith.constant 0 : i32
    %c0_i32_0 = arith.constant 0 : i32
    %c0_i32_1 = arith.constant 0 : i32
    return %arg0, %c0_i32, %c0_i32_0 : i32, i32, i32
  }
}

</mosaic_0001>

<bundles_post_ra>
// kernel: ode_layer_forward.1
= control target key start
LH: loop header
LB: loop body
LE: loop exit
PB: predicated region body
PF: predicated region fallthrough
CT: control target
= control target key end

     0   :  { %s5767_s24 = smov 0   ;;  %s7146_s0 = inlined_call_operand.vmem [shape: f32[2,64,128], index: 0, kind: input, shape index: {}]   ;;  %s7147_s1 = inlined_call_operand.vmem [shape: bf16[9,128,128], index: 1, kind: input, shape index: {}]   ;;  %s7148_s2 = inlined_call_operand.vmem [shape: f32[1,128], index: 2, kind: input, shape index: {}]   ;;  %s7149_s3 = inlined_call_operand.vmem [shape: f32[1,128], index: 3, kind: input, shape index: {}]   ;;  %s7150_s4 = inlined_call_operand.vmem [shape: bf16[9,128,128], index: 4, kind: input, shape index: {}]   ;;  %s7151_s5 = inlined_call_operand.vmem [shape: f32[1,128], index: 5, kind: input, shape index: {}]   ;;  %s7152_s6 = inlined_call_operand.vmem [shape: f32[1,128], index: 6, kind: input, shape index: {}]   ;;  %s7153_s7 = inlined_call_operand.vmem [shape: f32[2,64,128], index: 7, kind: output, shape index: {}]  }
   0x1 LB: > { %s4346_s25 = sadd.s32 4294967295, %s5721_s24   ;;  %p4350_p0 = scmp.ge.s32.totalorder %s5721_s24, 1  ;;  %s5721_s24 = sphi %s5767_s24, %s17_s24  }
   0x2   : > { %p237_p1 = scmp.lt.s32.totalorder %s5721_s24, 3 }
   0x4   : > { %p238_p2 = pnand %p4350_p0, %p237_p1 }
   0x6   : > { %241 = sbr.rel (%p238_p2) target bundleno = 1385 (0x569), region = 48 }
   0xd   : > { %p269_p3 = scmp.lt.s32.totalorder %s4346_s25, 1  ;;  %s5723_s30 = smov 32   ;;  %v5559_v8 = vld [vmem:[%s7147_s1 + $0x40] sm:$0xff]   ;;  %v5560_v9 = vld [vmem:[%s7147_s1 + $0x48] sm:$0xff]   ;;  %v5561_v10 = vld [vmem:[%s7147_s1 + $0x50] sm:$0xff]   ;;  %v284_v11 = vlaneseq  ;;  %v5726_v17 = vmov 0  }
   0xe   : > { %s5724_s8 = smov 64   ;;  %s5725_s9 = smov 96   ;;  %4987 = vmatprep.subr.bf16.mxu0 %v5559_v8  ;;  %v5562_v12 = vld [vmem:[%s7147_s1 + $0x58] sm:$0xff]   ;;  %v5563_v15 = vld [vmem:[%s7147_s1 + $0x60] sm:$0xff]   ;;  %v5564_v16 = vld [vmem:[%s7147_s1 + $0x68] sm:$0xff]   ;;  %282 = vst [vmem:[#allocation2] sm:$0xff] %v5726_v17 }
   0xf   : > { %s7357_s25 = smov (!%p269_p3, %s4346_s25), 1  ;;  %4988 = vmatpush3.bf16.msra.mxu0 %v5559_v8  ;;  %v285_v13 = vshrl.u32 %v284_v11, 7  ;;  %283 = vst [vmem:[#allocation2 + $0x28] sm:$0xff] %v5726_v17  ;;  %v5565_v23 = vld [vmem:[%s7147_s1 + $0x70] sm:$0xff]   ;;  %v5566_v33 = vld [vmem:[%s7147_s1 + $0x78] sm:$0xff]   ;;  %v5947_v44 = vld [vmem:[%s7147_s1] sm:$0xff]  }
  0x10   : > { %s4769_s26 = sshll.u32 %s7357_s25, 6  ;;  %4989 = vmatprep.subr.bf16.mxu0 %v5560_v9 }
  0x11   : > { %s5783_s29 = scalar_lea.vmem %s7146_s0, %s4769_s26  ;;  %v286_v14 = vadd.s32 8, %v285_v13  ;;  %v297_v18 = vand.u32 3, %v285_v13  ;;  %v287_v19 = vadd.s32 16, %v285_v13  ;;  %v288_v21 = vadd.s32 24, %v285_v13  ;;  %s7133_s12 = scalar_lea.vmem %s7153_s7, %s4769_s26 }
  0x12   : > { %v5786_v0 = vld [vmem:[%s5783_s29 + $0x10] sm:$0xff]  ;;  %v5789_v1 = vld [vmem:[%s5783_s29] sm:$0xff]  ;;  %v5796_v2 = vld [vmem:[%s5783_s29 + $0x8] sm:$0xff]  ;;  %v289_v22 = vadd.s32 32, %v285_v13  ;;  %v290_v24 = vadd.s32 40, %v285_v13  ;;  %v291_v27 = vadd.s32 48, %v285_v13 }
  0x13   : > { %425 = vrot.lane.b32.xlu1 %v5786_v0, %s5723_s30  ;;  %421 = vrot.lane.b32.xlu0 %v5789_v1, %s5723_s30  ;;  %v5799_v3 = vld [vmem:[%s5783_s29 + $0x18] sm:$0xff]  ;;  %v5810_v4 = vld [vmem:[%s5783_s29 + $0x20] sm:$0xff]  ;;  %v304_v20 = vand.u32 3, %v286_v14  ;;  %vm5880_vm0 = vcmp.lt.s32.totalorder %v297_v18, 3  ;;  %v311_v26 = vand.u32 3, %v287_v19  ;;  %v318_v29 = vand.u32 3, %v288_v21 }
  0x14   : > { %v5821_v5 = vld [vmem:[%s5783_s29 + $0x28] sm:$0xff]  ;;  %v5828_v6 = vld [vmem:[%s5783_s29 + $0x30] sm:$0xff]  ;;  %v5839_v7 = vld [vmem:[%s5783_s29 + $0x38] sm:$0xff]  ;;  %4990 = vmatpush3.bf16.msra.mxu0 %v5560_v9  ;;  %v292_v30 = vadd.s32 56, %v285_v13  ;;  %vm5888_vm2 = vcmp.gt.s32.totalorder %v297_v18, 0  ;;  %v325_v32 = vand.u32 3, %v289_v22 }
  0x15   : > { %4991 = vmatprep.subr.bf16.mxu0 %v5561_v10  ;;  %vm5884_vm1 = vcmp.lt.s32.totalorder %v304_v20, 3  ;;  %vm5898_vm4 = vcmp.gt.s32.totalorder %v304_v20, 0  ;;  %v332_v35 = vand.u32 3, %v290_v24  ;;  %vm5905_vm6 = vcmp.gt.s32.totalorder %v311_v26, 0  ;;  %vm618_vm8 = vmpackc.low %vm5888_vm2, %vm5888_vm2 }
  0x16   : > { %v339_v37 = vand.u32 3, %v291_v27  ;;  %vm5909_vm7 = vcmp.gt.s32.totalorder %v318_v29, 0  ;;  %v346_v39 = vand.u32 3, %v292_v30  ;;  %vm619_vm9 = vmpackc.low %vm5898_vm4, %vm5898_vm4  ;;  %vm5919_vm10 = vcmp.gt.s32.totalorder %v325_v32, 0 }
  0x17   : > { %461 = vrot.lane.b32.xlu1 %v5789_v1, %s5724_s8  ;;  %423 = vrot.lane.b32.xlu0 %v5796_v2, %s5723_s30  ;;  %vm620_vm11 = vmpackc.low %vm5905_vm6, %vm5905_vm6  ;;  %vm5926_vm12 = vcmp.gt.s32.totalorder %v332_v35, 0  ;;  %vm5956_vm5 = vcmp.lt.s32.totalorder %v318_v29, 3  ;;  %v626_v47 = vsel %vm618_vm8, 65537, %v5726_v17  ;;  %v627_v48 = vsel %vm619_vm9, 65537, %v5726_v17 }
  0x18   : > { %4992 = vmatpush3.bf16.msra.mxu0 %v5561_v10  ;;  %vm621_vm13 = vmpackc.low %vm5909_vm7, %vm5909_vm7  ;;  %vm5933_vm14 = vcmp.gt.s32.totalorder %v339_v37, 0  ;;  %vm5940_vm4 = vcmp.gt.s32.totalorder %v346_v39, 0  ;;  %vm5952_vm7 = vcmp.lt.s32.totalorder %v311_v26, 3  ;;  %v628_v49 = vsel %vm620_vm11, 65537, %v5726_v17 }
  0x19   : > { %4993 = vmatprep.subr.bf16.mxu0 %v5562_v12  ;;  %v629_v50 = vsel %vm621_vm13, 65537, %v5726_v17  ;;  %vm624_vm6 = vmpackc.low %vm5933_vm14, %vm5933_vm14  ;;  %vm5976_vm3 = vcmp.lt.s32.totalorder %v325_v32, 3  ;;  %vm5989_vm9 = vcmp.lt.s32.totalorder %v332_v35, 3  ;;  %v4355_v55 = vcombine.low %v626_v47, %v627_v48 }
  0x1a   : > { %vm625_vm15 = vmpackc.low %vm5940_vm4, %vm5940_vm4  ;;  %v4356_v56 = vcombine.low %v628_v49, %v629_v50  ;;  %vm6002_vm13 = vcmp.lt.s32.totalorder %v339_v37, 3  ;;  %vm6009_vm8 = vcmp.lt.s32.totalorder %v346_v39, 3  ;;  %v632_v62 = vsel %vm624_vm6, 65537, %v5726_v17 }
  0x1b   : > { %427 = vrot.lane.b32.xlu1 %v5799_v3, %s5723_s30  ;;  %463 = vrot.lane.b32.xlu0 %v5796_v2, %s5724_s8  ;;  %vm7247_vm2 = vmpackc.low %vm5880_vm0, %vm5880_vm0  ;;  %v633_v63 = vsel %vm625_vm15, 65537, %v5726_v17  ;;  %v6043_v8 = vshll.u32 %v4355_v55, 16  ;;  %v6068_v21 = vshrl.u32 %v4355_v55, 16  ;;  %vm7195_vm15 = vsmask.f32 256 }
  0x1c   : > { %4994 = vmatpush3.bf16.msra.mxu0 %v5562_v12  ;;  %v1045_v52 = vsel %vm7247_vm2, 65537, %v5726_v17  ;;  %vm7250_vm11 = vmpackc.low %vm5884_vm1, %vm5884_vm1  ;;  %v6045_v9 = vshll.u32 %v4356_v56, 16  ;;  %v4358_v13 = vcombine.low %v632_v62, %v633_v63  ;;  %v6072_v24 = vshrl.u32 %v4356_v56, 16 }
  0x1d   : > { %4995 = vmatprep.subr.bf16.mxu0 %v5563_v15  ;;  %v1046_v54 = vsel %vm7250_vm11, 65537, %v5726_v17  ;;  %vm1040_vm0 = vmpackc.low %vm5956_vm5, %vm5956_vm5  ;;  %v7155_v22 = vrot.slane %v6043_v8, 1  ;;  %v1846_v55 = vrot.slane %v6043_v8, 7  ;;  %vm7188_vm4 = vsmask.f32 1280 }
  0x1e   : > { %vm1041_vm2 = vmpackc.low %vm5976_vm3, %vm5976_vm3  ;;  %v4391_v61 = vcombine.low %v1045_v52, %v1046_v54  ;;  %v1048_v11 = vsel %vm1040_vm0, 65537, %v5726_v17  ;;  %vm1300_vm3 = vsmask.f32 7424  ;;  %v6076_v26 = vshll.u32 %v4358_v13, 16 }
  0x1f   : > { %501 = vrot.lane.b32.xlu1 %v5789_v1, %s5725_s9  ;;  %465 = vrot.lane.b32.xlu0 %v5786_v0, %s5724_s8  ;;  %vm7255_vm1 = vmpackc.low %vm5919_vm10, %vm5919_vm10  ;;  %v1049_v14 = vsel %vm1041_vm2, 65537, %v5726_v17  ;;  %v6091_v34 = vshrl.u32 %v4358_v13, 16  ;;  %v1845_v54 = vrot.slane %v6068_v21, 6  ;;  %vm858_vm6 = vsmask.f32 2304 }
  0x20   : > { %4996 = vmatpush3.bf16.msra.mxu0 %v5563_v15  ;;  %v630_v59 = vsel %vm7255_vm1, 65537, %v5726_v17  ;;  %vm7256_vm5 = vmpackc.low %vm5926_vm12, %vm5926_vm12  ;;  %v6066_v20 = vshrl.u32 %v4391_v61, 16  ;;  %v6087_v32 = vshll.u32 %v4391_v61, 16  ;;  %v1309_v38 = vrot.slane %v6076_v26, 1 }
  0x21   : > { %4997 = vmatprep.subr.bf16.mxu0 %v5564_v16  ;;  %v631_v60 = vsel %vm7256_vm5, 65537, %v5726_v17  ;;  %vm1042_vm11 = vmpackc.low %vm5989_vm9, %vm5989_vm9  ;;  %v6132_v58 = vor.u32 %v1846_v55, %v1845_v54  ;;  %v1856_v13 = vrot.slane %v6091_v34, 6  ;;  %vm731_vm0 = vcmask 1041408  }
  0x22   : > { %vm1043_vm10 = vmpackc.low %vm6002_vm13, %vm6002_vm13  ;;  %v4357_v12 = vcombine.low %v630_v59, %v631_v60  ;;  %v1050_v15 = vsel %vm1042_vm11, 65537, %v5726_v17  ;;  %v1644_v39 = vrot.slane %v6066_v20, 7  ;;  %v6108_v45 = vor.u32 %v1309_v38, %v6091_v34 }
  0x23   : > { %429 = vrot.lane.b32.xlu1 %v5810_v4, %s5723_s30  ;;  %503 = vrot.lane.b32.xlu0 %v5796_v2, %s5725_s9  ;;  %vm7257_vm12 = vmpackc.low %vm5952_vm7, %vm5952_vm7  ;;  %v1051_v18 = vsel %vm1043_vm10, 65537, %v5726_v17  ;;  %v4393_v27 = vcombine.low %v1049_v14, %v1050_v15  ;;  %7268 = vst [vmem:[#allocation13_spill] sm:$0xff] %v6132_v58  ;;  %v1848_v59 = vrot.slane %v6072_v24, 6  ;;  %v1849_v60 = vrot.slane %v6045_v9, 7 }
  0x24   : > { %4998 = vmatpush3.bf16.msra.mxu0 %v5564_v16  ;;  %v1047_v10 = vsel %vm7257_vm12, 65537, %v5726_v17  ;;  %vm1044_vm14 = vmpackc.low %vm6009_vm8, %vm6009_vm8  ;;  %v6074_v25 = vshll.u32 %v4357_v12, 16  ;;  %7262 = vst [vmem:[#allocation7_spill] sm:$0xff] %v6108_v45  ;;  %v6114_v47 = vor.u32 %v1644_v39, %v6087_v32  ;;  %v1857_v14 = vrot.slane %v6076_v26, 7 }
  0x25   : > { %4999 = vmatprep.subr.bf16.mxu0 %v5565_v23  ;;  %v4392_v16 = vcombine.low %v1047_v10, %v1048_v11  ;;  %v1052_v19 = vsel %vm1044_vm14, 65537, %v5726_v17  ;;  %v1302_v17 = vor.u32 %v7155_v22, %v6068_v21  ;;  %v6094_v36 = vshrl.u32 %v4393_v27, 16 }
  0x26   : > { %v4394_v28 = vcombine.low %v1051_v18, %v1052_v19  ;;  %v1306_v35 = vrot.slane %v6074_v25, 1  ;;  %7264 = vst [vmem:[#allocation9_spill] sm:$0xff] %v6114_v47  ;;  %v6117_v49 = vshll.u32 %v4393_v27, 16  ;;  %v1853_v10 = vrot.slane %v6074_v25, 7 }
  0x27   : > { %505 = vrot.lane.b32.xlu1 %v5786_v0, %s5725_s9  ;;  %467 = vrot.lane.b32.xlu0 %v5799_v3, %s5724_s8  ;;  %v6081_v29 = vshrl.u32 %v4392_v16, 16  ;;  %7259 = vst [vmem:[#allocation4_spill] sm:$0xff] %v6094_v36  ;;  %v6100_v40 = vshll.u32 %v4392_v16, 16  ;;  %v1649_v51 = vrot.slane %v6094_v36, 7  ;;  %v1850_v11 = vor.u32 %v1849_v60, %v1848_v59 }
  0x28   : > { %5000 = vmatpush3.bf16.msra.mxu0 %v5565_v23  ;;  %v1303_v23 = vrot.slane %v6045_v9, 1  ;;  %v6096_v37 = vshrl.u32 %v4394_v28, 16  ;;  %7265 = vst [vmem:[#allocation10_spill] sm:$0xff] %v6117_v49  ;;  %v6119_v50 = vshll.u32 %v4394_v28, 16  ;;  %v2215_v15 = vrot.slane %v6066_v20, 5 }
  0x29   : > { %5001 = vmatprep.subr.bf16.mxu0 %v5566_v33  ;;  %v1646_v43 = vrot.slane %v6081_v29, 7  ;;  %v1650_v56 = vor.u32 %v1649_v51, %v6117_v49  ;;  %v6149_v16 = vsel %vm7188_vm4, %v6132_v58, %v1850_v11  ;;  %v2216_v18 = vrot.slane %v6087_v32, 6 }
  0x2a   : > { %v1305_v30 = vor.u32 %v1303_v23, %v6072_v24  ;;  %v6085_v31 = vsel %vm1300_vm3, %v1302_v17, %v1303_v23  ;;  %7260 = vst [vmem:[#allocation5_spill] sm:$0xff] %v6096_v37  ;;  %7266 = vst [vmem:[#allocation11_spill] sm:$0xff] %v6119_v50  ;;  %v7154_v52 = vrot.slane %v6096_v37, 7  ;;  %v2218_v19 = vrot.slane %v6081_v29, 5 }
  0x2b   : > { %469 = vrot.lane.b32.xlu1 %v5810_v4, %s5724_s8  ;;  %431 = vrot.lane.b32.xlu0 %v5821_v5, %s5723_s30  ;;  %7258 = vst [vmem:[#allocation3_spill] sm:$0xff] %v6085_v31  ;;  %v1647_v48 = vor.u32 %v1646_v43, %v6100_v40  ;;  %v6137_v61 = vsel %vm7195_vm15, %v1646_v43, %v1650_v56  ;;  %7271 = vst [vmem:[#allocation16_spill] sm:$0xff] %v6149_v16  ;;  %v2219_v28 = vrot.slane %v6100_v40, 6  ;;  %vm646_vm7 = vsmask.f32 5376 }
  0x2c   : > { %5002 = vmatpush3.bf16.msra.mxu0 %v5566_v33  ;;  %v6089_v33 = vshrl.u32 %v4357_v12, 16  ;;  %v6103_v41 = vsel %vm1300_vm3, %v1305_v30, %v1306_v35  ;;  %v1653_v57 = vor.u32 %v7154_v52, %v6119_v50  ;;  %7269 = vst [vmem:[#allocation14_spill] sm:$0xff] %v6137_v61  ;;  %v6156_v27 = vor.u32 %v1857_v14, %v1856_v13 }
  0x2d   : > { %5011 = vmatprep.subr.bf16.mxu0 %v5947_v44  ;;  %7261 = vst [vmem:[#allocation6_spill] sm:$0xff] %v6103_v41  ;;  %v6124_v53 = vsel %vm7195_vm15, %v1644_v39, %v1647_v48  ;;  %v6159_v17 = vor.u32 %v2216_v18, %v2215_v15  ;;  %v2222_v30 = vrot.slane %v6094_v36, 5  ;;  %v2223_v39 = vrot.slane %v6117_v49, 6  ;;  %v6198_v49 = vld [vmem:[%s5783_s29 + $0x18] sm:$0xff] }
  0x2e   : > { %v1308_v42 = vor.u32 %v1306_v35, %v6089_v33  ;;  %7267 = vst [vmem:[#allocation12_spill] sm:$0xff] %v6124_v53  ;;  %v6140_v62 = vsel %vm7195_vm15, %v1649_v51, %v1653_v57  ;;  %v1852_v63 = vrot.slane %v6089_v33, 6  ;;  %7273 = vst [vmem:[#allocation18_spill] sm:$0xff] %v6156_v27  ;;  %v2227_v43 = vrot.slane %v6119_v50, 6 }
  0x2f   : > { %433 = vrot.lane.b32.xlu1 %v5828_v6, %s5723_s30  ;;  %507 = vrot.lane.b32.xlu0 %v5799_v3, %s5725_s9  ;;  %7270 = vst [vmem:[#allocation15_spill] sm:$0xff] %v6140_v62  ;;  %7274 = vst [vmem:[#allocation19_spill] sm:$0xff] %v6159_v17  ;;  %v2224_v51 = vor.u32 %v2223_v39, %v2222_v30  ;;  %vm1065_vm1 = vsmask.f32 6400 }
  0x30   : > { %v6111_v46 = vsel %vm1300_vm3, %v1308_v42, %v1309_v38  ;;  %v1854_v12 = vor.u32 %v1853_v10, %v1852_v63  ;;  %v2220_v38 = vor.u32 %v2219_v28, %v2218_v19  ;;  %v2226_v42 = vrot.slane %v6096_v37, 5 }
  0x31   : > { %7263 = vst [vmem:[#allocation8_spill] sm:$0xff] %v6111_v46 }
  0x32   : > { %v6154_v23 = vsel %vm7188_vm4, %v1850_v11, %v1854_v12  ;;  %v6164_v35 = vsel %vm7188_vm4, %v1854_v12, %v6156_v27  ;;  %v6171_v48 = vsel %vm858_vm6, %v6159_v17, %v2220_v38  ;;  %v6173_v54 = vor.u32 %v2227_v43, %v2226_v42 }
  0x33   : > { %509 = vrot.lane.b32.xlu1 %v5810_v4, %s5725_s9  ;;  %471 = vrot.lane.b32.xlu0 %v5821_v5, %s5724_s8  ;;  %7272 = vst [vmem:[#allocation17_spill] sm:$0xff] %v6154_v23  ;;  %7275 = vst [vmem:[#allocation20_spill] sm:$0xff] %v6164_v35  ;;  %v6176_v55 = vsel %vm858_vm6, %v2220_v38, %v2224_v51  ;;  %v413_v38 = vmul.f32 %v5789_v1, %v5789_v1 }
  0x34   : > { %7276 = vst [vmem:[#allocation21_spill] sm:$0xff] %v6171_v48  ;;  %7277 = vst [vmem:[#allocation22_spill] sm:$0xff] %v6173_v54  ;;  %v6180_v56 = vsel %vm858_vm6, %v2224_v51, %v6173_v54  ;;  %v414_v42 = vmul.f32 %v5796_v2, %v5796_v2  ;;  %v415_v51 = vmul.f32 %v5786_v0, %v5786_v0 }
  0x35   : > { %7278 = vst [vmem:[#allocation23_spill] sm:$0xff] %v6176_v55  ;;  %7279 = vst [vmem:[#allocation24_spill] sm:$0xff] %v6180_v56  ;;  %v416_v54 = vmul.f32 %v5799_v3, %v5799_v3  ;;  %v417_v55 = vmul.f32 %v5810_v4, %v5810_v4  ;;  %v418_v35 = vmul.f32 %v5821_v5, %v5821_v5 }
  0x37   : > { %473 = vrot.lane.b32.xlu1 %v5828_v6, %s5724_s8  ;;  %435 = vrot.lane.b32.xlu0 %v5839_v7, %s5723_s30 }
  0x3b   : > { %475 = vrot.lane.b32.xlu1 %v5839_v7, %s5724_s8  ;;  %511 = vrot.lane.b32.xlu0 %v5821_v5, %s5725_s9 }
  0x3f   : > { %515 = vrot.lane.b32.xlu1 %v5839_v7, %s5725_s9  ;;  %513 = vrot.lane.b32.xlu0 %v5828_v6, %s5725_s9 }
  0x85   : > { %v426_v57 = vpop.permute.xlu1 %425  ;;  %v422_v59 = vpop.permute.xlu0 %421 }
  0x86   : > { %v445_v39 = vmul.f32 %v422_v59, %v422_v59  ;;  %v447_v52 = vmul.f32 %v426_v57, %v426_v57  ;;  %v439_v48 = vadd.f32 %v426_v57, %v5786_v0  ;;  %v437_v17 = vadd.f32 %v422_v59, %v5789_v1 }
  0x88   : > { %v453_v58 = vadd.f32 %v445_v39, %v413_v38  ;;  %v455_v53 = vadd.f32 %v447_v52, %v415_v51 }
  0x89   : > { %v462_v60 = vpop.permute.xlu1 %461  ;;  %v424_v63 = vpop.permute.xlu0 %423 }
  0x8a   : > { %v446_v43 = vmul.f32 %v424_v63, %v424_v63  ;;  %v485_v22 = vmul.f32 %v462_v60, %v462_v60  ;;  %v438_v27 = vadd.f32 %v424_v63, %v5796_v2  ;;  %v477_v41 = vadd.f32 %v462_v60, %v437_v17 }
  0x8c   : > { %v454_v62 = vadd.f32 %v446_v43, %v414_v42  ;;  %v493_v0 = vadd.f32 %v485_v22, %v453_v58 }
  0x8d   : > { %v428_v10 = vpop.permute.xlu1 %427  ;;  %v464_v11 = vpop.permute.xlu0 %463 }
  0x8e   : > { %v486_v56 = vmul.f32 %v464_v11, %v464_v11  ;;  %v448_v61 = vmul.f32 %v428_v10, %v428_v10  ;;  %v478_v47 = vadd.f32 %v464_v11, %v438_v27  ;;  %v440_v38 = vadd.f32 %v6198_v49, %v428_v10 }
  0x90   : > { %v494_v57 = vadd.f32 %v486_v56, %v454_v62  ;;  %v456_v39 = vadd.f32 %v448_v61, %v416_v54 }
  0x91   : > { %v502_v12 = vpop.permute.xlu1 %501  ;;  %v466_v13 = vpop.permute.xlu0 %465 }
  0x92   : > { %v525_v3 = vmul.f32 %v502_v12, %v502_v12  ;;  %v487_v45 = vmul.f32 %v466_v13, %v466_v13  ;;  %v479_v59 = vadd.f32 %v466_v13, %v439_v48  ;;  %v517_v42 = vadd.f32 %v502_v12, %v477_v41 }
  0x94   : > { %v533_v52 = vadd.f32 %v525_v3, %v493_v0  ;;  %v495_v27 = vadd.f32 %v487_v45, %v455_v53 }
  0x95   : > { %v430_v14 = vpop.permute.xlu1 %429  ;;  %v504_v15 = vpop.permute.xlu0 %503 }
  0x96   : > { %v526_v46 = vmul.f32 %v504_v15, %v504_v15  ;;  %v449_v1 = vmul.f32 %v430_v14, %v430_v14  ;;  %v518_v2 = vadd.f32 %v504_v15, %v478_v47  ;;  %v441_v11 = vadd.f32 %v430_v14, %v5810_v4 }
  0x97   : > { %v419_v4 = vmul.f32 %v5828_v6, %v5828_v6 }
  0x98   : > { %v534_v17 = vadd.f32 %v526_v46, %v494_v57  ;;  %v457_v58 = vadd.f32 %v449_v1, %v417_v55  ;;  %v541_v56 = vadd.f32 %v518_v2, %v517_v42  ;;  %v420_v2 = vmul.f32 %v5839_v7, %v5839_v7 }
  0x99   : > { %v506_v18 = vpop.permute.xlu1 %505  ;;  %v468_v19 = vpop.permute.xlu0 %467 }
  0x9a   : > { %v527_v63 = vmul.f32 %v506_v18, %v506_v18  ;;  %v488_v31 = vmul.f32 %v468_v19, %v468_v19  ;;  %v519_v22 = vadd.f32 %v506_v18, %v479_v59  ;;  %v480_v62 = vadd.f32 %v468_v19, %v440_v38 }
  0x9b   : > { %v554_v45 = vadd.f32 %v534_v17, %v533_v52 }
  0x9c   : > { %v535_v60 = vadd.f32 %v527_v63, %v495_v27  ;;  %v496_v13 = vadd.f32 %v488_v31, %v456_v39  ;;  %v542_v53 = vadd.f32 %v541_v56, %v519_v22 }
  0x9d   : > { %v470_v28 = vpop.permute.xlu1 %469  ;;  %v432_v30 = vpop.permute.xlu0 %431 }
  0x9e   : > { %v489_v48 = vmul.f32 %v470_v28, %v470_v28  ;;  %v450_v15 = vmul.f32 %v432_v30, %v432_v30  ;;  %v481_v36 = vadd.f32 %v470_v28, %v441_v11  ;;  %v442_v61 = vadd.f32 %v432_v30, %v5821_v5 }
  0x9f   : > { %v555_v18 = vadd.f32 %v554_v45, %v535_v60 }
  0xa0   : > { %v497_v55 = vadd.f32 %v489_v48, %v457_v58  ;;  %v458_v31 = vadd.f32 %v450_v15, %v418_v35 }
  0xa1   : > { %v434_v23 = vpop.permute.xlu1 %433  ;;  %v508_v16 = vpop.permute.xlu0 %507 }
  0xa2   : > { %v528_v47 = vmul.f32 %v508_v16, %v508_v16  ;;  %v520_v41 = vadd.f32 %v508_v16, %v480_v62  ;;  %v443_v19 = vadd.f32 %v434_v23, %v5828_v6  ;;  %v451_v3 = vmul.f32 %v434_v23, %v434_v23 }
  0xa4   : > { %v536_v10 = vadd.f32 %v528_v47, %v496_v13  ;;  %v543_v5 = vadd.f32 %v542_v53, %v520_v41  ;;  %v459_v35 = vadd.f32 %v451_v3, %v419_v4 }
  0xa5   : > { %v510_v50 = vpop.permute.xlu1 %509  ;;  %v472_v37 = vpop.permute.xlu0 %471 }
  0xa6   : > { %v529_v54 = vmul.f32 %v510_v50, %v510_v50  ;;  %v490_v46 = vmul.f32 %v472_v37, %v472_v37  ;;  %v521_v12 = vadd.f32 %v510_v50, %v481_v36  ;;  %v482_v14 = vadd.f32 %v472_v37, %v442_v61 }
  0xa7   : > { %v556_v38 = vadd.f32 %v555_v18, %v536_v10 }
  0xa8   : > { %v537_v16 = vadd.f32 %v529_v54, %v497_v55  ;;  %v498_v1 = vadd.f32 %v490_v46, %v458_v31  ;;  %v544_v36 = vadd.f32 %v543_v5, %v521_v12  ;;  %v650_v5 = vrot.slane %v6068_v21, 2 }
  0xa9   : > { %v474_v43 = vpop.permute.xlu1 %473  ;;  %v436_v51 = vpop.permute.xlu0 %435 }
  0xaa   : > { %v491_v59 = vmul.f32 %v474_v43, %v474_v43  ;;  %v452_v63 = vmul.f32 %v436_v51, %v436_v51  ;;  %v483_v37 = vadd.f32 %v474_v43, %v443_v19  ;;  %v444_v50 = vadd.f32 %v436_v51, %v5839_v7 }
  0xab   : > { %v557_v52 = vadd.f32 %v556_v38, %v537_v16  ;;  %v653_v16 = vrot.slane %v6043_v8, 3 }
  0xac   : > { %v499_v22 = vadd.f32 %v491_v59, %v459_v35  ;;  %v460_v58 = vadd.f32 %v452_v63, %v420_v2  ;;  %v597_v63 = vld [vmem:[#allocation2] sm:$0xe0] }
  0xad   : > { %v476_v28 = vpop.permute.xlu1 %475  ;;  %v512_v0 = vpop.permute.xlu0 %511  ;;  %v6213_v59 = vor.u32 %v653_v16, %v650_v5 }
  0xae   : > { %v522_v30 = vadd.f32 %v512_v0, %v482_v14  ;;  %v530_v57 = vmul.f32 %v512_v0, %v512_v0  ;;  %v492_v6 = vmul.f32 %v476_v28, %v476_v28  ;;  %v484_v27 = vadd.f32 %v476_v28, %v444_v50  ;;  %v5710_v50 = vld [vmem:[%s5783_s29 + $0x10] sm:$0xff] }
  0xaf   : > { %vm682_vm8 = vcmp.ne.s16.totalorder %v6213_v59, 0 }
  0xb0   : > { %v538_v23 = vadd.f32 %v530_v57, %v498_v1  ;;  %v545_v11 = vadd.f32 %v544_v36, %v522_v30  ;;  %v500_v60 = vadd.f32 %v492_v6, %v460_v58  ;;  %v658_v30 = vrot.slane %v6072_v24, 2  ;;  %v5708_v24 = vld [vmem:[%s5783_s29] sm:$0xff]  ;;  %v5709_v36 = vld [vmem:[%s5783_s29 + $0x8] sm:$0xff]  ;;  %v5714_v58 = vld [vmem:[%s5783_s29 + $0x38] sm:$0xff] }
  0xb1   : > { %v516_v39 = vpop.permute.xlu1 %515  ;;  %v514_v42 = vpop.permute.xlu0 %513  ;;  %v661_v57 = vrot.slane %v6045_v9, 3  ;;  %v687_v9 = vsel %vm682_vm8, %v597_v63, 0  ;;  %v676_v63 = vrot.slane %v6091_v34, 2  ;;  %v5571_v34 = vld [vmem:[%s7147_s1 + $0x20] sm:$0xff]  }
  0xb2   : > { %v523_v17 = vadd.f32 %v514_v42, %v483_v37  ;;  %v532_v62 = vmul.f32 %v516_v39, %v516_v39  ;;  %v531_v48 = vmul.f32 %v514_v42, %v514_v42  ;;  %v524_v47 = vadd.f32 %v516_v39, %v484_v27  ;;  %v6230_v39 = vld [vmem:[#allocation2] sm:$0xc0]  ;;  %v5712_v27 = vld [vmem:[%s5783_s29 + $0x28] sm:$0xff] }
  0xb3   : > { %v558_v13 = vadd.f32 %v557_v52, %v538_v23  ;;  %v6215_v2 = vor.u32 %v661_v57, %v658_v30  ;;  %v5711_v42 = vld [vmem:[%s5783_s29 + $0x20] sm:$0xff]  ;;  %v5569_v30 = vld [vmem:[%s7147_s1 + $0x10] sm:$0xff]   ;;  %v667_v57 = vrot.slane %v6089_v33, 2 }
  0xb4   : > { %v546_v56 = vadd.f32 %v545_v11, %v523_v17  ;;  %v539_v15 = vadd.f32 %v531_v48, %v499_v22  ;;  %v540_v7 = vadd.f32 %v532_v62, %v500_v60  ;;  %v5713_v17 = vld [vmem:[%s5783_s29 + $0x30] sm:$0xff] }
  0xb5   : > { %v6220_v21 = vsel %vm646_vm7, %v6213_v59, %v6215_v2 }
  0xb6   : > { %v547_v43 = vadd.f32 %v546_v56, %v524_v47  ;;  %v559_v51 = vadd.f32 %v558_v13, %v539_v15  ;;  %vm683_vm9 = vcmp.ne.s16.totalorder %v6220_v21, 0 }
  0xb8   : > { %v548_v61 = vrot.slane %v547_v43, 4  ;;  %v560_v41 = vadd.f32 %v559_v51, %v540_v7  ;;  %v732_v51 = vrot.slane %v6230_v39, 6 }
  0xba   : > { %v549_v54 = vadd.f32 %v548_v61, %v547_v43  ;;  %v561_v45 = vrot.slane %v560_v41, 4 }
  0xbc   : > { %v550_v53 = vrot.slane %v549_v54, 2  ;;  %v562_v4 = vadd.f32 %v561_v45, %v560_v41  ;;  %v860_v45 = vshrl.u32 %v687_v9, 16 }
  0xbe   : > { %v551_v46 = vadd.f32 %v550_v53, %v549_v54  ;;  %v563_v55 = vrot.slane %v562_v4, 2 }
  0xc0   : > { %v552_v10 = vrot.slane %v551_v46, 1  ;;  %v564_v12 = vadd.f32 %v563_v55, %v562_v4  ;;  %v863_v55 = vshll.u32 %v687_v9, 16  ;;  %v679_v9 = vrot.slane %v6076_v26, 3 }
  0xc1   : > { %v1069_v26 = vrot.slane %v6066_v20, 1  ;;  %v5572_v20 = vld [vmem:[%s7147_s1 + $0x28] sm:$0xff]  }
  0xc2   : > { %v553_v14 = vadd.f32 %v552_v10, %v551_v46  ;;  %v565_v18 = vrot.slane %v564_v12, 1 }
  0xc4   : > { %v567_v31 = vmul.f32 0.00390625, %v553_v14  ;;  %v566_v19 = vadd.f32 %v565_v18, %v564_v12 }
  0xc6   : > { %v569_v3 = vmul.f32 %v567_v31, %v567_v31  ;;  %v568_v28 = vmul.f32 0.00390625, %v566_v19  ;;  %v571_v38 = vsub.f32 %v5708_v24, %v567_v31  ;;  %v572_v37 = vsub.f32 %v5709_v36, %v567_v31  ;;  %v5568_v19 = vld [vmem:[%s7147_s1 + $0x8] sm:$0xff]  }
  0xc7   : > { %v573_v35 = vsub.f32 %v5710_v50, %v567_v31  ;;  %v574_v6 = vsub.f32 %v6198_v49, %v567_v31  ;;  %v575_v52 = vsub.f32 %v5711_v42, %v567_v31  ;;  %v576_v11 = vsub.f32 %v5712_v27, %v567_v31 }
  0xc8   : > { %v570_v0 = vsub.f32 %v568_v28, %v569_v3  ;;  %v577_v22 = vsub.f32 %v5713_v17, %v567_v31  ;;  %v578_v62 = vsub.f32 %v5714_v58, %v567_v31  ;;  %v862_v3 = vrot.slane %v860_v45, 5  ;;  %v5575_v45 = vld [vmem:[%s7147_s1 + $0x80] sm:$0xff]  }
  0xc9   : > { %v1080_v27 = vrot.slane %v6100_v40, 2 }
  0xca   : > { %v579_v1 = vadd.f32 1e-05, %v570_v0  ;;  %v865_v0 = vrot.slane %v863_v55, 6 }
  0xcc   : > { %5703 = vrsqrt.f32 %v579_v1  ;;  %v670_v1 = vrot.slane %v6074_v25, 3 }
  0xce   : > { %v671_v50 = vor.u32 %v670_v1, %v667_v57  ;;  %v5577_v57 = vld [vmem:[%s7147_s1 + $0x90] sm:$0xff]   ;;  %v7280_v1 = vld [vmem:[#allocation4_spill] sm:$0xff] }
  0xd6   : > { %v5704_v23 = vpop.eup %5703 }
  0xd7   : > { %v581_v48 = vmul.f32 %v5704_v23, %v571_v38  ;;  %v582_v47 = vmul.f32 %v5704_v23, %v572_v37  ;;  %v583_v56 = vmul.f32 %v5704_v23, %v573_v35  ;;  %v584_v60 = vmul.f32 %v5704_v23, %v574_v6  ;;  %v5570_v37 = vld [vmem:[%s7147_s1 + $0x18] sm:$0xff]  }
  0xd8   : > { %v585_v13 = vmul.f32 %v5704_v23, %v575_v52  ;;  %v586_v15 = vmul.f32 %v5704_v23, %v576_v11  ;;  %v587_v43 = vmul.f32 %v5704_v23, %v577_v22  ;;  %v588_v7 = vmul.f32 %v5704_v23, %v578_v62  ;;  %v5573_v11 = vld [vmem:[%s7147_s1 + $0x30] sm:$0xff]  }
  0xd9   : > { %v6236_v49 = vpack.c.bf16 %v582_v47, %v581_v48  ;;  %v6239_v61 = vpack.c.bf16 %v584_v60, %v583_v56  ;;  %v866_v38 = vor.u32 %v865_v0, %v862_v3  ;;  %v6273_v35 = vor.u32 %v679_v9, %v676_v63  ;;  %v5574_v47 = vld [vmem:[%s7147_s1 + $0x38] sm:$0xff]   ;;  %v7281_v9 = vld [vmem:[#allocation10_spill] sm:$0xff] }
  0xda   : > { %v6241_v41 = vpack.c.bf16 %v586_v15, %v585_v13  ;;  %v6243_v54 = vpack.c.bf16 %v588_v7, %v587_v43  ;;  %v6283_v6 = vsel %vm646_vm7, %v6215_v2, %v671_v50  ;;  %v1072_v23 = vrot.slane %v6087_v32, 2 }
  0xdb   : > { %593 = vst [vmem:[#allocation2 + $0x8] sm:$0xff] %v6236_v49  ;;  %v733_v53 = vrot.slane %v6236_v49, 6  ;;  %v735_v4 = vrot.slane %v6239_v61, 6  ;;  %v688_v46 = vsel %vm683_vm9, %v6236_v49, 0  ;;  %v6288_v42 = vsel %vm646_vm7, %v671_v50, %v6273_v35 }
  0xdc   : > { %v737_v10 = vrot.slane %v6241_v41, 6  ;;  %596 = vst [vmem:[#allocation2 + $0x20] sm:$0xff] %v6243_v54  ;;  %v868_v12 = vshrl.u32 %v688_v46, 16  ;;  %v871_v14 = vshll.u32 %v688_v46, 16  ;;  %v1077_v52 = vrot.slane %v6081_v29, 1 }
  0xdd   : > { %v734_v18 = vsel %vm731_vm0, %v732_v51, %v733_v53  ;;  %v736_v31 = vsel %vm731_vm0, %v733_v53, %v735_v4  ;;  %vm684_vm13 = vcmp.ne.s16.totalorder %v6283_v6, 0  ;;  %vm685_vm2 = vcmp.ne.s16.totalorder %v6288_v42, 0  ;;  %v5646_v6 = vld [vmem:[%s7150_s4 + $0x38] sm:$0xff]  }
  0xde   : > { %5003 = vmatprep.mubr.bf16.mxu0 %v734_v18  ;;  %v738_v28 = vsel %vm731_vm0, %v735_v4, %v737_v10  ;;  %v870_v5 = vrot.slane %v868_v12, 5  ;;  %v873_v16 = vrot.slane %v871_v14, 6  ;;  %v6297_v2 = vor.u32 %v1072_v23, %v1069_v26  ;;  %v5576_v18 = vld [vmem:[%s7147_s1 + $0x88] sm:$0xff]   ;;  %v5578_v26 = vld [vmem:[%s7147_s1 + $0x98] sm:$0xff]  }
  0xdf   : > { %5004 = vmatmul.mubr.bf16.vlgmr.msra.gmra.mrb[0].mxu0 %v736_v31  ;;  %v6299_v32 = vor.u32 %v1080_v27, %v1077_v52  ;;  %v689_v29 = vsel %vm684_vm13, %v6239_v61, 0  ;;  %v690_v40 = vsel %vm685_vm2, %v6241_v41, 0  ;;  %vm686_vm11 = vcmp.ne.s16.totalorder %v6273_v35, 0 }
  0xe0   : > { %5012 = vmatpush3.bf16.msra.mxu0 %v5947_v44  ;;  %5007 = vmatprep.mubr.bf16.mxu0 %v738_v28  ;;  %v6267_v36 = vor.u32 %v873_v16, %v870_v5  ;;  %v877_v17 = vshrl.u32 %v689_v29, 16  ;;  %v880_v22 = vshll.u32 %v689_v29, 16  ;;  %v886_v62 = vshrl.u32 %v690_v40, 16 }
  0xe1   : > { %5013 = vmatprep.subr.bf16.mxu0 %v5568_v19  ;;  %v6313_v58 = vsel %vm1065_vm1, %v6297_v2, %v6299_v32  ;;  %v889_v48 = vshll.u32 %v690_v40, 16  ;;  %vm1101_vm5 = vcmp.ne.s16.totalorder %v6297_v2, 0  ;;  %v1086_v63 = vrot.slane %v7280_v1, 1  ;;  %v5585_v1 = vld [vmem:[%s7147_s1 + $0xd0] sm:$0xff]  }
  0xe2   : > { %v875_v25 = vsel %vm858_vm6, %v866_v38, %v6267_v36  ;;  %vm7183_vm10 = vcmp.ne.s16.totalorder %v6313_v58, 0  ;;  %v879_v56 = vrot.slane %v877_v17, 5  ;;  %v882_v60 = vrot.slane %v880_v22, 6  ;;  %v5581_v22 = vld [vmem:[%s7147_s1 + $0xb0] sm:$0xff]  }
  0xe3   : > { %v601_v24 = vld [vmem:[#allocation2 + $0x20] sm:$0x3f]  ;;  %v1106_v13 = vsel %vm1101_vm5, %v6230_v39, 0  ;;  %v888_v15 = vrot.slane %v886_v62, 5  ;;  %v891_v43 = vrot.slane %v889_v48, 6  ;;  %v1107_v51 = vsel %vm7183_vm10, %v6236_v49, 0 }
  0xe4   : > { %5014 = vmatpush3.bf16.msra.mxu0 %v5568_v19  ;;  %v739_v44 = vrot.slane %v601_v24, 6  ;;  %v691_v7 = vsel %vm686_vm11, %v601_v24, 0  ;;  %v1130_v53 = vshrl.u32 %v1106_v13, 16  ;;  %v883_v4 = vor.u32 %v882_v60, %v879_v56  ;;  %v1020_v60 = vld [vmem:[#allocation2 + $0x20] sm:$0x7f] }
  0xe5   : > { %5015 = vmatprep.subr.bf16.mxu0 %v5569_v30  ;;  %v895_v46 = vshrl.u32 %v691_v7, 16  ;;  %v898_v55 = vshll.u32 %v691_v7, 16  ;;  %v1133_v39 = vshll.u32 %v1106_v13, 16  ;;  %v1138_v12 = vshrl.u32 %v1107_v51, 16  ;;  %v5582_v13 = vld [vmem:[%s7147_s1 + $0xb8] sm:$0xff]  }
  0xe6   : > { %v740_v33 = vsel %vm731_vm0, %v737_v10, %v739_v44  ;;  %v892_v10 = vor.u32 %v891_v43, %v888_v15  ;;  %v1141_v14 = vshll.u32 %v1107_v51, 16  ;;  %v1132_v31 = vrot.slane %v1130_v53, 6  ;;  %v7284_v15 = vld [vmem:[#allocation3_spill] sm:$0xff] }
  0xe7   : > { %5008 = vmatmul.mubr.bf16.gmra.mrb[4].mxu0 %v740_v33  ;;  %v884_v19 = vsel %vm858_vm6, %v6267_v36, %v883_v4  ;;  %v897_v3 = vrot.slane %v895_v46, 5  ;;  %v900_v28 = vrot.slane %v898_v55, 6  ;;  %v1135_v0 = vrot.slane %v1133_v39, 7  ;;  %v7282_v36 = vld [vmem:[#allocation5_spill] sm:$0xff] }
  0xe8   : > { %5016 = vmatpush3.bf16.msra.mxu0 %v5569_v30  ;;  %5027 = vmatprep.mubr.bf16.mxu0 %v875_v25  ;;  %v893_v5 = vsel %vm858_vm6, %v883_v4, %v892_v10  ;;  %v1140_v16 = vrot.slane %v1138_v12, 6  ;;  %v1143_v30 = vrot.slane %v1141_v14, 7  ;;  %v1089_v24 = vrot.slane %v7281_v9, 2  ;;  %v5583_v46 = vld [vmem:[%s7147_s1 + $0xc0] sm:$0xff]  }
  0xe9   : > { %5017 = vmatprep.subr.bf16.mxu0 %v5570_v37  ;;  %v901_v38 = vor.u32 %v900_v28, %v897_v3  ;;  %v1095_v44 = vrot.slane %v7282_v36, 1  ;;  %v1136_v33 = vor.u32 %v1135_v0, %v1132_v31  ;;  %v1298_v55 = vld [vmem:[#allocation2] sm:$0x80]  ;;  %v7285_v39 = vrot.slane %v6043_v8, 1  ;;  %v5584_v28 = vld [vmem:[%s7147_s1 + $0xc8] sm:$0xff]  }
  0xea   : > { %v1144_v25 = vor.u32 %v1143_v30, %v1140_v16 }
  0xeb   : > { %v902_v23 = vsel %vm858_vm6, %v892_v10, %v901_v38  ;;  %v5657_v10 = vld [vmem:[%s7150_s4 + $0xd0] sm:$0xff]  }
  0xec   : > { %5018 = vmatpush3.bf16.msra.mxu0 %v5570_v37  ;;  %v7283_v37 = vld [vmem:[#allocation11_spill] sm:$0xff]  ;;  %v1145_v27 = vsel %vm7188_vm4, %v1136_v33, %v1144_v25  ;;  %v5587_v33 = vld [vmem:[%s7147_s1 + $0xe0] sm:$0xff]  }
  0xed   : > { %5019 = vmatprep.subr.bf16.mxu0 %v5571_v34  ;;  %v1098_v50 = vrot.slane %v7283_v37, 2 }
  0xef   : > { %v6349_v52 = vor.u32 %v1098_v50, %v1095_v44  ;;  %v5586_v44 = vld [vmem:[%s7147_s1 + $0xd8] sm:$0xff]  }
  0xf0   : > { %5020 = vmatpush3.bf16.msra.mxu0 %v5571_v34  ;;  %v1090_v34 = vor.u32 %v1089_v24, %v1086_v63 }
  0xf1   : > { %5021 = vmatprep.subr.bf16.mxu0 %v5572_v20  ;;  %vm7187_vm10 = vcmp.ne.s16.totalorder %v6349_v52, 0 }
  0xf2   : > { %v6357_v29 = vsel %vm1065_vm1, %v6299_v32, %v1090_v34  ;;  %v6361_v40 = vsel %vm1065_vm1, %v1090_v34, %v6349_v52  ;;  %v1110_v53 = vsel %vm7187_vm10, %v1020_v60, 0  ;;  %v7289_v34 = vld [vmem:[#allocation8_spill] sm:$0xff]  ;;  %v5591_v60 = vld [vmem:[%s7147_s1 + $0x100] sm:$0xff]  }
  0xf3   : > { %vm7185_vm12 = vcmp.ne.s16.totalorder %v6357_v29, 0  ;;  %vm7184_vm14 = vcmp.ne.s16.totalorder %v6361_v40, 0  ;;  %v1165_v14 = vshrl.u32 %v1110_v53, 16  ;;  %vm7190_vm10 = vcmp.ne.s16.totalorder %v7289_v34, 0 }
  0xf4   : > { %5022 = vmatpush3.bf16.msra.mxu0 %v5572_v20  ;;  %v5579_v20 = vld [vmem:[%s7147_s1 + $0xa0] sm:$0xff]   ;;  %v1108_v17 = vsel %vm7185_vm12, %v6239_v61, 0  ;;  %v1109_v32 = vsel %vm7184_vm14, %v6241_v41, 0  ;;  %vm7186_vm14 = vcmp.ne.s16.totalorder %v7284_v15, 0  ;;  %vm6392_vm12 = vcmp.ne.s16.totalorder %v7285_v39, 0  ;;  %v5593_v39 = vld [vmem:[%s7147_s1 + $0x110] sm:$0xff]  }
  0xf5   : > { %5023 = vmatprep.subr.bf16.mxu0 %v5573_v11  ;;  %v1147_v62 = vshrl.u32 %v1108_v17, 16  ;;  %v1150_v48 = vshll.u32 %v1108_v17, 16  ;;  %v1159_v56 = vshll.u32 %v1109_v32, 16  ;;  %v1318_v4 = vsel %vm7186_vm14, %v6236_v49, 0 }
  0xf6   : > { %v1317_v3 = vsel %vm6392_vm12, %v1298_v55, 0  ;;  %v1167_v0 = vrot.slane %v1165_v14, 6  ;;  %v1348_v63 = vshll.u32 %v1318_v4, 16  ;;  %v5594_v14 = vld [vmem:[%s7147_s1 + $0x118] sm:$0xff]  }
  0xf7   : > { %v1149_v43 = vrot.slane %v1147_v62, 6  ;;  %v1152_v7 = vrot.slane %v1150_v48, 7  ;;  %v1341_v30 = vshrl.u32 %v1317_v3, 16  ;;  %v5597_v3 = vld [vmem:[%s7147_s1 + $0x130] sm:$0xff]  }
  0xf8   : > { %5024 = vmatpush3.bf16.msra.mxu0 %v5573_v11  ;;  %v5580_v11 = vld [vmem:[%s7147_s1 + $0xa8] sm:$0xff]  }
  0xf9   : > { %5025 = vmatprep.subr.bf16.mxu0 %v5574_v47  ;;  %v1153_v12 = vor.u32 %v1152_v7, %v1149_v43  ;;  %v1343_v24 = vrot.slane %v1341_v30, 7 }
  0xfb   : > { %v1154_v8 = vsel %vm7188_vm4, %v1144_v25, %v1153_v12  ;;  %v7288_v25 = vld [vmem:[#allocation6_spill] sm:$0xff] }
  0xfc   : > { %5026 = vmatpush3.bf16.msra.mxu0 %v5574_v47  ;;  %v1156_v47 = vshrl.u32 %v1109_v32, 16  ;;  %vm7193_vm14 = vcmp.ne.s16.totalorder %v7288_v25, 0  ;;  %v7290_v32 = vld [vmem:[#allocation7_spill] sm:$0xff] }
  0xfd   : > { %5035 = vmatprep.subr.bf16.mxu0 %v5575_v45 }
  0xfe   : > { %v1158_v51 = vrot.slane %v1156_v47, 6 }
  0xff   : > { %5028 = vmatmul.mubr.bf16.vlgmr.msra.gmra.mrb[0].mxu0 %v884_v19  ;;  %v1345_v19 = vshrl.u32 %v1318_v4, 16 }
 0x100   : > { %5031 = vmatprep.mubr.bf16.mxu0 %v893_v5  ;;  %5036 = vmatpush3.bf16.msra.mxu0 %v5575_v45  ;;  %v1161_v45 = vrot.slane %v1159_v56, 7 }
 0x101   : > { %5037 = vmatprep.subr.bf16.mxu0 %v5576_v18 }
 0x102   : > { %v1162_v31 = vor.u32 %v1161_v45, %v1158_v51  ;;  %v5592_v45 = vld [vmem:[%s7147_s1 + $0x108] sm:$0xff]  }
 0x104   : > { %5038 = vmatpush3.bf16.msra.mxu0 %v5576_v18  ;;  %v1168_v18 = vshll.u32 %v1110_v53, 16  ;;  %v1163_v16 = vsel %vm7188_vm4, %v1153_v12, %v1162_v31 }
 0x105   : > { %5039 = vmatprep.subr.bf16.mxu0 %v5577_v57 }
 0x106   : > { %v1170_v5 = vrot.slane %v1168_v18, 7 }
 0x107   : > { %5032 = vmatmul.mubr.bf16.gmra.mrb[4].mxu0 %v902_v23  ;;  %v1319_v23 = vsel %vm7193_vm14, %v6239_v61, 0 }
 0x108   : > { %5040 = vmatpush3.bf16.msra.mxu0 %v5577_v57  ;;  %5051 = vmatprep.mubr.bf16.mxu0 %v1145_v27  ;;  %v1347_v57 = vrot.slane %v1345_v19, 7  ;;  %v1171_v9 = vor.u32 %v1170_v5, %v1167_v0  ;;  %v1320_v27 = vsel %vm7190_vm10, %v6241_v41, 0  ;;  %v1356_v56 = vshll.u32 %v1319_v23, 16  ;;  %v5596_v19 = vld [vmem:[%s7147_s1 + $0x128] sm:$0xff]   ;;  %v5599_v5 = vld [vmem:[%s7147_s1 + $0x140] sm:$0xff]  }
 0x109   : > { %5041 = vmatprep.subr.bf16.mxu0 %v5578_v26  ;;  %v1361_v17 = vshrl.u32 %v1320_v27, 16 }
 0x10a   : > { %v1350_v38 = vor.u32 %v1348_v63, %v1347_v57  ;;  %v1172_v37 = vsel %vm7188_vm4, %v1162_v31, %v1171_v9  ;;  %vm7189_vm4 = vcmp.ne.s16.totalorder %v7290_v32, 0  ;;  %v5595_v31 = vld [vmem:[%s7147_s1 + $0x120] sm:$0xff]   ;;  %v5601_v63 = vld [vmem:[%s7147_s1 + $0x150] sm:$0xff]  }
 0x10b   : > { %v1363_v48 = vrot.slane %v1361_v17, 7  ;;  %v1321_v47 = vsel %vm7189_vm4, %v6243_v54, 0  ;;  %v7294_v17 = vld [vmem:[#allocation15_spill] sm:$0xff] }
 0x10c   : > { %5042 = vmatpush3.bf16.msra.mxu0 %v5578_v26  ;;  %v1351_v50 = vsel %vm7195_vm15, %v1343_v24, %v1350_v38  ;;  %v5588_v26 = vld [vmem:[%s7147_s1 + $0xe8] sm:$0xff]   ;;  %v1369_v7 = vshrl.u32 %v1321_v47, 16  ;;  %v1372_v55 = vshll.u32 %v1321_v47, 16 }
 0x10d   : > { %5043 = vmatprep.subr.bf16.mxu0 %v5579_v20 }
 0x10e   : > { %v1371_v4 = vrot.slane %v1369_v7, 7  ;;  %v7297_v7 = vrot.slane %v7282_v36, 7 }
 0x110   : > { %5044 = vmatpush3.bf16.msra.mxu0 %v5579_v20  ;;  %v5589_v20 = vld [vmem:[%s7147_s1 + $0xf0] sm:$0xff]   ;;  %v1374_v12 = vor.u32 %v1372_v55, %v1371_v4 }
 0x111   : > { %5045 = vmatprep.subr.bf16.mxu0 %v5580_v11 }
 0x112   : > { %v1375_v18 = vsel %vm7195_vm15, %v1363_v48, %v1374_v12 }
 0x114   : > { %5046 = vmatpush3.bf16.msra.mxu0 %v5580_v11  ;;  %v1353_v11 = vshrl.u32 %v1319_v23, 16  ;;  %v7293_v23 = vld [vmem:[#allocation14_spill] sm:$0xff] }
 0x115   : > { %5047 = vmatprep.subr.bf16.mxu0 %v5581_v22 }
 0x116   : > { %v1355_v62 = vrot.slane %v1353_v11, 7 }
 0x118   : > { %5048 = vmatpush3.bf16.msra.mxu0 %v5581_v22  ;;  %v5590_v22 = vld [vmem:[%s7147_s1 + $0xf8] sm:$0xff]   ;;  %v1358_v43 = vor.u32 %v1356_v56, %v1355_v62 }
 0x119   : > { %5049 = vmatprep.subr.bf16.mxu0 %v5582_v13 }
 0x11a   : > { %v1359_v53 = vsel %vm7195_vm15, %v1347_v57, %v1358_v43  ;;  %v5600_v57 = vld [vmem:[%s7147_s1 + $0x148] sm:$0xff]  }
 0x11b   : > { %v1643_v43 = vld [vmem:[#allocation2 + $0x28] sm:$0x1] }
 0x11c   : > { %5050 = vmatpush3.bf16.msra.mxu0 %v5582_v13  ;;  %v1364_v13 = vshll.u32 %v1320_v27, 16 }
 0x11d   : > { %5059 = vmatprep.subr.bf16.mxu0 %v5583_v46 }
 0x11e   : > { %v1366_v51 = vor.u32 %v1364_v13, %v1363_v48  ;;  %v7295_v48 = vld [vmem:[#allocation13_spill] sm:$0xff] }
 0x11f   : > { %5052 = vmatmul.mubr.bf16.vlgmr.msra.gmra.mrb[0].mxu0 %v1154_v8  ;;  %v7291_v8 = vld [vmem:[#allocation9_spill] sm:$0xff]  ;;  %vm7197_vm14 = vcmp.ne.s16.totalorder %v7295_v48, 0 }
 0x120   : > { %5055 = vmatprep.mubr.bf16.mxu0 %v1163_v16  ;;  %5060 = vmatpush3.bf16.msra.mxu0 %v5583_v46  ;;  %v1367_v46 = vsel %vm7195_vm15, %v1355_v62, %v1366_v51  ;;  %vm7192_vm4 = vcmp.ne.s16.totalorder %v7291_v8, 0  ;;  %v7292_v16 = vld [vmem:[#allocation12_spill] sm:$0xff]  ;;  %v1843_v62 = vld [vmem:[#allocation2 + $0x8] sm:$0xfe]  ;;  %vm6511_vm15 = vcmp.ne.s16.totalorder %v7297_v7, 0  ;;  %v7298_v51 = vmov 0 }
 0x121   : > { %5061 = vmatprep.subr.bf16.mxu0 %v5584_v28  ;;  %v1660_v0 = vsel %vm7192_vm4, %v6236_v49, 0  ;;  %vm7191_vm10 = vcmp.ne.s16.totalorder %v7292_v16, 0  ;;  %vm7198_vm4 = vcmp.ne.s16.totalorder %v7294_v17, 0  ;;  %v7299_v51 = vsel %vm6511_vm15, 4294967295, %v7298_v51 }
 0x122   : > { %v1685_v30 = vshll.u32 %v1660_v0, 16  ;;  %v1683_v9 = vshrl.u32 %v1660_v0, 16  ;;  %v1663_v47 = vsel %vm7198_vm4, %v6243_v54, 0  ;;  %7300 = vst [vmem:[#allocation4_spill] sm:$0xff] %v7299_v51  ;;  %v1664_v12 = vsel %vm6511_vm15, %v1643_v43, 0 }
 0x124   : > { %5062 = vmatpush3.bf16.msra.mxu0 %v5584_v28  ;;  %v5598_v28 = vld [vmem:[%s7147_s1 + $0x138] sm:$0xff]  }
 0x125   : > { %5063 = vmatprep.subr.bf16.mxu0 %v5585_v1 }
 0x127   : > { %5056 = vmatmul.mubr.bf16.gmra.mrb[4].mxu0 %v1172_v37  ;;  %v5602_v37 = vld [vmem:[%s7147_s1 + $0x158] sm:$0xff]  }
 0x128   : > { %5064 = vmatpush3.bf16.msra.mxu0 %v5585_v1  ;;  %5075 = vmatprep.mubr.bf16.mxu0 %v1351_v50  ;;  %v1661_v1 = vsel %vm7191_vm10, %v6239_v61, 0  ;;  %vm7194_vm10 = vcmp.ne.s16.totalorder %v7293_v23, 0 }
 0x129   : > { %5065 = vmatprep.subr.bf16.mxu0 %v5586_v44  ;;  %v1690_v24 = vshll.u32 %v1661_v1, 16  ;;  %v1662_v27 = vsel %vm7194_vm10, %v6241_v41, 0  ;;  %v1694_v13 = vshrl.u32 %v1661_v1, 16 }
 0x12a   : > { %v1698_v11 = vshll.u32 %v1662_v27, 16  ;;  %v1702_v4 = vshrl.u32 %v1662_v27, 16 }
 0x12c   : > { %5066 = vmatpush3.bf16.msra.mxu0 %v5586_v44  ;;  %v1692_v44 = vrot.slane %v1690_v24, 1  ;;  %v1700_v56 = vrot.slane %v1698_v11, 1  ;;  %v7301_v11 = vld [vmem:[#allocation17_spill] sm:$0xff] }
 0x12d   : > { %5067 = vmatprep.subr.bf16.mxu0 %v5587_v33 }
 0x12e   : > { %v1696_v55 = vor.u32 %v1694_v13, %v1692_v44  ;;  %v1704_v36 = vor.u32 %v1702_v4, %v1700_v56  ;;  %v5613_v13 = vld [vmem:[%s7147_s1 + $0x1b0] sm:$0xff]   ;;  %v6555_v4 = vld [vmem:[#allocation2 + $0x28] sm:$0x3] }
 0x130   : > { %5068 = vmatpush3.bf16.msra.mxu0 %v5587_v33  ;;  %v5603_v33 = vld [vmem:[%s7147_s1 + $0x160] sm:$0xff]   ;;  %v1701_v0 = vsel %vm1300_vm3, %v1696_v55, %v1700_v56  ;;  %v5614_v55 = vld [vmem:[%s7147_s1 + $0x1b8] sm:$0xff]  }
 0x131   : > { %5069 = vmatprep.subr.bf16.mxu0 %v5588_v26 }
 0x134   : > { %5070 = vmatpush3.bf16.msra.mxu0 %v5588_v26  ;;  %v5604_v26 = vld [vmem:[%s7147_s1 + $0x168] sm:$0xff]  }
 0x135   : > { %5071 = vmatprep.subr.bf16.mxu0 %v5589_v20 }
 0x138   : > { %5072 = vmatpush3.bf16.msra.mxu0 %v5589_v20  ;;  %v5605_v20 = vld [vmem:[%s7147_s1 + $0x170] sm:$0xff]  }
 0x139   : > { %5073 = vmatprep.subr.bf16.mxu0 %v5590_v22 }
 0x13c   : > { %5074 = vmatpush3.bf16.msra.mxu0 %v5590_v22  ;;  %v5606_v22 = vld [vmem:[%s7147_s1 + $0x178] sm:$0xff]  }
 0x13d   : > { %5083 = vmatprep.subr.bf16.mxu0 %v5591_v60 }
 0x13f   : > { %5076 = vmatmul.mubr.bf16.vlgmr.msra.gmra.mrb[0].mxu0 %v1359_v53  ;;  %v5607_v53 = vld [vmem:[%s7147_s1 + $0x180] sm:$0xff]  }
 0x140   : > { %5079 = vmatprep.mubr.bf16.mxu0 %v1367_v46  ;;  %5084 = vmatpush3.bf16.msra.mxu0 %v5591_v60  ;;  %v7296_v60 = vld [vmem:[#allocation16_spill] sm:$0xff]  ;;  %v1706_v46 = vshll.u32 %v1663_v47, 16 }
 0x141   : > { %5085 = vmatprep.subr.bf16.mxu0 %v5592_v45  ;;  %vm7196_vm10 = vcmp.ne.s16.totalorder %v7296_v60, 0 }
 0x144   : > { %5086 = vmatpush3.bf16.msra.mxu0 %v5592_v45  ;;  %v1865_v45 = vsel %vm7197_vm14, %v1843_v62, 0  ;;  %v7302_v62 = vld [vmem:[#allocation20_spill] sm:$0xff] }
 0x145   : > { %5087 = vmatprep.subr.bf16.mxu0 %v5593_v39  ;;  %vm7200_vm14 = vcmp.ne.s16.totalorder %v7302_v62, 0 }
 0x146   : > { %v1868_v56 = vsel %vm7200_vm14, %v6243_v54, 0 }
 0x147   : > { %5080 = vmatmul.mubr.bf16.gmra.mrb[4].mxu0 %v1375_v18  ;;  %v1891_v18 = vshll.u32 %v1865_v45, 16 }
 0x148   : > { %5088 = vmatpush3.bf16.msra.mxu0 %v5593_v39  ;;  %5099 = vmatprep.mubr.bf16.mxu0 %v6236_v49  ;;  %v1687_v49 = vrot.slane %v1685_v30, 1  ;;  %v1866_v39 = vsel %vm7196_vm10, %v6239_v61, 0  ;;  %vm7201_vm10 = vcmp.ne.s16.totalorder %v7301_v11, 0 }
 0x149   : > { %5089 = vmatprep.subr.bf16.mxu0 %v5594_v14  ;;  %v1893_v1 = vrot.slane %v1891_v18, 2 }
 0x14a   : > { %v1688_v38 = vor.u32 %v1687_v49, %v1683_v9  ;;  %v1710_v49 = vshrl.u32 %v1663_v47, 16  ;;  %v1867_v47 = vsel %vm7201_vm10, %v6241_v41, 0 }
 0x14b   : > { %v1905_v43 = vshrl.u32 %v1867_v47, 16  ;;  %v1908_v7 = vshll.u32 %v1867_v47, 16  ;;  %v7304_v47 = vld [vmem:[#allocation19_spill] sm:$0xff] }
 0x14c   : > { %5090 = vmatpush3.bf16.msra.mxu0 %v5594_v14  ;;  %v1693_v50 = vsel %vm1300_vm3, %v1688_v38, %v1692_v44  ;;  %v1888_v14 = vshrl.u32 %v1865_v45, 16  ;;  %v1914_v45 = vshrl.u32 %v1868_v56, 16  ;;  %vm7203_vm14 = vcmp.ne.s16.totalorder %v7304_v47, 0 }
 0x14d   : > { %5091 = vmatprep.subr.bf16.mxu0 %v5595_v31 }
 0x150   : > { %5092 = vmatpush3.bf16.msra.mxu0 %v5595_v31  ;;  %v1708_v31 = vrot.slane %v1706_v46, 1  ;;  %v7303_v46 = vld [vmem:[#allocation18_spill] sm:$0xff] }
 0x151   : > { %5093 = vmatprep.subr.bf16.mxu0 %v5596_v19  ;;  %vm7199_vm4 = vcmp.ne.s16.totalorder %v7303_v46, 0 }
 0x152   : > { %v1709_v30 = vsel %vm1300_vm3, %v1704_v36, %v1708_v31  ;;  %v1712_v38 = vor.u32 %v1710_v49, %v1708_v31  ;;  %v1910_v36 = vrot.slane %v1908_v7, 2  ;;  %v1869_v18 = vsel %vm7199_vm4, %v6555_v4, 0  ;;  %v5615_v31 = vld [vmem:[%s7147_s1 + $0x1c0] sm:$0xff]  }
 0x153   : > { %vm7204_vm4 = vcmask 1045504   ;;  %v2083_v7 = vrot.slane %v6241_v41, 2 }
 0x154   : > { %5094 = vmatpush3.bf16.msra.mxu0 %v5596_v19  ;;  %v5608_v19 = vld [vmem:[%s7147_s1 + $0x188] sm:$0xff]  }
 0x155   : > { %5095 = vmatprep.subr.bf16.mxu0 %v5597_v3 }
 0x158   : > { %5096 = vmatpush3.bf16.msra.mxu0 %v5597_v3  ;;  %v1896_v3 = vshrl.u32 %v1866_v39, 16 }
 0x159   : > { %5097 = vmatprep.subr.bf16.mxu0 %v5598_v28 }
 0x15a   : > { %v1898_v9 = vrot.slane %v1896_v3, 1  ;;  %v1923_v3 = vshrl.u32 %v1869_v18, 16 }
 0x15c   : > { %5098 = vmatpush3.bf16.msra.mxu0 %v5598_v28  ;;  %v1899_v28 = vshll.u32 %v1866_v39, 16  ;;  %v1907_v39 = vrot.slane %v1905_v43, 1  ;;  %v5623_v43 = vld [vmem:[%s7147_s1 + $0x200] sm:$0xff]  }
 0x15d   : > { %5107 = vmatprep.subr.bf16.mxu0 %v5599_v5 }
 0x15e   : > { %v1901_v24 = vrot.slane %v1899_v28, 2  ;;  %v1926_v28 = vshll.u32 %v1869_v18, 16 }
 0x15f   : > { %5100 = vmatmul.mubr.bf16.vlgmr.msra.gmra.mrb[0].mxu0 %v6239_v61 }
 0x160   : > { %5103 = vmatprep.mubr.bf16.mxu0 %v6241_v41  ;;  %5108 = vmatpush3.bf16.msra.mxu0 %v5599_v5  ;;  %v1714_v5 = vshll.u32 %v1664_v12, 16  ;;  %v1916_v12 = vrot.slane %v1914_v45, 1 }
 0x161   : > { %5109 = vmatprep.subr.bf16.mxu0 %v5600_v57 }
 0x162   : > { %v1716_v44 = vrot.slane %v1714_v5, 1  ;;  %v5616_v5 = vld [vmem:[%s7147_s1 + $0x1c8] sm:$0xff]  }
 0x164   : > { %5110 = vmatpush3.bf16.msra.mxu0 %v5600_v57  ;;  %v1890_v57 = vrot.slane %v1888_v14, 1 }
 0x165   : > { %5111 = vmatprep.subr.bf16.mxu0 %v5601_v63 }
 0x167   : > { %5104 = vmatmul.mubr.bf16.gmra.mrb[4].mxu0 %v6243_v54 }
 0x168   : > { %5112 = vmatpush3.bf16.msra.mxu0 %v5601_v63  ;;  %5123 = vmatprep.mubr.bf16.mxu0 %v1693_v50  ;;  %v5609_v63 = vld [vmem:[%s7147_s1 + $0x190] sm:$0xff]   ;;  %v1902_v50 = vor.u32 %v1901_v24, %v1898_v9 }
 0x169   : > { %5113 = vmatprep.subr.bf16.mxu0 %v5602_v37  ;;  %v5617_v9 = vld [vmem:[%s7147_s1 + $0x1d0] sm:$0xff]  }
 0x16c   : > { %5114 = vmatpush3.bf16.msra.mxu0 %v5602_v37  ;;  %v1894_v37 = vor.u32 %v1893_v1, %v1890_v57  ;;  %v1925_v57 = vrot.slane %v1923_v3, 1  ;;  %v1928_v1 = vrot.slane %v1926_v28, 2 }
 0x16d   : > { %5115 = vmatprep.subr.bf16.mxu0 %v5603_v33 }
 0x16e   : > { %v1903_v27 = vsel %vm1065_vm1, %v1894_v37, %v1902_v50  ;;  %v1929_v24 = vor.u32 %v1928_v1, %v1925_v57  ;;  %v5618_v37 = vld [vmem:[%s7147_s1 + $0x1d8] sm:$0xff]  }
 0x16f   : > { %v5626_v1 = vld [vmem:[%s7147_s1 + $0x218] sm:$0xff]  }
 0x170   : > { %5116 = vmatpush3.bf16.msra.mxu0 %v5603_v33  ;;  %v5610_v33 = vld [vmem:[%s7147_s1 + $0x198] sm:$0xff]  }
 0x171   : > { %5117 = vmatprep.subr.bf16.mxu0 %v5604_v26 }
 0x174   : > { %5118 = vmatpush3.bf16.msra.mxu0 %v5604_v26  ;;  %v1717_v26 = vsel %vm1300_vm3, %v1712_v38, %v1716_v44  ;;  %v2081_v44 = vrot.slane %v6239_v61, 2 }
 0x175   : > { %5119 = vmatprep.subr.bf16.mxu0 %v5605_v20 }
 0x176   : > { %v2084_v18 = vsel %vm7204_vm4, %v2081_v44, %v2083_v7 }
 0x178   : > { %5120 = vmatpush3.bf16.msra.mxu0 %v5605_v20  ;;  %v5611_v20 = vld [vmem:[%s7147_s1 + $0x1a0] sm:$0xff]  }
 0x179   : > { %5121 = vmatprep.subr.bf16.mxu0 %v5606_v22 }
 0x17c   : > { %5122 = vmatpush3.bf16.msra.mxu0 %v5606_v22  ;;  %v5612_v22 = vld [vmem:[%s7147_s1 + $0x1a8] sm:$0xff]  }
 0x17d   : > { %5131 = vmatprep.subr.bf16.mxu0 %v5607_v53 }
 0x17f   : > { %5124 = vmatmul.mubr.bf16.vlgmr.msra.gmra.mrb[0].mxu0 %v1701_v0 }
 0x180   : > { %5127 = vmatprep.mubr.bf16.mxu0 %v1709_v30  ;;  %5132 = vmatpush3.bf16.msra.mxu0 %v5607_v53  ;;  %v1917_v53 = vshll.u32 %v1868_v56, 16  ;;  %v7305_v56 = vld [vmem:[#allocation21_spill] sm:$0xff] }
 0x181   : > { %5133 = vmatprep.subr.bf16.mxu0 %v5608_v19  ;;  %vm7202_vm10 = vcmp.ne.s16.totalorder %v7305_v56, 0 }
 0x182   : > { %v1919_v14 = vrot.slane %v1917_v53, 2  ;;  %v2236_v45 = vsel %vm7202_vm10, %v6239_v61, 0  ;;  %v2085_v53 = vrot.slane %v6243_v54, 2  ;;  %v5625_v61 = vld [vmem:[%s7147_s1 + $0x210] sm:$0xff]  }
 0x184   : > { %5134 = vmatpush3.bf16.msra.mxu0 %v5608_v19  ;;  %v1911_v19 = vor.u32 %v1910_v36, %v1907_v39  ;;  %v1920_v0 = vor.u32 %v1919_v14, %v1916_v12  ;;  %v5624_v36 = vld [vmem:[%s7147_s1 + $0x208] sm:$0xff]   ;;  %v2266_v12 = vshrl.u32 %v2236_v45, 16  ;;  %v2269_v14 = vshll.u32 %v2236_v45, 16 }
 0x185   : > { %5135 = vmatprep.subr.bf16.mxu0 %v5609_v63 }
 0x186   : > { %v1912_v30 = vsel %vm1065_vm1, %v1902_v50, %v1911_v19  ;;  %v1921_v49 = vsel %vm1065_vm1, %v1911_v19, %v1920_v0  ;;  %v1930_v50 = vsel %vm1065_vm1, %v1920_v0, %v1929_v24  ;;  %v2268_v28 = vrot.slane %v2266_v12, 2  ;;  %v5628_v24 = vld [vmem:[%s7147_s1 + $0x228] sm:$0xff]  }
 0x187   : > { %5128 = vmatmul.mubr.bf16.gmra.mrb[4].mxu0 %v1717_v26  ;;  %v5619_v26 = vld [vmem:[%s7147_s1 + $0x1e0] sm:$0xff]   ;;  %v2271_v0 = vrot.slane %v2269_v14, 3 }
 0x188   : > { %5136 = vmatpush3.bf16.msra.mxu0 %v5609_v63  ;;  %5147 = vmatprep.mubr.bf16.mxu0 %v1903_v27  ;;  %v2056_v63 = vld [vmem:[#allocation2 + $0x8] sm:$0xfc] }
 0x189   : > { %5137 = vmatprep.subr.bf16.mxu0 %v5610_v33  ;;  %v2080_v38 = vrot.slane %v2056_v63, 2  ;;  %v5620_v27 = vld [vmem:[%s7147_s1 + $0x1e8] sm:$0xff]   ;;  %v2272_v57 = vor.u32 %v2271_v0, %v2268_v28  ;;  %v4563_v28 = vld [vmem:[%s7148_s2] ss:$0 sm:$0xff] }
 0x18c   : > { %5138 = vmatpush3.bf16.msra.mxu0 %v5610_v33  ;;  %v2082_v33 = vsel %vm7204_vm4, %v2080_v38, %v2081_v44  ;;  %v7307_v38 = vld [vmem:[#allocation24_spill] sm:$0xff] }
 0x18d   : > { %5139 = vmatprep.subr.bf16.mxu0 %v5611_v20 }
 0x190   : > { %5140 = vmatpush3.bf16.msra.mxu0 %v5611_v20  ;;  %v5621_v20 = vld [vmem:[%s7147_s1 + $0x1f0] sm:$0xff]  }
 0x191   : > { %5141 = vmatprep.subr.bf16.mxu0 %v5612_v22 }
 0x194   : > { %5142 = vmatpush3.bf16.msra.mxu0 %v5612_v22  ;;  %v5622_v22 = vld [vmem:[%s7147_s1 + $0x1f8] sm:$0xff]  }
 0x195   : > { %5143 = vmatprep.subr.bf16.mxu0 %v5613_v13 }
 0x198   : > { %5144 = vmatpush3.bf16.msra.mxu0 %v5613_v13  ;;  %v2235_v13 = vsel %vm7203_vm14, %v2056_v63, 0  ;;  %vm7206_vm14 = vcmp.ne.s16.totalorder %v7307_v38, 0 }
 0x199   : > { %5145 = vmatprep.subr.bf16.mxu0 %v5614_v55  ;;  %v2261_v39 = vshll.u32 %v2235_v13, 16 }
 0x19b   : > { %v2263_v3 = vrot.slane %v2261_v39, 3 }
 0x19c   : > { %5146 = vmatpush3.bf16.msra.mxu0 %v5614_v55  ;;  %v2258_v55 = vshrl.u32 %v2235_v13, 16  ;;  %v7308_v13 = vld [vmem:[#allocation22_spill] sm:$0xff] }
 0x19d   : > { %5155 = vmatprep.subr.bf16.mxu0 %v5615_v31 }
 0x19e   : > { %v2260_v19 = vrot.slane %v2258_v55, 2 }
 0x19f   : > { %5148 = vmatmul.mubr.bf16.vlgmr.msra.gmra.mrb[0].mxu0 %v1912_v30 }
 0x1a0   : > { %5151 = vmatprep.mubr.bf16.mxu0 %v1921_v49  ;;  %5156 = vmatpush3.bf16.msra.mxu0 %v5615_v31  ;;  %v2086_v31 = vsel %vm7204_vm4, %v2083_v7, %v2085_v53  ;;  %v2264_v30 = vor.u32 %v2263_v3, %v2260_v19 }
 0x1a1   : > { %5157 = vmatprep.subr.bf16.mxu0 %v5616_v5 }
 0x1a2   : > { %v2273_v63 = vsel %vm646_vm7, %v2264_v30, %v2272_v57 }
 0x1a4   : > { %5158 = vmatpush3.bf16.msra.mxu0 %v5616_v5  ;;  %v2087_v5 = vrot.slane %v6555_v4, 2  ;;  %v5627_v4 = vld [vmem:[%s7147_s1 + $0x220] sm:$0xff]  }
 0x1a5   : > { %5159 = vmatprep.subr.bf16.mxu0 %v5617_v9 }
 0x1a6   : > { %v2088_v49 = vsel %vm7204_vm4, %v2085_v53, %v2087_v5  ;;  %vm7205_vm4 = vcmp.ne.s16.totalorder %v7308_v13, 0  ;;  %v4564_v5 = vld [vmem:[%s7149_s3] ss:$0 sm:$0xff] }
 0x1a7   : > { %5152 = vmatmul.mubr.bf16.gmra.mrb[4].mxu0 %v1930_v50  ;;  %v5629_v50 = vld [vmem:[%s7147_s1 + $0x230] sm:$0xff]  }
 0x1a8   : > { %5160 = vmatpush3.bf16.msra.mxu0 %v5617_v9  ;;  %5171 = vmatprep.mubr.bf16.mxu0 %v2082_v33  ;;  %v7306_v9 = vld [vmem:[#allocation23_spill] sm:$0xff] }
 0x1a9   : > { %5161 = vmatprep.subr.bf16.mxu0 %v5618_v37  ;;  %vm7207_vm10 = vcmp.ne.s16.totalorder %v7306_v9, 0 }
 0x1aa   : > { %v2237_v44 = vsel %vm7207_vm10, %v6241_v41, 0  ;;  %v5630_v41 = vld [vmem:[%s7147_s1 + $0x238] sm:$0xff]  }
 0x1ab   : > { %v2275_v33 = vshrl.u32 %v2237_v44, 16 }
 0x1ac   : > { %5162 = vmatpush3.bf16.msra.mxu0 %v5618_v37  ;;  %v2238_v37 = vsel %vm7206_vm14, %v6243_v54, 0 }
 0x1ad   : > { %5163 = vmatprep.subr.bf16.mxu0 %v5619_v26 }
 0x1b0   : > { %5164 = vmatpush3.bf16.msra.mxu0 %v5619_v26  ;;  %v2278_v26 = vshll.u32 %v2237_v44, 16 }
 0x1b1   : > { %5165 = vmatprep.subr.bf16.mxu0 %v5620_v27 }
 0x1b2   : > { %v2280_v54 = vrot.slane %v2278_v26, 3 }
 0x1b4   : > { %5166 = vmatpush3.bf16.msra.mxu0 %v5620_v27  ;;  %v2284_v27 = vshrl.u32 %v2238_v37, 16 }
 0x1b5   : > { %5167 = vmatprep.subr.bf16.mxu0 %v5621_v20 }
 0x1b6   : > { %v2286_v7 = vrot.slane %v2284_v27, 2 }
 0x1b8   : > { %5168 = vmatpush3.bf16.msra.mxu0 %v5621_v20  ;;  %v2287_v20 = vshll.u32 %v2238_v37, 16 }
 0x1b9   : > { %5169 = vmatprep.subr.bf16.mxu0 %v5622_v22 }
 0x1ba   : > { %v2289_v45 = vrot.slane %v2287_v20, 3 }
 0x1bc   : > { %5170 = vmatpush3.bf16.msra.mxu0 %v5622_v22  ;;  %v2214_v22 = vld [vmem:[#allocation2 + $0x28] sm:$0x7]  ;;  %v2290_v12 = vor.u32 %v2289_v45, %v2286_v7 }
 0x1bd   : > { %5179 = vmatprep.subr.bf16.mxu0 %v5623_v43  ;;  %v2239_v53 = vsel %vm7205_vm4, %v2214_v22, 0 }
 0x1be   : > { %v2293_v39 = vshrl.u32 %v2239_v53, 16 }
 0x1bf   : > { %5172 = vmatmul.mubr.bf16.vlgmr.msra.gmra.mrb[0].mxu0 %v2084_v18 }
 0x1c0   : > { %5175 = vmatprep.mubr.bf16.mxu0 %v2086_v31  ;;  %5180 = vmatpush3.bf16.msra.mxu0 %v5623_v43  ;;  %v2277_v43 = vrot.slane %v2275_v33, 2  ;;  %v2295_v18 = vrot.slane %v2293_v39, 2 }
 0x1c1   : > { %5181 = vmatprep.subr.bf16.mxu0 %v5624_v36 }
 0x1c2   : > { %v2281_v55 = vor.u32 %v2280_v54, %v2277_v43 }
 0x1c4   : > { %5182 = vmatpush3.bf16.msra.mxu0 %v5624_v36  ;;  %v2296_v36 = vshll.u32 %v2239_v53, 16  ;;  %v2282_v14 = vsel %vm646_vm7, %v2272_v57, %v2281_v55  ;;  %v2291_v19 = vsel %vm646_vm7, %v2281_v55, %v2290_v12 }
 0x1c5   : > { %5183 = vmatprep.subr.bf16.mxu0 %v5625_v61 }
 0x1c6   : > { %v2298_v31 = vrot.slane %v2296_v36, 3 }
 0x1c7   : > { %5176 = vmatmul.mubr.bf16.gmra.mrb[4].mxu0 %v2088_v49 }
 0x1c8   : > { %5184 = vmatpush3.bf16.msra.mxu0 %v5625_v61  ;;  %5195 = vmatprep.mubr.bf16.mxu0 %v2273_v63  ;;  %v2299_v3 = vor.u32 %v2298_v31, %v2295_v18 }
 0x1c9   : > { %5185 = vmatprep.subr.bf16.mxu0 %v5626_v1 }
 0x1ca   : > { %v2300_v61 = vsel %vm646_vm7, %v2290_v12, %v2299_v3 }
 0x1cc   : > { %5186 = vmatpush3.bf16.msra.mxu0 %v5626_v1 }
 0x1cd   : > { %5187 = vmatprep.subr.bf16.mxu0 %v5627_v4 }
 0x1d0   : > { %5188 = vmatpush3.bf16.msra.mxu0 %v5627_v4 }
 0x1d1   : > { %5189 = vmatprep.subr.bf16.mxu0 %v5628_v24 }
 0x1d4   : > { %5190 = vmatpush3.bf16.msra.mxu0 %v5628_v24 }
 0x1d5   : > { %5191 = vmatprep.subr.bf16.mxu0 %v5629_v50 }
 0x1d8   : > { %5192 = vmatpush3.bf16.msra.mxu0 %v5629_v50 }
 0x1d9   : > { %5193 = vmatprep.subr.bf16.mxu0 %v5630_v41 }
 0x1dc   : > { %5194 = vmatpush3.bf16.msra.mxu0 %v5630_v41 }
 0x1df   : > { %5196 = vmatmul.mubr.bf16.vlgmr.msra.gmra.mrb[0].mxu0 %v2282_v14 }
 0x1e0   : > { %5199 = vmatprep.mubr.bf16.mxu0 %v2291_v19 }
 0x1e7   : > { %5200 = vmatmul.mubr.bf16.gmra.mrb[4].mxu0 %v2300_v61 }
 0x2b2   : > { %v5197_v0 = vpop.f32.mrb[0].mxu0 }
 0x2b3   : > { %v2435_v30 = vadd.f32 %v5197_v0, %v4563_v28  ;;  %v2387_v57 = vpop.f32.mrb[1].mxu0  ;;  %v5632_v0 = vld [vmem:[%s7150_s4 + $0x48] sm:$0xff]  }
 0x2b4   : > { %v2433_v1 = vadd.f32 %v4563_v28, %v2387_v57  ;;  %v5198_v49 = vpop.f32.mrb[2].mxu0  ;;  %v5635_v57 = vld [vmem:[%s7150_s4 + $0x60] sm:$0xff]  }
 0x2b5   : > { %vm2444_vm4 = vcmp.gt.f32.partialorder %v2435_v30, 0.0  ;;  %v2458_v63 = vmul.f32 %v4564_v5, %v2435_v30  ;;  %v2390_v4 = vpop.f32.mrb[3].mxu0  ;;  %v2436_v33 = vadd.f32 %v5198_v49, %v4563_v28  ;;  %v5637_v49 = vld [vmem:[%s7150_s4 + $0x70] sm:$0xff]  }
 0x2b6   : > { %v2456_v44 = vmul.f32 %v4564_v5, %v2433_v1  ;;  %vm2442_vm14 = vcmp.gt.f32.partialorder %v2433_v1, 0.0  ;;  %v2434_v41 = vadd.f32 %v4563_v28, %v2390_v4  ;;  %v6742_v4 = vld [vmem:[%s7150_s4] sm:$0xff]  }
 0x2b7   : > { %v6651_v24 = vsel %vm2444_vm4, %v2435_v30, %v2458_v63  ;;  %v2459_v22 = vmul.f32 %v4564_v5, %v2436_v33  ;;  %vm2445_vm4 = vcmp.gt.f32.partialorder %v2436_v33, 0.0  ;;  %v5634_v30 = vld [vmem:[%s7150_s4 + $0x58] sm:$0xff]  }
 0x2b8   : > { %2564 = vrot.lane.b32.xlu1 %v6651_v24, %s5725_s9  ;;  %2484 = vrot.lane.b32.xlu0 %v6651_v24, %s5723_s30  ;;  %v6657_v50 = vsel %vm2442_vm14, %v2433_v1, %v2456_v44  ;;  %v2457_v54 = vmul.f32 %v4564_v5, %v2434_v41  ;;  %vm2443_vm14 = vcmp.gt.f32.partialorder %v2434_v41, 0.0  ;;  %v5636_v1 = vld [vmem:[%s7150_s4 + $0x68] sm:$0xff]   ;;  %v5638_v63 = vld [vmem:[%s7150_s4 + $0x78] sm:$0xff]  }
 0x2b9   : > { %v6667_v43 = vsel %vm2445_vm4, %v2436_v33, %v2459_v22 }
 0x2ba   : > { %v5201_v37 = vpop.f32.mrb[4].mxu0  ;;  %v6673_v45 = vsel %vm2443_vm14, %v2434_v41, %v2457_v54 }
 0x2bb   : > { %v2403_v26 = vpop.f32.mrb[5].mxu0  ;;  %v2439_v7 = vadd.f32 %v5201_v37, %v4563_v28 }
 0x2bc   : > { %2524 = vrot.lane.b32.xlu0 %v6651_v24, %s5724_s8  ;;  %2520 = vrot.lane.b32.xlu1 %v6657_v50, %s5724_s8  ;;  %v5202_v27 = vpop.f32.mrb[6].mxu0  ;;  %v2437_v39 = vadd.f32 %v4563_v28, %v2403_v26 }
 0x2bd   : > { %v2406_v20 = vpop.f32.mrb[7].mxu0  ;;  %v2462_v53 = vmul.f32 %v4564_v5, %v2439_v7  ;;  %vm2448_vm10 = vcmp.gt.f32.partialorder %v2439_v7, 0.0  ;;  %v2440_v36 = vadd.f32 %v5202_v27, %v4563_v28 }
 0x2be   : > { %v2460_v12 = vmul.f32 %v4564_v5, %v2437_v39  ;;  %v2438_v18 = vadd.f32 %v4563_v28, %v2406_v20  ;;  %vm2446_vm4 = vcmp.gt.f32.partialorder %v2437_v39, 0.0  ;;  %v5631_v28 = vld [vmem:[%s7150_s4 + $0x40] sm:$0xff]  }
 0x2bf   : > { %v6679_v55 = vsel %vm2448_vm10, %v2439_v7, %v2462_v53  ;;  %v2463_v14 = vmul.f32 %v4564_v5, %v2440_v36  ;;  %vm2449_vm14 = vcmp.gt.f32.partialorder %v2440_v36, 0.0  ;;  %5203 = vmatprep.subr.bf16.mxu1 %v5631_v28 }
 0x2c0   : > { %2560 = vrot.lane.b32.xlu1 %v6657_v50, %s5725_s9  ;;  %2480 = vrot.lane.b32.xlu0 %v6657_v50, %s5723_s30  ;;  %v6689_v31 = vsel %vm2446_vm4, %v2437_v39, %v2460_v12  ;;  %v2461_v3 = vmul.f32 %v4564_v5, %v2438_v18  ;;  %vm2447_vm10 = vcmp.gt.f32.partialorder %v2438_v18, 0.0  ;;  %v5633_v5 = vld [vmem:[%s7150_s4 + $0x50] sm:$0xff]   ;;  %v2472_v12 = vmul.f32 %v6657_v50, %v6657_v50 }
 0x2c1   : > { %v6691_v19 = vsel %vm2449_vm14, %v2440_v36, %v2463_v14  ;;  %5204 = vmatpush3.bf16.msra.mxu1 %v5631_v28  ;;  %v2473_v28 = vmul.f32 %v6673_v45, %v6673_v45  ;;  %vm7318_vm4 = vsmask.f32 256  ;;  %vm7319_vm14 = vcmp.ne.s16.totalorder %v7288_v25, 0 }
 0x2c2   : > { %v6697_v61 = vsel %vm2447_vm10, %v2438_v18, %v2461_v3  ;;  %5205 = vmatprep.subr.bf16.mxu1 %v5632_v0  ;;  %vm7320_vm10 = vcmp.ne.s16.totalorder %v7289_v34, 0 }
 0x2c4   : > { %2526 = vrot.lane.b32.xlu0 %v6667_v43, %s5724_s8  ;;  %2486 = vrot.lane.b32.xlu1 %v6667_v43, %s5723_s30 }
 0x2c5   : > { %5206 = vmatpush3.bf16.msra.mxu1 %v5632_v0 }
 0x2c6   : > { %5207 = vmatprep.subr.bf16.mxu1 %v5633_v5 }
 0x2c8   : > { %2566 = vrot.lane.b32.xlu0 %v6667_v43, %s5725_s9  ;;  %2482 = vrot.lane.b32.xlu1 %v6673_v45, %s5723_s30 }
 0x2c9   : > { %5208 = vmatpush3.bf16.msra.mxu1 %v5633_v5 }
 0x2ca   : > { %5209 = vmatprep.subr.bf16.mxu1 %v5634_v30 }
 0x2cc   : > { %2522 = vrot.lane.b32.xlu0 %v6673_v45, %s5724_s8  ;;  %2492 = vrot.lane.b32.xlu1 %v6679_v55, %s5723_s30 }
 0x2cd   : > { %5210 = vmatpush3.bf16.msra.mxu1 %v5634_v30 }
 0x2ce   : > { %5211 = vmatprep.subr.bf16.mxu1 %v5635_v57 }
 0x2d0   : > { %2562 = vrot.lane.b32.xlu0 %v6673_v45, %s5725_s9  ;;  %2532 = vrot.lane.b32.xlu1 %v6679_v55, %s5724_s8 }
 0x2d1   : > { %5212 = vmatpush3.bf16.msra.mxu1 %v5635_v57 }
 0x2d2   : > { %5213 = vmatprep.subr.bf16.mxu1 %v5636_v1 }
 0x2d4   : > { %2488 = vrot.lane.b32.xlu1 %v6689_v31, %s5723_s30  ;;  %2494 = vrot.lane.b32.xlu0 %v6691_v19, %s5723_s30 }
 0x2d5   : > { %5214 = vmatpush3.bf16.msra.mxu1 %v5636_v1 }
 0x2d6   : > { %5215 = vmatprep.subr.bf16.mxu1 %v5637_v49 }
 0x2d8   : > { %2528 = vrot.lane.b32.xlu1 %v6689_v31, %s5724_s8  ;;  %2490 = vrot.lane.b32.xlu0 %v6697_v61, %s5723_s30 }
 0x2d9   : > { %5216 = vmatpush3.bf16.msra.mxu1 %v5637_v49 }
 0x2da   : > { %5217 = vmatprep.subr.bf16.mxu1 %v5638_v63 }
 0x2dc   : > { %2568 = vrot.lane.b32.xlu1 %v6689_v31, %s5725_s9  ;;  %2530 = vrot.lane.b32.xlu0 %v6697_v61, %s5724_s8 }
 0x2dd   : > { %5218 = vmatpush3.bf16.msra.mxu1 %v5638_v63 }
 0x2de   : > { %5227 = vmatprep.subr.bf16.mxu1 %v6742_v4 }
 0x2e0   : > { %2534 = vrot.lane.b32.xlu1 %v6691_v19, %s5724_s8  ;;  %2570 = vrot.lane.b32.xlu0 %v6697_v61, %s5725_s9 }
 0x2e4   : > { %2574 = vrot.lane.b32.xlu1 %v6691_v19, %s5725_s9  ;;  %2572 = vrot.lane.b32.xlu0 %v6679_v55, %s5725_s9 }
 0x32a   : > { %v2565_v44 = vpop.permute.xlu1 %2564  ;;  %v2485_v37 = vpop.permute.xlu0 %2484 }
 0x32b   : > { %v2506_v1 = vmul.f32 %v2485_v37, %v2485_v37  ;;  %v2498_v11 = vadd.f32 %v2485_v37, %v6651_v24  ;;  %v2476_v37 = vmul.f32 %v6689_v31, %v6689_v31 }
 0x32e   : > { %v2525_v33 = vpop.permute.xlu0 %2524  ;;  %v2521_v26 = vpop.permute.xlu1 %2520 }
 0x32f   : > { %v2544_v49 = vmul.f32 %v2521_v26, %v2521_v26 }
 0x332   : > { %v2561_v27 = vpop.permute.xlu1 %2560  ;;  %v2481_v20 = vpop.permute.xlu0 %2480 }
 0x333   : > { %v2504_v53 = vmul.f32 %v2481_v20, %v2481_v20  ;;  %v2496_v18 = vadd.f32 %v2481_v20, %v6657_v50  ;;  %v2474_v20 = vmul.f32 %v6651_v24, %v6651_v24 }
 0x335   : > { %v2512_v3 = vadd.f32 %v2504_v53, %v2472_v12  ;;  %v2536_v38 = vadd.f32 %v2521_v26, %v2496_v18  ;;  %v2546_v53 = vmul.f32 %v2525_v33, %v2525_v33  ;;  %v2514_v60 = vadd.f32 %v2506_v1, %v2474_v20 }
 0x336   : > { %v2527_v22 = vpop.permute.xlu0 %2526  ;;  %v2487_v41 = vpop.permute.xlu1 %2486 }
 0x337   : > { %v2507_v9 = vmul.f32 %v2487_v41, %v2487_v41  ;;  %v2552_v12 = vadd.f32 %v2544_v49, %v2512_v3  ;;  %v2499_v26 = vadd.f32 %v2487_v41, %v6667_v43  ;;  %v2576_v3 = vadd.f32 %v2561_v27, %v2536_v38 }
 0x338   : > { %v2479_v41 = vmul.f32 %v6691_v19, %v6691_v19 }
 0x33a   : > { %v6745_v54 = vpop.permute.xlu0 %2566  ;;  %v2483_v7 = vpop.permute.xlu1 %2482 }
 0x33b   : > { %v2505_v14 = vmul.f32 %v2483_v7, %v2483_v7  ;;  %v2497_v57 = vadd.f32 %v2483_v7, %v6673_v45  ;;  %v2475_v7 = vmul.f32 %v6667_v43, %v6667_v43 }
 0x33d   : > { %v2513_v63 = vadd.f32 %v2505_v14, %v2473_v28  ;;  %v2584_v14 = vmul.f32 %v2561_v27, %v2561_v27  ;;  %v2515_v28 = vadd.f32 %v2507_v9, %v2475_v7  ;;  %v2539_v9 = vadd.f32 %v2527_v22, %v2499_v26 }
 0x33e   : > { %v2523_v39 = vpop.permute.xlu0 %2522  ;;  %v6747_v36 = vpop.permute.xlu1 %2492  ;;  %v2587_v27 = vmul.f32 %v6745_v54, %v6745_v54 }
 0x33f   : > { %v2545_v0 = vmul.f32 %v2523_v39, %v2523_v39  ;;  %v2537_v56 = vadd.f32 %v2523_v39, %v2497_v57  ;;  %v2538_v39 = vadd.f32 %v2525_v33, %v2498_v11  ;;  %v2478_v57 = vmul.f32 %v6679_v55, %v6679_v55 }
 0x340   : > { %v2592_v49 = vadd.f32 %v2584_v14, %v2552_v12  ;;  %v2477_v11 = vmul.f32 %v6697_v61, %v6697_v61 }
 0x341   : > { %v2553_v47 = vadd.f32 %v2545_v0, %v2513_v63  ;;  %v2554_v0 = vadd.f32 %v2546_v53, %v2514_v60  ;;  %v2578_v60 = vadd.f32 %v2565_v44, %v2538_v39 }
 0x342   : > { %v2563_v5 = vpop.permute.xlu0 %2562  ;;  %v6754_v30 = vpop.permute.xlu1 %2532 }
 0x343   : > { %v2585_v13 = vmul.f32 %v2563_v5, %v2563_v5  ;;  %v2577_v51 = vadd.f32 %v2563_v5, %v2537_v56  ;;  %v2547_v56 = vmul.f32 %v2527_v22, %v2527_v22 }
 0x345   : > { %v2593_v18 = vadd.f32 %v2585_v13, %v2553_v47  ;;  %v2600_v5 = vadd.f32 %v2577_v51, %v2576_v3  ;;  %v2586_v47 = vmul.f32 %v2565_v44, %v2565_v44  ;;  %v2555_v33 = vadd.f32 %v2547_v56, %v2515_v28 }
 0x346   : > { %v2489_v46 = vpop.permute.xlu1 %2488  ;;  %v2495_v62 = vpop.permute.xlu0 %2494  ;;  %v2510_v51 = vmul.f32 %v6747_v36, %v6747_v36  ;;  %v2579_v44 = vadd.f32 %v6745_v54, %v2539_v9 }
 0x347   : > { %v2508_v63 = vmul.f32 %v2489_v46, %v2489_v46  ;;  %v2613_v13 = vadd.f32 %v2593_v18, %v2592_v49  ;;  %v2500_v1 = vadd.f32 %v2489_v46, %v6689_v31  ;;  %v2594_v20 = vadd.f32 %v2586_v47, %v2554_v0 }
 0x348   : > { %v2601_v3 = vadd.f32 %v2600_v5, %v2578_v60  ;;  %v2595_v49 = vadd.f32 %v2587_v27, %v2555_v33  ;;  %v2550_v46 = vmul.f32 %v6754_v30, %v6754_v30  ;;  %v2518_v60 = vadd.f32 %v2510_v51, %v2478_v57 }
 0x349   : > { %v2516_v53 = vadd.f32 %v2508_v63, %v2476_v37  ;;  %v2614_v18 = vadd.f32 %v2613_v13, %v2594_v20  ;;  %v2502_v37 = vadd.f32 %v6747_v36, %v6679_v55  ;;  %v2511_v63 = vmul.f32 %v2495_v62, %v2495_v62 }
 0x34a   : > { %v2529_v48 = vpop.permute.xlu1 %2528  ;;  %v2491_v17 = vpop.permute.xlu0 %2490  ;;  %v2503_v54 = vadd.f32 %v2495_v62, %v6691_v19  ;;  %v2602_v9 = vadd.f32 %v2601_v3, %v2579_v44  ;;  %v2558_v20 = vadd.f32 %v2550_v46, %v2518_v60 }
 0x34b   : > { %v2548_v38 = vmul.f32 %v2529_v48, %v2529_v48  ;;  %v2509_v12 = vmul.f32 %v2491_v17, %v2491_v17  ;;  %v2540_v23 = vadd.f32 %v2529_v48, %v2500_v1  ;;  %v2501_v22 = vadd.f32 %v2491_v17, %v6697_v61 }
 0x34d   : > { %v2556_v39 = vadd.f32 %v2548_v38, %v2516_v53  ;;  %v2517_v5 = vadd.f32 %v2509_v12, %v2477_v11  ;;  %v2615_v38 = vadd.f32 %v2614_v18, %v2595_v49 }
 0x34e   : > { %v2569_v7 = vpop.permute.xlu1 %2568  ;;  %v2531_v14 = vpop.permute.xlu0 %2530 }
 0x34f   : > { %v2588_v26 = vmul.f32 %v2569_v7, %v2569_v7  ;;  %v2549_v28 = vmul.f32 %v2531_v14, %v2531_v14  ;;  %v2580_v0 = vadd.f32 %v2569_v7, %v2540_v23  ;;  %v2541_v56 = vadd.f32 %v2531_v14, %v2501_v22 }
 0x350   : > { %v2542_v23 = vadd.f32 %v6754_v30, %v2502_v37  ;;  %v2519_v7 = vadd.f32 %v2511_v63, %v2479_v41 }
 0x351   : > { %v2596_v48 = vadd.f32 %v2588_v26, %v2556_v39  ;;  %v2557_v33 = vadd.f32 %v2549_v28, %v2517_v5  ;;  %v2603_v53 = vadd.f32 %v2602_v9, %v2580_v0 }
 0x352   : > { %v2535_v47 = vpop.permute.xlu1 %2534  ;;  %v2571_v17 = vpop.permute.xlu0 %2570 }
 0x353   : > { %v2581_v13 = vadd.f32 %v2571_v17, %v2541_v56  ;;  %v2551_v27 = vmul.f32 %v2535_v47, %v2535_v47  ;;  %v2589_v1 = vmul.f32 %v2571_v17, %v2571_v17  ;;  %v2616_v36 = vadd.f32 %v2615_v38, %v2596_v48 }
 0x354   : > { %v2543_v14 = vadd.f32 %v2535_v47, %v2503_v54 }
 0x355   : > { %v2597_v11 = vadd.f32 %v2589_v1, %v2557_v33  ;;  %v2604_v26 = vadd.f32 %v2603_v53, %v2581_v13  ;;  %v2559_v3 = vadd.f32 %v2551_v27, %v2519_v7 }
 0x356   : > { %v2575_v12 = vpop.permute.xlu1 %2574  ;;  %v2573_v22 = vpop.permute.xlu0 %2572 }
 0x357   : > { %v2591_v57 = vmul.f32 %v2575_v12, %v2575_v12  ;;  %v2582_v51 = vadd.f32 %v2573_v22, %v2542_v23  ;;  %v2590_v62 = vmul.f32 %v2573_v22, %v2573_v22  ;;  %v2617_v44 = vadd.f32 %v2616_v36, %v2597_v11 }
 0x358   : > { %v2583_v18 = vadd.f32 %v2575_v12, %v2543_v14 }
 0x359   : > { %v2598_v39 = vadd.f32 %v2590_v62, %v2558_v20  ;;  %v2605_v28 = vadd.f32 %v2604_v26, %v2582_v51  ;;  %v2599_v49 = vadd.f32 %v2591_v57, %v2559_v3  ;;  %v2656_v20 = vld [vmem:[#allocation2] sm:$0xe0] }
 0x35a   : > { %v2661_v53 = vsel %vm682_vm8, %v2656_v20, 0  ;;  %v6794_v62 = vld [vmem:[#allocation2] sm:$0xc0]  ;;  %vm7309_vm8 = vcmp.ne.s16.totalorder %v6313_v58, 0  ;;  %v5648_v58 = vld [vmem:[%s7150_s4 + $0x88] sm:$0xff]  }
 0x35b   : > { %v2606_v56 = vadd.f32 %v2605_v28, %v2583_v18  ;;  %v2618_v30 = vadd.f32 %v2617_v44, %v2598_v39  ;;  %v5643_v20 = vld [vmem:[%s7150_s4 + $0x20] sm:$0xff]   ;;  %v2993_v42 = vsel %vm1101_vm5, %v6794_v62, 0 }
 0x35d   : > { %v2607_v46 = vrot.slane %v2606_v56, 4  ;;  %v2619_v0 = vadd.f32 %v2618_v30, %v2599_v49 }
 0x35f   : > { %v2608_v41 = vadd.f32 %v2607_v46, %v2606_v56  ;;  %v2620_v37 = vrot.slane %v2619_v0, 4  ;;  %v2835_v46 = vshll.u32 %v2661_v53, 16 }
 0x361   : > { %v2609_v63 = vrot.slane %v2608_v41, 2  ;;  %v2621_v5 = vadd.f32 %v2620_v37, %v2619_v0 }
 0x363   : > { %v2610_v48 = vadd.f32 %v2609_v63, %v2608_v41  ;;  %v2622_v47 = vrot.slane %v2621_v5, 2 }
 0x365   : > { %v2611_v17 = vrot.slane %v2610_v48, 1  ;;  %v2623_v60 = vadd.f32 %v2622_v47, %v2621_v5 }
 0x367   : > { %v2612_v54 = vadd.f32 %v2611_v17, %v2610_v48  ;;  %v2624_v9 = vrot.slane %v2623_v60, 1  ;;  %v5640_v48 = vld [vmem:[%s7150_s4 + $0x8] sm:$0xff]   ;;  %v2837_v17 = vrot.slane %v2835_v46, 6 }
 0x369   : > { %v2625_v13 = vadd.f32 %v2624_v9, %v2623_v60  ;;  %v2626_v38 = vmul.f32 0.00390625, %v2612_v54  ;;  %v5641_v9 = vld [vmem:[%s7150_s4 + $0x10] sm:$0xff]  }
 0x36b   : > { %v2627_v33 = vmul.f32 0.00390625, %v2625_v13  ;;  %v2628_v27 = vmul.f32 %v2626_v38, %v2626_v38  ;;  %v2630_v7 = vsub.f32 %v6657_v50, %v2626_v38  ;;  %v2631_v36 = vsub.f32 %v6673_v45, %v2626_v38 }
 0x36c   : > { %v2632_v14 = vsub.f32 %v6651_v24, %v2626_v38  ;;  %v2633_v11 = vsub.f32 %v6667_v43, %v2626_v38  ;;  %v2634_v22 = vsub.f32 %v6689_v31, %v2626_v38  ;;  %v2635_v26 = vsub.f32 %v6697_v61, %v2626_v38 }
 0x36d   : > { %v2629_v1 = vsub.f32 %v2627_v33, %v2628_v27  ;;  %v2636_v57 = vsub.f32 %v6679_v55, %v2626_v38  ;;  %v2637_v51 = vsub.f32 %v6691_v19, %v2626_v38  ;;  %v2705_v31 = vrot.slane %v6794_v62, 6 }
 0x36e   : > { %v2832_v19 = vshrl.u32 %v2661_v53, 16  ;;  %v5644_v53 = vld [vmem:[%s7150_s4 + $0x28] sm:$0xff]   ;;  %v3019_v62 = vshll.u32 %v2993_v42, 16 }
 0x36f   : > { %v2638_v23 = vadd.f32 1e-05, %v2629_v1  ;;  %v5642_v1 = vld [vmem:[%s7150_s4 + $0x18] sm:$0xff]  }
 0x370   : > { %v2834_v47 = vrot.slane %v2832_v19, 5 }
 0x371   : > { %5705 = vrsqrt.f32 %v2638_v23 }
 0x372   : > { %v2838_v38 = vor.u32 %v2837_v17, %v2834_v47  ;;  %v5650_v17 = vld [vmem:[%s7150_s4 + $0x98] sm:$0xff]  }
 0x37b   : > { %v5706_v12 = vpop.eup %5705 }
 0x37c   : > { %v2640_v59 = vmul.f32 %v5706_v12, %v2630_v7  ;;  %v2641_v3 = vmul.f32 %v5706_v12, %v2631_v36  ;;  %v2642_v50 = vmul.f32 %v5706_v12, %v2632_v14  ;;  %v2643_v44 = vmul.f32 %v5706_v12, %v2633_v11  ;;  %v5645_v14 = vld [vmem:[%s7150_s4 + $0x30] sm:$0xff]  }
 0x37d   : > { %v2644_v45 = vmul.f32 %v5706_v12, %v2634_v22  ;;  %v2645_v18 = vmul.f32 %v5706_v12, %v2635_v26  ;;  %v2646_v24 = vmul.f32 %v5706_v12, %v2636_v57  ;;  %v2647_v39 = vmul.f32 %v5706_v12, %v2637_v51 }
 0x37e   : > { %v6796_v43 = vpack.c.bf16 %v2641_v3, %v2640_v59  ;;  %v6799_v28 = vpack.c.bf16 %v2643_v44, %v2642_v50 }
 0x37f   : > { %v6801_v61 = vpack.c.bf16 %v2647_v39, %v2646_v24  ;;  %v6803_v55 = vpack.c.bf16 %v2645_v18, %v2644_v45  ;;  %v5647_v45 = vld [vmem:[%s7150_s4 + $0x80] sm:$0xff]   ;;  %v3016_v18 = vshrl.u32 %v2993_v42, 16 }
 0x380   : > { %2652 = vst [vmem:[#allocation2 + $0x8] sm:$0xff] %v6796_v43  ;;  %v2706_v49 = vrot.slane %v6796_v43, 6  ;;  %v2708_v56 = vrot.slane %v6799_v28, 6  ;;  %v2662_v30 = vsel %vm683_vm9, %v6796_v43, 0  ;;  %v2663_v7 = vsel %vm684_vm13, %v6799_v28, 0 }
 0x381   : > { %2655 = vst [vmem:[#allocation2 + $0x20] sm:$0xff] %v6801_v61  ;;  %v2710_v0 = vrot.slane %v6803_v55, 6  ;;  %v2840_v41 = vshrl.u32 %v2662_v30, 16  ;;  %v2843_v37 = vshll.u32 %v2662_v30, 16  ;;  %v2664_v36 = vsel %vm685_vm2, %v6803_v55, 0 }
 0x382   : > { %v2707_v63 = vsel %vm731_vm0, %v2705_v31, %v2706_v49  ;;  %v2709_v5 = vsel %vm731_vm0, %v2706_v49, %v2708_v56  ;;  %v2849_v11 = vshrl.u32 %v2663_v7, 16  ;;  %v2852_v12 = vshll.u32 %v2663_v7, 16 }
 0x383   : > { %5219 = vmatprep.mubr.bf16.mxu1 %v2707_v63  ;;  %v2711_v21 = vsel %vm731_vm0, %v2708_v56, %v2710_v0  ;;  %v2842_v60 = vrot.slane %v2840_v41, 5  ;;  %v2845_v54 = vrot.slane %v2843_v37, 6  ;;  %v2858_v22 = vshrl.u32 %v2664_v36, 16 }
 0x384   : > { %5220 = vmatmul.mubr.bf16.vlgmr.msra.gmra.mrb[0].mxu1 %v2709_v5  ;;  %v2861_v26 = vshll.u32 %v2664_v36, 16  ;;  %v2851_v57 = vrot.slane %v2849_v11, 5  ;;  %v2854_v51 = vrot.slane %v2852_v12, 6  ;;  %v2994_v44 = vsel %vm7309_vm8, %v6796_v43, 0  ;;  %v5649_v5 = vld [vmem:[%s7150_s4 + $0x90] sm:$0xff]  }
 0x385   : > { %5228 = vmatpush3.bf16.msra.mxu1 %v6742_v4  ;;  %5223 = vmatprep.mubr.bf16.mxu1 %v2711_v21  ;;  %v2846_v33 = vor.u32 %v2845_v54, %v2842_v60  ;;  %v2860_v3 = vrot.slane %v2858_v22, 5  ;;  %v3024_v35 = vshrl.u32 %v2994_v44, 16  ;;  %v3027_v19 = vshll.u32 %v2994_v44, 16  ;;  %v5655_v22 = vld [vmem:[%s7150_s4 + $0xc0] sm:$0xff]  }
 0x386   : > { %5229 = vmatprep.subr.bf16.mxu1 %v5640_v48  ;;  %v2863_v50 = vrot.slane %v2861_v26, 6  ;;  %v2855_v24 = vor.u32 %v2854_v51, %v2851_v57  ;;  %v3018_v49 = vrot.slane %v3016_v18, 6  ;;  %vm7310_vm9 = vsmask.f32 1280  ;;  %v3184_v26 = vld [vmem:[#allocation2] sm:$0x80] }
 0x387   : > { %v2847_v4 = vsel %vm858_vm6, %v2838_v38, %v2846_v33  ;;  %v3026_v37 = vrot.slane %v3024_v35, 6  ;;  %v3029_v63 = vrot.slane %v3027_v19, 7  ;;  %vm7313_vm13 = vcmp.ne.s16.totalorder %v6349_v52, 0  ;;  %vm7315_vm5 = vmmov %vm7310_vm9  ;;  %v5658_v35 = vld [vmem:[%s7150_s4 + $0xd8] sm:$0xff]  }
 0x388   : > { %v2660_v13 = vld [vmem:[#allocation2 + $0x20] sm:$0x3f]  ;;  %v2864_v31 = vor.u32 %v2863_v50, %v2860_v3  ;;  %v2856_v56 = vsel %vm858_vm6, %v2846_v33, %v2855_v24  ;;  %vm7314_vm2 = vcmp.ne.s16.totalorder %v7284_v15, 0  ;;  %v3186_v52 = vsel %vm6392_vm12, %v3184_v26, 0  ;;  %v5656_v15 = vld [vmem:[%s7150_s4 + $0xc8] sm:$0xff]   ;;  %vm7317_vm12 = vmmov %vm7315_vm5 }
 0x389   : > { %5230 = vmatpush3.bf16.msra.mxu1 %v5640_v48  ;;  %v2712_v27 = vrot.slane %v2660_v13, 6  ;;  %v2665_v59 = vsel %vm686_vm11, %v2660_v13, 0  ;;  %v3030_v21 = vor.u32 %v3029_v63, %v3026_v37  ;;  %v5652_v13 = vld [vmem:[%s7150_s4 + $0xa8] sm:$0xff]   ;;  %v3187_v12 = vsel %vm7314_vm2, %v6796_v43, 0  ;;  %vm7316_vm11 = vmmov %vm7315_vm5  ;;  %v5662_v63 = vld [vmem:[%s7150_s4 + $0xf8] sm:$0xff]  }
 0x38a   : > { %5231 = vmatprep.subr.bf16.mxu1 %v5641_v9  ;;  %v2867_v39 = vshrl.u32 %v2665_v59, 16  ;;  %v2870_v2 = vshll.u32 %v2665_v59, 16  ;;  %v2865_v41 = vsel %vm858_vm6, %v2855_v24, %v2864_v31  ;;  %v3213_v59 = vshrl.u32 %v3187_v12, 16 }
 0x38b   : > { %v2713_v23 = vsel %vm731_vm0, %v2710_v0, %v2712_v27  ;;  %v3021_v0 = vrot.slane %v3019_v62, 7  ;;  %vm7311_vm0 = vcmp.ne.s16.totalorder %v6357_v29, 0  ;;  %v5653_v27 = vld [vmem:[%s7150_s4 + $0xb0] sm:$0xff]   ;;  %v5654_v29 = vld [vmem:[%s7150_s4 + $0xb8] sm:$0xff]   ;;  %v3209_v18 = vshrl.u32 %v3186_v52, 16  ;;  %v7327_v52 = vld [vmem:[#allocation14_spill] sm:$0xff] }
 0x38c   : > { %5224 = vmatmul.mubr.bf16.gmra.mrb[4].mxu1 %v2713_v23  ;;  %v2869_v30 = vrot.slane %v2867_v39, 5  ;;  %v2872_v46 = vrot.slane %v2870_v2, 6  ;;  %v2995_v38 = vsel %vm7311_vm0, %v6799_v28, 0  ;;  %v3215_v24 = vrot.slane %v3213_v59, 7  ;;  %vm7323_vm0 = vmmov %vm7318_vm4  ;;  %v5676_v59 = vld [vmem:[%s7150_s4 + $0x168] sm:$0xff]  }
 0x38d   : > { %5232 = vmatpush3.bf16.msra.mxu1 %v5641_v9  ;;  %5243 = vmatprep.mubr.bf16.mxu1 %v2847_v4  ;;  %v3022_v47 = vor.u32 %v3021_v0, %v3018_v49  ;;  %v5651_v9 = vld [vmem:[%s7150_s4 + $0xa0] sm:$0xff]   ;;  %v3036_v23 = vshll.u32 %v2995_v38, 16  ;;  %v3216_v39 = vshll.u32 %v3187_v12, 16  ;;  %v3211_v62 = vrot.slane %v3209_v18, 7  ;;  %v5661_v0 = vld [vmem:[%s7150_s4 + $0xf0] sm:$0xff]  }
 0x38e   : > { %5233 = vmatprep.subr.bf16.mxu1 %v5642_v1  ;;  %v2873_v48 = vor.u32 %v2872_v46, %v2869_v30  ;;  %v5659_v49 = vld [vmem:[%s7150_s4 + $0xe0] sm:$0xff]   ;;  %v3188_v30 = vsel %vm7319_vm14, %v6799_v28, 0  ;;  %v3189_v46 = vsel %vm7320_vm10, %v6803_v55, 0  ;;  %vm7321_vm8 = vcmp.ne.s16.totalorder %v7290_v32, 0  ;;  %v7329_v18 = vld [vmem:[#allocation15_spill] sm:$0xff] }
 0x38f   : > { %v3031_v54 = vsel %vm7310_vm9, %v3022_v47, %v3030_v21  ;;  %v3038_v36 = vrot.slane %v3036_v23, 7  ;;  %v3229_v37 = vshrl.u32 %v3189_v46, 16  ;;  %v3190_v34 = vsel %vm7321_vm8, %v6801_v61, 0  ;;  %v5663_v47 = vld [vmem:[%s7150_s4 + $0x100] sm:$0xff]   ;;  %vm7322_vm9 = vmmov %vm7318_vm4  ;;  %v5666_v23 = vld [vmem:[%s7150_s4 + $0x118] sm:$0xff]  }
 0x390   : > { %v2874_v60 = vsel %vm858_vm6, %v2864_v31, %v2873_v48  ;;  %vm7312_vm6 = vcmp.ne.s16.totalorder %v6361_v40, 0  ;;  %v3218_v31 = vor.u32 %v3216_v39, %v3215_v24  ;;  %v3224_v48 = vshll.u32 %v3188_v30, 16 }
 0x391   : > { %5234 = vmatpush3.bf16.msra.mxu1 %v5642_v1  ;;  %v2996_v33 = vsel %vm7312_vm6, %v6803_v55, 0  ;;  %v3033_v1 = vshrl.u32 %v2995_v38, 16  ;;  %vm7324_vm6 = vmmov %vm7323_vm0  ;;  %vm7326_vm2 = vcmp.ne.s16.totalorder %v7292_v16, 0  ;;  %v5674_v16 = vld [vmem:[%s7150_s4 + $0x158] sm:$0xff]   ;;  %vm7342_vm10 = vcmask 1045504  }
 0x392   : > { %5235 = vmatprep.subr.bf16.mxu1 %v5643_v20  ;;  %v3042_v4 = vshrl.u32 %v2996_v33, 16  ;;  %v3513_v12 = vsel %vm7326_vm2, %v6799_v28, 0 }
 0x393   : > { %v3035_v7 = vrot.slane %v3033_v1, 6  ;;  %v3542_v26 = vshll.u32 %v3513_v12, 16  ;;  %v3546_v39 = vshrl.u32 %v3513_v12, 16  ;;  %v5685_v12 = vld [vmem:[%s7150_s4 + $0x1b0] sm:$0xff]  }
 0x394   : > { %v3044_v40 = vrot.slane %v3042_v4, 6 }
 0x395   : > { %5236 = vmatpush3.bf16.msra.mxu1 %v5643_v20  ;;  %v3045_v20 = vshll.u32 %v2996_v33, 16  ;;  %v3240_v33 = vshll.u32 %v3190_v34, 16 }
 0x396   : > { %5237 = vmatprep.subr.bf16.mxu1 %v5644_v53 }
 0x399   : > { %5238 = vmatpush3.bf16.msra.mxu1 %v5644_v53  ;;  %v2992_v53 = vld [vmem:[#allocation2 + $0x20] sm:$0x7f] }
 0x39a   : > { %5239 = vmatprep.subr.bf16.mxu1 %v5645_v14  ;;  %v2997_v11 = vsel %vm7313_vm13, %v2992_v53, 0  ;;  %v5668_v53 = vld [vmem:[%s7150_s4 + $0x128] sm:$0xff]   ;;  %vm7325_vm13 = vcmp.ne.s16.totalorder %v7291_v8, 0 }
 0x39b   : > { %v3051_v57 = vshrl.u32 %v2997_v11, 16  ;;  %v3054_v51 = vshll.u32 %v2997_v11, 16  ;;  %v5672_v11 = vld [vmem:[%s7150_s4 + $0x148] sm:$0xff]  }
 0x39d   : > { %5240 = vmatpush3.bf16.msra.mxu1 %v5645_v14  ;;  %v3047_v14 = vrot.slane %v3045_v20, 7  ;;  %v3053_v50 = vrot.slane %v3051_v57, 6  ;;  %v3056_v44 = vrot.slane %v3054_v51, 7  ;;  %v5667_v20 = vld [vmem:[%s7150_s4 + $0x120] sm:$0xff]   ;;  %v3544_v57 = vrot.slane %v3542_v26, 1 }
 0x39e   : > { %5241 = vmatprep.subr.bf16.mxu1 %v5646_v6 }
 0x39f   : > { %v3048_v42 = vor.u32 %v3047_v14, %v3044_v40  ;;  %v3057_v2 = vor.u32 %v3056_v44, %v3053_v50  ;;  %v5671_v40 = vld [vmem:[%s7150_s4 + $0x140] sm:$0xff]   ;;  %v5678_v44 = vld [vmem:[%s7150_s4 + $0x178] sm:$0xff]  }
 0x3a1   : > { %5242 = vmatpush3.bf16.msra.mxu1 %v5646_v6  ;;  %v3039_v6 = vor.u32 %v3038_v36, %v3035_v7  ;;  %v3058_v19 = vsel %vm7317_vm12, %v3048_v42, %v3057_v2  ;;  %v5670_v7 = vld [vmem:[%s7150_s4 + $0x138] sm:$0xff]   ;;  %v3512_v36 = vsel %vm7325_vm13, %v6796_v43, 0  ;;  %v3511_v2 = vld [vmem:[#allocation2 + $0x28] sm:$0x1] }
 0x3a2   : > { %5251 = vmatprep.subr.bf16.mxu1 %v5647_v45  ;;  %v3537_v14 = vshll.u32 %v3512_v36, 16 }
 0x3a3   : > { %v3040_v3 = vsel %vm7315_vm5, %v3030_v21, %v3039_v6  ;;  %v3232_v21 = vshll.u32 %v3189_v46, 16  ;;  %vm7328_vm5 = vcmp.ne.s16.totalorder %v7327_v52, 0  ;;  %v7340_v52 = vld [vmem:[#allocation18_spill] sm:$0xff] }
 0x3a4   : > { %5244 = vmatmul.mubr.bf16.vlgmr.msra.gmra.mrb[0].mxu1 %v2856_v56  ;;  %v5660_v56 = vld [vmem:[%s7150_s4 + $0xe8] sm:$0xff]   ;;  %v3539_v8 = vrot.slane %v3537_v14, 1  ;;  %v7338_v14 = vld [vmem:[#allocation20_spill] sm:$0xff]  ;;  %vm7341_vm14 = vcmp.ne.s16.totalorder %v7340_v52, 0 }
 0x3a5   : > { %5247 = vmatprep.mubr.bf16.mxu1 %v2865_v41  ;;  %5252 = vmatpush3.bf16.msra.mxu1 %v5647_v45  ;;  %v3049_v45 = vsel %vm7316_vm11, %v3039_v6, %v3048_v42  ;;  %v3221_v41 = vshrl.u32 %v3188_v30, 16  ;;  %v5675_v42 = vld [vmem:[%s7150_s4 + $0x160] sm:$0xff]   ;;  %vm7330_vm11 = vcmp.ne.s16.totalorder %v7329_v18, 0 }
 0x3a6   : > { %5253 = vmatprep.subr.bf16.mxu1 %v5648_v58 }
 0x3a7   : > { %v3223_v25 = vrot.slane %v3221_v41, 7  ;;  %v3516_v41 = vsel %vm6511_vm15, %v3511_v2, 0 }
 0x3a9   : > { %5254 = vmatpush3.bf16.msra.mxu1 %v5648_v58  ;;  %v3219_v58 = vsel %vm7318_vm4, %v3211_v62, %v3218_v31  ;;  %v7331_v62 = vld [vmem:[#allocation13_spill] sm:$0xff] }
 0x3aa   : > { %5255 = vmatprep.subr.bf16.mxu1 %v5649_v5  ;;  %vm7332_vm12 = vcmp.ne.s16.totalorder %v7331_v62, 0 }
 0x3ac   : > { %5248 = vmatmul.mubr.bf16.gmra.mrb[4].mxu1 %v2874_v60  ;;  %v3237_v60 = vshrl.u32 %v3190_v34, 16 }
 0x3ad   : > { %5256 = vmatpush3.bf16.msra.mxu1 %v5649_v5  ;;  %5267 = vmatprep.mubr.bf16.mxu1 %v3031_v54  ;;  %v3231_v5 = vrot.slane %v3229_v37, 7 }
 0x3ae   : > { %5257 = vmatprep.subr.bf16.mxu1 %v5650_v17 }
 0x3af   : > { %v3234_v54 = vor.u32 %v3232_v21, %v3231_v5  ;;  %v3566_v21 = vshll.u32 %v3516_v41, 16  ;;  %v5692_v41 = vld [vmem:[%s7150_s4 + $0x1e8] sm:$0xff]  }
 0x3b1   : > { %5258 = vmatpush3.bf16.msra.mxu1 %v5650_v17  ;;  %v3226_v17 = vor.u32 %v3224_v48, %v3223_v25  ;;  %v3235_v38 = vsel %vm7323_vm0, %v3223_v25, %v3234_v54 }
 0x3b2   : > { %5259 = vmatprep.subr.bf16.mxu1 %v5651_v9 }
 0x3b3   : > { %v3227_v32 = vsel %vm7322_vm9, %v3215_v24, %v3226_v17  ;;  %v3515_v24 = vsel %vm7330_vm11, %v6801_v61, 0  ;;  %vm7347_vm9 = vmmov %vm7342_vm10 }
 0x3b4   : > { %vm7348_vm0 = vmmov %vm7347_vm9 }
 0x3b5   : > { %5260 = vmatpush3.bf16.msra.mxu1 %v5651_v9  ;;  %v5664_v9 = vld [vmem:[%s7150_s4 + $0x108] sm:$0xff]  }
 0x3b6   : > { %5261 = vmatprep.subr.bf16.mxu1 %v5652_v13 }
 0x3b9   : > { %5262 = vmatpush3.bf16.msra.mxu1 %v5652_v13  ;;  %v3239_v13 = vrot.slane %v3237_v60, 7 }
 0x3ba   : > { %5263 = vmatprep.subr.bf16.mxu1 %v5653_v27 }
 0x3bb   : > { %v3242_v1 = vor.u32 %v3240_v33, %v3239_v13 }
 0x3bd   : > { %5264 = vmatpush3.bf16.msra.mxu1 %v5653_v27  ;;  %v5665_v27 = vld [vmem:[%s7150_s4 + $0x110] sm:$0xff]   ;;  %v3243_v4 = vsel %vm7324_vm6, %v3231_v5, %v3242_v1  ;;  %v5680_v5 = vld [vmem:[%s7150_s4 + $0x188] sm:$0xff]   ;;  %vm7349_vm6 = vmmov %vm7348_vm0 }
 0x3be   : > { %5265 = vmatprep.subr.bf16.mxu1 %v5654_v29 }
 0x3c1   : > { %5266 = vmatpush3.bf16.msra.mxu1 %v5654_v29  ;;  %v5669_v29 = vld [vmem:[%s7150_s4 + $0x130] sm:$0xff]  }
 0x3c2   : > { %5275 = vmatprep.subr.bf16.mxu1 %v5655_v22 }
 0x3c4   : > { %5268 = vmatmul.mubr.bf16.vlgmr.msra.gmra.mrb[0].mxu1 %v3040_v3  ;;  %v5677_v3 = vld [vmem:[%s7150_s4 + $0x170] sm:$0xff]  }
 0x3c5   : > { %5271 = vmatprep.mubr.bf16.mxu1 %v3049_v45  ;;  %5276 = vmatpush3.bf16.msra.mxu1 %v5655_v22  ;;  %v3535_v22 = vshrl.u32 %v3512_v36, 16  ;;  %v3695_v45 = vld [vmem:[#allocation2 + $0x8] sm:$0xfe]  ;;  %v7336_v36 = vld [vmem:[#allocation17_spill] sm:$0xff] }
 0x3c6   : > { %5277 = vmatprep.subr.bf16.mxu1 %v5656_v15  ;;  %v3697_v31 = vsel %vm7332_vm12, %v3695_v45, 0  ;;  %vm7337_vm15 = vcmp.ne.s16.totalorder %v7336_v36, 0 }
 0x3c7   : > { %v3540_v6 = vor.u32 %v3539_v8, %v3535_v22  ;;  %v3720_v37 = vshrl.u32 %v3697_v31, 16 }
 0x3c9   : > { %5278 = vmatpush3.bf16.msra.mxu1 %v5656_v15  ;;  %v3545_v51 = vsel %vm1300_vm3, %v3540_v6, %v3544_v57  ;;  %v3514_v15 = vsel %vm7328_vm5, %v6803_v55, 0  ;;  %v3722_v60 = vrot.slane %v3720_v37, 1  ;;  %v7038_v6 = vld [vmem:[#allocation2 + $0x28] sm:$0x3]  ;;  %v5693_v37 = vld [vmem:[%s7150_s4 + $0x1f0] sm:$0xff]  }
 0x3ca   : > { %5279 = vmatprep.subr.bf16.mxu1 %v5657_v10  ;;  %v3550_v50 = vshll.u32 %v3514_v15, 16 }
 0x3cc   : > { %5272 = vmatmul.mubr.bf16.gmra.mrb[4].mxu1 %v3058_v19  ;;  %v3554_v19 = vshrl.u32 %v3514_v15, 16  ;;  %v3701_v15 = vsel %vm7341_vm14, %v7038_v6, 0 }
 0x3cd   : > { %5280 = vmatpush3.bf16.msra.mxu1 %v5657_v10  ;;  %5291 = vmatprep.mubr.bf16.mxu1 %v3219_v58  ;;  %v3552_v10 = vrot.slane %v3550_v50, 1  ;;  %v3558_v58 = vshll.u32 %v3515_v24, 16  ;;  %v3758_v45 = vshll.u32 %v3701_v15, 16 }
 0x3ce   : > { %5281 = vmatprep.subr.bf16.mxu1 %v5658_v35 }
 0x3cf   : > { %v3556_v46 = vor.u32 %v3554_v19, %v3552_v10  ;;  %v3560_v25 = vrot.slane %v3558_v58, 1  ;;  %v3760_v2 = vrot.slane %v3758_v45, 2 }
 0x3d1   : > { %5282 = vmatpush3.bf16.msra.mxu1 %v5658_v35  ;;  %v5679_v35 = vld [vmem:[%s7150_s4 + $0x180] sm:$0xff]   ;;  %v3561_v17 = vsel %vm1300_vm3, %v3556_v46, %v3560_v25 }
 0x3d2   : > { %5283 = vmatprep.subr.bf16.mxu1 %v5659_v49 }
 0x3d5   : > { %5284 = vmatpush3.bf16.msra.mxu1 %v5659_v49  ;;  %v3548_v49 = vor.u32 %v3546_v39, %v3544_v57  ;;  %v5686_v57 = vld [vmem:[%s7150_s4 + $0x1b8] sm:$0xff]  }
 0x3d6   : > { %5285 = vmatprep.subr.bf16.mxu1 %v5660_v56 }
 0x3d9   : > { %5286 = vmatpush3.bf16.msra.mxu1 %v5660_v56  ;;  %v7333_v56 = vld [vmem:[#allocation16_spill] sm:$0xff] }
 0x3da   : > { %5287 = vmatprep.subr.bf16.mxu1 %v5661_v0  ;;  %vm7334_vm4 = vcmp.ne.s16.totalorder %v7333_v56, 0  ;;  %v5690_v56 = vld [vmem:[%s7150_s4 + $0x1d8] sm:$0xff]  }
 0x3db   : > { %v3698_v30 = vsel %vm7334_vm4, %v6799_v28, 0 }
 0x3dc   : > { %v3728_v34 = vshrl.u32 %v3698_v30, 16  ;;  %v3731_v48 = vshll.u32 %v3698_v30, 16 }
 0x3dd   : > { %5288 = vmatpush3.bf16.msra.mxu1 %v5661_v0  ;;  %v5691_v0 = vld [vmem:[%s7150_s4 + $0x1e0] sm:$0xff]  }
 0x3de   : > { %5289 = vmatprep.subr.bf16.mxu1 %v5662_v63  ;;  %v3730_v13 = vrot.slane %v3728_v34, 1  ;;  %v5695_v34 = vld [vmem:[%s7150_s4 + $0x200] sm:$0xff]  }
 0x3e1   : > { %5290 = vmatpush3.bf16.msra.mxu1 %v5662_v63  ;;  %v3723_v63 = vshll.u32 %v3697_v31, 16  ;;  %v3888_v31 = vld [vmem:[#allocation2 + $0x8] sm:$0xfc] }
 0x3e2   : > { %5299 = vmatprep.subr.bf16.mxu1 %v5663_v47  ;;  %v3911_v58 = vrot.slane %v3888_v31, 2 }
 0x3e3   : > { %v3725_v54 = vrot.slane %v3723_v63, 2  ;;  %v5694_v63 = vld [vmem:[%s7150_s4 + $0x1f8] sm:$0xff]  }
 0x3e4   : > { %5292 = vmatmul.mubr.bf16.vlgmr.msra.gmra.mrb[0].mxu1 %v3227_v32  ;;  %v5681_v32 = vld [vmem:[%s7150_s4 + $0x190] sm:$0xff]  }
 0x3e5   : > { %5295 = vmatprep.mubr.bf16.mxu1 %v3235_v38  ;;  %5300 = vmatpush3.bf16.msra.mxu1 %v5663_v47  ;;  %v3553_v47 = vsel %vm1300_vm3, %v3548_v49, %v3552_v10  ;;  %v3733_v38 = vrot.slane %v3731_v48, 2  ;;  %v3726_v1 = vor.u32 %v3725_v54, %v3722_v60  ;;  %v3912_v49 = vrot.slane %v6799_v28, 2 }
 0x3e6   : > { %5301 = vmatprep.subr.bf16.mxu1 %v5664_v9  ;;  %v3914_v48 = vrot.slane %v6803_v55, 2 }
 0x3e7   : > { %v3913_v46 = vsel %vm7342_vm10, %v3911_v58, %v3912_v49 }
 0x3e9   : > { %5302 = vmatpush3.bf16.msra.mxu1 %v5664_v9  ;;  %v3562_v9 = vshrl.u32 %v3515_v24, 16  ;;  %v5688_v24 = vld [vmem:[%s7150_s4 + $0x1c8] sm:$0xff]  }
 0x3ea   : > { %5303 = vmatprep.subr.bf16.mxu1 %v5665_v27 }
 0x3eb   : > { %v3564_v33 = vor.u32 %v3562_v9, %v3560_v25  ;;  %v7343_v25 = vld [vmem:[#allocation19_spill] sm:$0xff]  ;;  %v5696_v9 = vld [vmem:[%s7150_s4 + $0x208] sm:$0xff]  }
 0x3ec   : > { %5296 = vmatmul.mubr.bf16.gmra.mrb[4].mxu1 %v3243_v4  ;;  %v5682_v4 = vld [vmem:[%s7150_s4 + $0x198] sm:$0xff]  }
 0x3ed   : > { %5304 = vmatpush3.bf16.msra.mxu1 %v5665_v27  ;;  %5315 = vmatprep.mubr.bf16.mxu1 %v6796_v43  ;;  %v5673_v43 = vld [vmem:[%s7150_s4 + $0x150] sm:$0xff]   ;;  %v3568_v27 = vrot.slane %v3566_v21, 1 }
 0x3ee   : > { %5305 = vmatprep.subr.bf16.mxu1 %v5666_v23 }
 0x3f1   : > { %5306 = vmatpush3.bf16.msra.mxu1 %v5666_v23  ;;  %v3734_v23 = vor.u32 %v3733_v38, %v3730_v13  ;;  %v3915_v38 = vsel %vm7347_vm9, %v3912_v49, %v3914_v48  ;;  %v4766_v49 = vld [vmem:[%s7152_s6] ss:$0 sm:$0xff] }
 0x3f2   : > { %5307 = vmatprep.subr.bf16.mxu1 %v5667_v20 }
 0x3f5   : > { %5308 = vmatpush3.bf16.msra.mxu1 %v5667_v20  ;;  %v3569_v20 = vsel %vm1300_vm3, %v3564_v33, %v3568_v27  ;;  %vm7339_vm3 = vcmp.ne.s16.totalorder %v7338_v14, 0  ;;  %v5699_v14 = vld [vmem:[%s7150_s4 + $0x220] sm:$0xff]  }
 0x3f6   : > { %5309 = vmatprep.subr.bf16.mxu1 %v5668_v53 }
 0x3f9   : > { %5310 = vmatpush3.bf16.msra.mxu1 %v5668_v53  ;;  %v3735_v53 = vsel %vm1065_vm1, %v3726_v1, %v3734_v23 }
 0x3fa   : > { %5311 = vmatprep.subr.bf16.mxu1 %v5669_v29 }
 0x3fd   : > { %5312 = vmatpush3.bf16.msra.mxu1 %v5669_v29  ;;  %v5683_v29 = vld [vmem:[%s7150_s4 + $0x1a0] sm:$0xff]  }
 0x3fe   : > { %5313 = vmatprep.subr.bf16.mxu1 %v5670_v7 }
 0x401   : > { %5314 = vmatpush3.bf16.msra.mxu1 %v5670_v7  ;;  %v5684_v7 = vld [vmem:[%s7150_s4 + $0x1a8] sm:$0xff]  }
 0x402   : > { %5323 = vmatprep.subr.bf16.mxu1 %v5671_v40 }
 0x404   : > { %5316 = vmatmul.mubr.bf16.vlgmr.msra.gmra.mrb[0].mxu1 %v6799_v28 }
 0x405   : > { %5319 = vmatprep.mubr.bf16.mxu1 %v6803_v55  ;;  %5324 = vmatpush3.bf16.msra.mxu1 %v5671_v40  ;;  %v3699_v40 = vsel %vm7337_vm15, %v6803_v55, 0 }
 0x406   : > { %5325 = vmatprep.subr.bf16.mxu1 %v5672_v11  ;;  %v3737_v8 = vshrl.u32 %v3699_v40, 16 }
 0x409   : > { %5326 = vmatpush3.bf16.msra.mxu1 %v5672_v11  ;;  %v3700_v11 = vsel %vm7339_vm3, %v6801_v61, 0 }
 0x40a   : > { %5327 = vmatprep.subr.bf16.mxu1 %v5673_v43  ;;  %v3746_v22 = vshrl.u32 %v3700_v11, 16  ;;  %v3749_v26 = vshll.u32 %v3700_v11, 16  ;;  %v5700_v11 = vld [vmem:[%s7150_s4 + $0x228] sm:$0xff]  }
 0x40c   : > { %5320 = vmatmul.mubr.bf16.gmra.mrb[4].mxu1 %v6801_v61 }
 0x40d   : > { %5328 = vmatpush3.bf16.msra.mxu1 %v5673_v43  ;;  %5339 = vmatprep.mubr.bf16.mxu1 %v3545_v51  ;;  %v3740_v43 = vshll.u32 %v3699_v40, 16 }
 0x40e   : > { %5329 = vmatprep.subr.bf16.mxu1 %v5674_v16 }
 0x40f   : > { %v3742_v51 = vrot.slane %v3740_v43, 2  ;;  %v7352_v43 = vld [vmem:[#allocation24_spill] sm:$0xff] }
 0x410   : > { %vm7353_vm2 = vcmp.ne.s16.totalorder %v7352_v43, 0 }
 0x411   : > { %5330 = vmatpush3.bf16.msra.mxu1 %v5674_v16  ;;  %v3739_v16 = vrot.slane %v3737_v8, 1 }
 0x412   : > { %5331 = vmatprep.subr.bf16.mxu1 %v5675_v42 }
 0x413   : > { %v3743_v50 = vor.u32 %v3742_v51, %v3739_v16 }
 0x415   : > { %5332 = vmatpush3.bf16.msra.mxu1 %v5675_v42  ;;  %v3748_v42 = vrot.slane %v3746_v22, 1  ;;  %v3744_v10 = vsel %vm1065_vm1, %v3734_v23, %v3743_v50  ;;  %v4049_v22 = vsel %vm7353_vm2, %v6801_v61, 0 }
 0x416   : > { %5333 = vmatprep.subr.bf16.mxu1 %v5676_v59  ;;  %v4095_v16 = vshrl.u32 %v4049_v22, 16  ;;  %v4098_v51 = vshll.u32 %v4049_v22, 16 }
 0x419   : > { %5334 = vmatpush3.bf16.msra.mxu1 %v5676_v59  ;;  %v3751_v59 = vrot.slane %v3749_v26, 2  ;;  %v5701_v26 = vld [vmem:[%s7150_s4 + $0x230] sm:$0xff]  }
 0x41a   : > { %5335 = vmatprep.subr.bf16.mxu1 %v5677_v3 }
 0x41b   : > { %v3752_v18 = vor.u32 %v3751_v59, %v3748_v42  ;;  %v4045_v42 = vld [vmem:[#allocation2 + $0x28] sm:$0x7] }
 0x41d   : > { %5336 = vmatpush3.bf16.msra.mxu1 %v5677_v3  ;;  %v5687_v3 = vld [vmem:[%s7150_s4 + $0x1c0] sm:$0xff]   ;;  %v3753_v62 = vsel %vm1065_vm1, %v3743_v50, %v3752_v18 }
 0x41e   : > { %5337 = vmatprep.subr.bf16.mxu1 %v5678_v44 }
 0x421   : > { %5338 = vmatpush3.bf16.msra.mxu1 %v5678_v44  ;;  %v3755_v44 = vshrl.u32 %v3701_v15, 16  ;;  %v4097_v15 = vrot.slane %v4095_v16, 2 }
 0x422   : > { %5347 = vmatprep.subr.bf16.mxu1 %v5679_v35 }
 0x423   : > { %v3757_v39 = vrot.slane %v3755_v44, 1 }
 0x424   : > { %5340 = vmatmul.mubr.bf16.vlgmr.msra.gmra.mrb[0].mxu1 %v3553_v47  ;;  %v7345_v47 = vld [vmem:[#allocation21_spill] sm:$0xff] }
 0x425   : > { %5343 = vmatprep.mubr.bf16.mxu1 %v3561_v17  ;;  %5348 = vmatpush3.bf16.msra.mxu1 %v5679_v35  ;;  %v5689_v35 = vld [vmem:[%s7150_s4 + $0x1d0] sm:$0xff]   ;;  %v3761_v19 = vor.u32 %v3760_v2, %v3757_v39  ;;  %vm7346_vm8 = vcmp.ne.s16.totalorder %v7345_v47, 0  ;;  %v3916_v17 = vrot.slane %v6801_v61, 2  ;;  %v4100_v61 = vrot.slane %v4098_v51, 3 }
 0x426   : > { %5349 = vmatprep.subr.bf16.mxu1 %v5680_v5  ;;  %v4047_v21 = vsel %vm7346_vm8, %v6799_v28, 0  ;;  %v5697_v28 = vld [vmem:[%s7150_s4 + $0x210] sm:$0xff]  }
 0x427   : > { %v3762_v30 = vsel %vm1065_vm1, %v3752_v18, %v3761_v19  ;;  %vm7344_vm1 = vcmp.ne.s16.totalorder %v7343_v25, 0  ;;  %v4080_v13 = vshll.u32 %v4047_v21, 16  ;;  %v3917_v33 = vsel %vm7348_vm0, %v3914_v48, %v3916_v17  ;;  %v4765_v19 = vld [vmem:[%s7151_s5] ss:$0 sm:$0xff] }
 0x429   : > { %5350 = vmatpush3.bf16.msra.mxu1 %v5680_v5  ;;  %v4046_v5 = vsel %vm7344_vm1, %v3888_v31, 0 }
 0x42a   : > { %5351 = vmatprep.subr.bf16.mxu1 %v5681_v32  ;;  %v4069_v60 = vshrl.u32 %v4046_v5, 16  ;;  %v4072_v54 = vshll.u32 %v4046_v5, 16 }
 0x42c   : > { %5344 = vmatmul.mubr.bf16.gmra.mrb[4].mxu1 %v3569_v20  ;;  %v4071_v27 = vrot.slane %v4069_v60, 2  ;;  %v4074_v1 = vrot.slane %v4072_v54, 3  ;;  %v3918_v20 = vrot.slane %v7038_v6, 2 }
 0x42d   : > { %5352 = vmatpush3.bf16.msra.mxu1 %v5681_v32  ;;  %5363 = vmatprep.mubr.bf16.mxu1 %v3735_v53  ;;  %v4077_v32 = vshrl.u32 %v4047_v21, 16 }
 0x42e   : > { %5353 = vmatprep.subr.bf16.mxu1 %v5682_v4  ;;  %v4075_v53 = vor.u32 %v4074_v1, %v4071_v27  ;;  %v3919_v36 = vsel %vm7349_vm6, %v3916_v17, %v3918_v20 }
 0x42f   : > { %v4079_v23 = vrot.slane %v4077_v32, 2 }
 0x431   : > { %5354 = vmatpush3.bf16.msra.mxu1 %v5682_v4  ;;  %v4082_v4 = vrot.slane %v4080_v13, 3 }
 0x432   : > { %5355 = vmatprep.subr.bf16.mxu1 %v5683_v29 }
 0x435   : > { %5356 = vmatpush3.bf16.msra.mxu1 %v5683_v29  ;;  %v4083_v29 = vor.u32 %v4082_v4, %v4079_v23 }
 0x436   : > { %5357 = vmatprep.subr.bf16.mxu1 %v5684_v7 }
 0x437   : > { %v4084_v40 = vsel %vm646_vm7, %v4075_v53, %v4083_v29 }
 0x439   : > { %5358 = vmatpush3.bf16.msra.mxu1 %v5684_v7  ;;  %v5698_v7 = vld [vmem:[%s7150_s4 + $0x218] sm:$0xff]  }
 0x43a   : > { %5359 = vmatprep.subr.bf16.mxu1 %v5685_v12 }
 0x43d   : > { %5360 = vmatpush3.bf16.msra.mxu1 %v5685_v12  ;;  %v7350_v12 = vld [vmem:[#allocation23_spill] sm:$0xff] }
 0x43e   : > { %5361 = vmatprep.subr.bf16.mxu1 %v5686_v57  ;;  %vm7351_vm13 = vcmp.ne.s16.totalorder %v7350_v12, 0 }
 0x43f   : > { %v4048_v8 = vsel %vm7351_vm13, %v6803_v55, 0  ;;  %v5702_v55 = vld [vmem:[%s7150_s4 + $0x238] sm:$0xff]  }
 0x440   : > { %v4086_v6 = vshrl.u32 %v4048_v8, 16 }
 0x441   : > { %5362 = vmatpush3.bf16.msra.mxu1 %v5686_v57  ;;  %v4089_v57 = vshll.u32 %v4048_v8, 16 }
 0x442   : > { %5371 = vmatprep.subr.bf16.mxu1 %v5687_v3  ;;  %v4088_v59 = vrot.slane %v4086_v6, 2 }
 0x443   : > { %v4091_v52 = vrot.slane %v4089_v57, 3 }
 0x444   : > { %5364 = vmatmul.mubr.bf16.vlgmr.msra.gmra.mrb[0].mxu1 %v3744_v10 }
 0x445   : > { %5367 = vmatprep.mubr.bf16.mxu1 %v3753_v62  ;;  %5372 = vmatpush3.bf16.msra.mxu1 %v5687_v3  ;;  %v7354_v3 = vld [vmem:[#allocation22_spill] sm:$0xff]  ;;  %v4092_v44 = vor.u32 %v4091_v52, %v4088_v59 }
 0x446   : > { %5373 = vmatprep.subr.bf16.mxu1 %v5688_v24  ;;  %vm7355_vm5 = vcmp.ne.s16.totalorder %v7354_v3, 0 }
 0x447   : > { %v4050_v50 = vsel %vm7355_vm5, %v4045_v42, 0  ;;  %v4093_v10 = vsel %vm646_vm7, %v4083_v29, %v4092_v44 }
 0x448   : > { %v4104_v45 = vshrl.u32 %v4050_v50, 16  ;;  %v4107_v18 = vshll.u32 %v4050_v50, 16 }
 0x449   : > { %5374 = vmatpush3.bf16.msra.mxu1 %v5688_v24  ;;  %v4101_v24 = vor.u32 %v4100_v61, %v4097_v15 }
 0x44a   : > { %5375 = vmatprep.subr.bf16.mxu1 %v5689_v35  ;;  %v4106_v39 = vrot.slane %v4104_v45, 2  ;;  %v4109_v2 = vrot.slane %v4107_v18, 3 }
 0x44b   : > { %v4102_v62 = vsel %vm646_vm7, %v4092_v44, %v4101_v24 }
 0x44c   : > { %5368 = vmatmul.mubr.bf16.gmra.mrb[4].mxu1 %v3762_v30  ;;  %v4110_v31 = vor.u32 %v4109_v2, %v4106_v39 }
 0x44d   : > { %5376 = vmatpush3.bf16.msra.mxu1 %v5689_v35  ;;  %5387 = vmatprep.mubr.bf16.mxu1 %v3913_v46 }
 0x44e   : > { %5377 = vmatprep.subr.bf16.mxu1 %v5690_v56  ;;  %v4111_v35 = vsel %vm646_vm7, %v4101_v24, %v4110_v31 }
 0x451   : > { %5378 = vmatpush3.bf16.msra.mxu1 %v5690_v56 }
 0x452   : > { %5379 = vmatprep.subr.bf16.mxu1 %v5691_v0 }
 0x455   : > { %5380 = vmatpush3.bf16.msra.mxu1 %v5691_v0 }
 0x456   : > { %5381 = vmatprep.subr.bf16.mxu1 %v5692_v41 }
 0x459   : > { %5382 = vmatpush3.bf16.msra.mxu1 %v5692_v41 }
 0x45a   : > { %5383 = vmatprep.subr.bf16.mxu1 %v5693_v37 }
 0x45d   : > { %5384 = vmatpush3.bf16.msra.mxu1 %v5693_v37 }
 0x45e   : > { %5385 = vmatprep.subr.bf16.mxu1 %v5694_v63 }
 0x461   : > { %5386 = vmatpush3.bf16.msra.mxu1 %v5694_v63 }
 0x462   : > { %5395 = vmatprep.subr.bf16.mxu1 %v5695_v34 }
 0x464   : > { %5388 = vmatmul.mubr.bf16.vlgmr.msra.gmra.mrb[0].mxu1 %v3915_v38 }
 0x465   : > { %5391 = vmatprep.mubr.bf16.mxu1 %v3917_v33  ;;  %5396 = vmatpush3.bf16.msra.mxu1 %v5695_v34 }
 0x466   : > { %5397 = vmatprep.subr.bf16.mxu1 %v5696_v9 }
 0x469   : > { %5398 = vmatpush3.bf16.msra.mxu1 %v5696_v9 }
 0x46a   : > { %5399 = vmatprep.subr.bf16.mxu1 %v5697_v28 }
 0x46c   : > { %5392 = vmatmul.mubr.bf16.gmra.mrb[4].mxu1 %v3919_v36 }
 0x46d   : > { %5400 = vmatpush3.bf16.msra.mxu1 %v5697_v28  ;;  %5411 = vmatprep.mubr.bf16.mxu1 %v4084_v40 }
 0x46e   : > { %5401 = vmatprep.subr.bf16.mxu1 %v5698_v7 }
 0x471   : > { %5402 = vmatpush3.bf16.msra.mxu1 %v5698_v7 }
 0x472   : > { %5403 = vmatprep.subr.bf16.mxu1 %v5699_v14 }
 0x475   : > { %5404 = vmatpush3.bf16.msra.mxu1 %v5699_v14 }
 0x476   : > { %5405 = vmatprep.subr.bf16.mxu1 %v5700_v11 }
 0x479   : > { %5406 = vmatpush3.bf16.msra.mxu1 %v5700_v11 }
 0x47a   : > { %5407 = vmatprep.subr.bf16.mxu1 %v5701_v26 }
 0x47d   : > { %5408 = vmatpush3.bf16.msra.mxu1 %v5701_v26 }
 0x47e   : > { %5409 = vmatprep.subr.bf16.mxu1 %v5702_v55 }
 0x481   : > { %5410 = vmatpush3.bf16.msra.mxu1 %v5702_v55 }
 0x484   : > { %5412 = vmatmul.mubr.bf16.vlgmr.msra.gmra.mrb[0].mxu1 %v4093_v10 }
 0x485   : > { %5415 = vmatprep.mubr.bf16.mxu1 %v4102_v62 }
 0x48c   : > { %5416 = vmatmul.mubr.bf16.gmra.mrb[4].mxu1 %v4111_v35 }
 0x557   : > { %v5413_v58 = vpop.f32.mrb[0].mxu1 }
 0x558   : > { %v4246_v56 = vadd.f32 %v5413_v58, %v4765_v19  ;;  %v4198_v30 = vpop.f32.mrb[1].mxu1 }
 0x559   : > { %v4244_v46 = vadd.f32 %v4765_v19, %v4198_v30  ;;  %v5414_v0 = vpop.f32.mrb[2].mxu1 }
 0x55a   : > { %vm4255_vm7 = vcmp.gt.f32.partialorder %v4246_v56, 0.0  ;;  %v4269_v41 = vmul.f32 %v4766_v49, %v4246_v56  ;;  %v4247_v37 = vadd.f32 %v5414_v0, %v4765_v19  ;;  %v4201_v63 = vpop.f32.mrb[3].mxu1 }
 0x55b   : > { %vm4253_vm11 = vcmp.gt.f32.partialorder %v4244_v46, 0.0  ;;  %v4267_v25 = vmul.f32 %v4766_v49, %v4244_v46  ;;  %v4245_v5 = vadd.f32 %v4765_v19, %v4201_v63 }
 0x55c   : > { %v4277_v34 = vsel %vm4255_vm7, %v4246_v56, %v4269_v41  ;;  %vm4256_vm12 = vcmp.gt.f32.partialorder %v4247_v37, 0.0  ;;  %v4270_v48 = vmul.f32 %v4766_v49, %v4247_v37 }
 0x55d   : > { %4285 = vst [vmem:[%s7133_s12 + $0x10] sm:$0xff] %v4277_v34  ;;  %v4275_v47 = vsel %vm4253_vm11, %v4244_v46, %v4267_v25  ;;  %vm4254_vm4 = vcmp.gt.f32.partialorder %v4245_v5, 0.0  ;;  %v4268_v21 = vmul.f32 %v4766_v49, %v4245_v5 }
 0x55e   : > { %4283 = vst [vmem:[%s7133_s12] sm:$0xff] %v4275_v47  ;;  %v4278_v17 = vsel %vm4256_vm12, %v4247_v37, %v4270_v48 }
 0x55f   : > { %4286 = vst [vmem:[%s7133_s12 + $0x18] sm:$0xff] %v4278_v17  ;;  %v4276_v60 = vsel %vm4254_vm4, %v4245_v5, %v4268_v21  ;;  %v5417_v54 = vpop.f32.mrb[4].mxu1 }
 0x560   : > { %4284 = vst [vmem:[%s7133_s12 + $0x8] sm:$0xff] %v4276_v60  ;;  %v4250_v9 = vadd.f32 %v5417_v54, %v4765_v19  ;;  %v4214_v32 = vpop.f32.mrb[5].mxu1 }
 0x561   : > { %v4248_v13 = vadd.f32 %v4765_v19, %v4214_v32  ;;  %v5418_v38 = vpop.f32.mrb[6].mxu1 }
 0x562   : > { %vm4259_vm15 = vcmp.gt.f32.partialorder %v4250_v9, 0.0  ;;  %v4273_v33 = vmul.f32 %v4766_v49, %v4250_v9  ;;  %v4251_v27 = vadd.f32 %v5418_v38, %v4765_v19  ;;  %v4217_v1 = vpop.f32.mrb[7].mxu1 }
 0x563   : > { %vm4257_vm3 = vcmp.gt.f32.partialorder %v4248_v13, 0.0  ;;  %v4271_v28 = vmul.f32 %v4766_v49, %v4248_v13  ;;  %v4249_v23 = vadd.f32 %v4765_v19, %v4217_v1 }
 0x564   : > { %v4281_v4 = vsel %vm4259_vm15, %v4250_v9, %v4273_v33  ;;  %vm4260_vm14 = vcmp.gt.f32.partialorder %v4251_v27, 0.0  ;;  %v4274_v20 = vmul.f32 %v4766_v49, %v4251_v27 }
 0x565   : > { %4289 = vst [vmem:[%s7133_s12 + $0x30] sm:$0xff] %v4281_v4  ;;  %v4279_v53 = vsel %vm4257_vm3, %v4248_v13, %v4271_v28  ;;  %vm4258_vm10 = vcmp.gt.f32.partialorder %v4249_v23, 0.0  ;;  %v4272_v29 = vmul.f32 %v4766_v49, %v4249_v23 }
 0x566   : > { %4287 = vst [vmem:[%s7133_s12 + $0x20] sm:$0xff] %v4279_v53  ;;  %v4282_v7 = vsel %vm4260_vm14, %v4251_v27, %v4274_v20 }
 0x567   : > { %4290 = vst [vmem:[%s7133_s12 + $0x38] sm:$0xff] %v4282_v7  ;;  %v4280_v36 = vsel %vm4258_vm10, %v4249_v23, %v4272_v29 }
 0x568   : > { %4288 = vst [vmem:[%s7133_s12 + $0x28] sm:$0xff] %v4280_v36 }
 0x569 PF: > { %s17_s24 = sadd.s32 1, %s5721_s24  }
 0x56a   : > { %p14_p4 = scmp.ge.s32.totalorder %s17_s24, 4  }
 0x56c   :  { %16 = sbr.rel (!%p14_p4) target bundleno = 1 (0x1), region = 94 }

</bundles_post_ra>
